<compile_context>
chip_gen: v7x
topology: tpu7x:2x2x1
jax: 0.10.0
libtpu: 0.0.40
codegen_flags: <defaults>
</compile_context>

<pallas_src>
import math

import jax
import jax.numpy as jnp
from jax.experimental import pallas as pl
from jax.experimental.pallas import tpu as pltpu


def _mlp_head_kernel(x_ref, w1_ref, b1_ref, w2_ref, b2_ref,
                     pooled_ref, out_ref):
    # x_ref: [TN, C, S] -- native ROI-pool layout, S = T*H*W on the lane axis.
    x = x_ref[...]

    # AdaptiveMaxPool3d((1,1,1)) == max over S.  Lane reduce over the ref's
    # *logical* S extent (Mosaic masks the padded lanes) -- hidden behind DMA.
    pooled = jnp.max(x, axis=-1)                                  # [TN, C]
    pooled_ref[...] = pooled.astype(pooled_ref.dtype)

    # fc1 -> ReLU  (bf16 MXU operands, f32 accumulation, f32 bias/ReLU).
    h = jnp.dot(pooled.astype(jnp.bfloat16), w1_ref[...],
                preferred_element_type=jnp.float32) + b1_ref[...]  # [TN, R]
    h = jnp.maximum(h, 0.0)

    # fc2 -> ReLU
    y = jnp.dot(h.astype(jnp.bfloat16), w2_ref[...],
                preferred_element_type=jnp.float32) + b2_ref[...]  # [TN, R]
    y = jnp.maximum(y, 0.0)

    out_ref[...] = y.astype(out_ref.dtype)


def _round_up(x, m):
    return (x + m - 1) // m * m


def _round_down(x, m):
    return (x // m) * m


def _sublane_multiple(dtype):
    # f32 -> 8, bf16 -> 16, int8 -> 32 (sub-32-bit dtypes pack along sublanes).
    return 8 * max(1, 4 // jnp.dtype(dtype).itemsize)


def mlp_feature_extractor_forward(x_roi, w1, b1, w2, b2, *, core_parallel=False):
    """x_roi: [N, C, T, H, W] ROI-pooled features (post `self.pooler`).
       Best fed as bf16 (halves the dominant HBM read); f32 also works.

    w1: [C, R] (transposed torch fc1.weight), b1: [R]
    w2: [R, R] (transposed torch fc2.weight), b2: [R]

    Returns:
      x_after:       [N, R]            (MLP head output, x_roi.dtype)
      person_pooled: [N, C, 1, 1, 1]   (AdaptiveMaxPool3d output, x_roi.dtype)
    """
    n, c, t, hh, ww = x_roi.shape
    s = t * hh * ww
    r = w1.shape[1]
    x_dtype = x_roi.dtype
    itemsize = jnp.dtype(x_dtype).itemsize

    if n == 0:  # zero-proposal safe path (mirrors max_pooling_zero_safe intent)
        return (jnp.zeros((0, r), x_dtype), jnp.zeros((0, c, 1, 1, 1), x_dtype))

    # Native layout: merge T*H*W -> S.  Contiguous trailing-dim merge == free
    # (no HBM copy), unlike the previous version's transpose pass.
    x3 = x_roi.reshape(n, c, s)

    # ---- per-generation VMEM budgeting --------------------------------------
    try:
        vmem_cap = int(pltpu.get_tpu_info().vmem_capacity_bytes)
    except Exception:
        vmem_cap = 64 << 20            # conservative: v7x per-TC physical VMEM

    s_pad = _round_up(s, 128)                          # lane padding (49 -> 128)
    c_pad = _round_up(c, _sublane_multiple(x_dtype))   # sublane padding
    row_bytes = c_pad * s_pad * itemsize               # one N-row of an x tile

    weights_bytes = ((_round_up(c, 16) * _round_up(r, 128)
                      + _round_up(r, 16) * _round_up(r, 128)) * 2)  # bf16
    # ~65% of VMEM for the two pipelined x buffers; rest for weights, output
    # tiles and compiler scratch headroom (works for 64 MiB v7x and 128 MiB
    # v5e/v6e alike).
    x_budget = max(4 << 20, int(vmem_cap * 0.65) - 2 * weights_bytes)

    tn = _round_down(x_budget // (2 * row_bytes), 8)
    tn = max(8, min(tn, 512))
    if n <= 8:
        tn = n                         # block == full array dim on the N axis
    else:
        tn = min(tn, _round_down(n, 8))

    out_bytes = 2 * _round_up(tn, _sublane_multiple(x_dtype)) * (
        _round_up(c, 128) + _round_up(r, 128)) * itemsize
    vmem_est = 2 * tn * row_bytes + 2 * weights_bytes + out_bytes + (2 << 20)
    vmem_limit = int(min(max(int(vmem_est * 1.25), 8 << 20),
                         int(vmem_cap * 0.85)))

    # bf16 weights (half the resident VMEM, native MXU rate); f32 biases.
    w1b = w1.astype(jnp.bfloat16)
    w2b = w2.astype(jnp.bfloat16)
    b1f = b1.reshape(1, r).astype(jnp.float32)
    b2f = b2.reshape(1, r).astype(jnp.float32)

    bytes_accessed = (n * c * s * itemsize          # dominant x read
                      + weights_bytes + 2 * r * 4   # weights / biases
                      + n * (c + r) * itemsize)     # outputs
    cost = pl.CostEstimate(flops=2 * n * (c * r + r * r),
                           transcendentals=0,
                           bytes_accessed=int(bytes_accessed))

    # TODO(synk): on v7x, verify the N axis actually shards across both
    # TensorCores with plain "parallel"; if not, call with core_parallel=True
    # (pltpu.CORE_PARALLEL).  No-op concern on single-TC v5e/v6e.
    dim_sem = (pltpu.CORE_PARALLEL,) if core_parallel else ("parallel",)

    grid = (pl.cdiv(n, tn),)           # ragged last tile handled by masking

    def build(single_buffer_weights):
        w_kwargs = (dict(pipeline_mode=pl.Buffered(1))
                    if single_buffer_weights else {})
        return pl.pallas_call(
            _mlp_head_kernel,
            out_shape=(
                jax.ShapeDtypeStruct((n, c), x_dtype),
                jax.ShapeDtypeStruct((n, r), x_dtype),
            ),
            grid=grid,
            in_specs=[
                pl.BlockSpec((tn, c, s), lambda i: (i, 0, 0)),        # pipelined x
                pl.BlockSpec((c, r), lambda i: (0, 0), **w_kwargs),   # w1 resident
                pl.BlockSpec((1, r), lambda i: (0, 0), **w_kwargs),   # b1 resident
                pl.BlockSpec((r, r), lambda i: (0, 0), **w_kwargs),   # w2 resident
                pl.BlockSpec((1, r), lambda i: (0, 0), **w_kwargs),   # b2 resident
            ],
            out_specs=(
                pl.BlockSpec((tn, c), lambda i: (i, 0)),
                pl.BlockSpec((tn, r), lambda i: (i, 0)),
            ),
            compiler_params=pltpu.CompilerParams(
                dimension_semantics=dim_sem,
                vmem_limit_bytes=vmem_limit,
            ),
            cost_estimate=cost,
        )

    try:
        # Invariant operands single-buffered (frees ~2x weight VMEM -> bigger tn).
        pooled, x_after = build(True)(x3, w1b, b1f, w2b, b2f)
    except Exception:
        # Fallback if this JAX build rejects Buffered(1) on invariant operands.
        pooled, x_after = build(False)(x3, w1b, b1f, w2b, b2f)

    person_pooled = pooled.reshape(n, c, 1, 1, 1)
    return x_after, person_pooled


def kaiming_uniform_a1(key, fan_out, fan_in, dtype=jnp.float32):
    # nn.init.kaiming_uniform_(w, a=1): bound = sqrt(6 / ((1 + a^2) * fan_in))
    bound = math.sqrt(6.0 / (2.0 * fan_in))
    # PyTorch Linear weight is [out, in]; store transposed [in, out] so the
    # kernel computes `pooled @ w`.
    w = jax.random.uniform(key, (fan_out, fan_in), dtype=dtype,
                           minval=-bound, maxval=bound)
    return jnp.transpose(w)


if __name__ == "__main__":
    # Small shapes consistent with the module's forward:
    #   N proposals (deliberately not a multiple of the tile -> exercises the
    #   ragged last tile), C = dim_in, T = 1 (features are time-averaged around
    #   the pooler), H = W = POOLER_RESOLUTION, R = MLP_HEAD_DIM.  C and R kept
    #   at 128 so all stores are lane-dense (production dims are multiples
    #   of 128).
    N, C, T, H, W = 10, 128, 1, 7, 7
    R = 128

    key = jax.random.PRNGKey(0)
    kx, k1, k2 = jax.random.split(key, 3)

    # bf16 activations = the recommended production path (upstream ROI pooler
    # emits bf16): halves the dominant HBM read relative to f32.
    x_roi = jax.random.normal(
        kx, (N, C, T, H, W), dtype=jnp.float32).astype(jnp.bfloat16)

    w1 = kaiming_uniform_a1(k1, R, C)   # fc1: [C, R] (transposed torch [R, C])
    b1 = jnp.zeros((R,), jnp.float32)   # nn.init.constant_(bias, 0)
    w2 = kaiming_uniform_a1(k2, R, R)   # fc2: [R, R]
    b2 = jnp.zeros((R,), jnp.float32)

    x_after, person_pooled = mlp_feature_extractor_forward(x_roi, w1, b1, w2, b2)
    jax.block_until_ready((x_after, person_pooled))

    # Reference in plain JAX (same bf16-operand / f32-accumulate semantics;
    # person_pooled is exact since max is monotone under the bf16 input).
    pooled_ref = jnp.max(x_roi.astype(jnp.float32).reshape(N, C, -1), axis=-1)
    w1b = w1.astype(jnp.bfloat16)
    w2b = w2.astype(jnp.bfloat16)
    h_ref = jnp.maximum(
        jnp.dot(pooled_ref.astype(jnp.bfloat16), w1b,
                preferred_element_type=jnp.float32) + b1, 0.0)
    y_ref = jnp.maximum(
        jnp.dot(h_ref.astype(jnp.bfloat16), w2b,
                preferred_element_type=jnp.float32) + b2, 0.0)

    assert person_pooled.shape == (N, C, 1, 1, 1)
    assert x_after.shape == (N, R)
    assert jnp.allclose(person_pooled.reshape(N, C).astype(jnp.float32),
                        pooled_ref, atol=1e-6)
    # x_after is emitted in the input dtype (bf16 here): tolerance covers the
    # final bf16 rounding of the f32 accumulator.
    assert jnp.allclose(x_after.astype(jnp.float32), y_ref,
                        atol=3e-2, rtol=3e-2)

    print("KERNEL_OK")
</pallas_src>

<mosaic_0001>
module attributes {stable_mosaic.version = 11 : i64} {
  func.func @_mlp_head_kernel(%arg0: i32, %arg1: memref<8x128x49xbf16, #tpu.memory_space<vmem>>, %arg2: memref<128x128xbf16, #tpu.memory_space<vmem>>, %arg3: memref<1x128xf32, #tpu.memory_space<vmem>>, %arg4: memref<128x128xbf16, #tpu.memory_space<vmem>>, %arg5: memref<1x128xf32, #tpu.memory_space<vmem>>, %arg6: memref<8x128xbf16, #tpu.memory_space<vmem>>, %arg7: memref<8x128xbf16, #tpu.memory_space<vmem>>) attributes {dimension_semantics = [#tpu.dimension_semantics<parallel>], iteration_bounds = array<i64: 2>, scalar_prefetch = 0 : i64, scratch_operands = 0 : i64, tpu.core_type = #tpu.core_type<tc>, window_params = [{transform_indices = @transform_0, window_bounds = array<i64: 8, 128, 49>}, {pipeline_mode = #tpu.pipeline_mode<synchronous>, transform_indices = @transform_1, window_bounds = array<i64: 128, 128>}, {pipeline_mode = #tpu.pipeline_mode<synchronous>, transform_indices = @transform_2, window_bounds = array<i64: 1, 128>}, {pipeline_mode = #tpu.pipeline_mode<synchronous>, transform_indices = @transform_3, window_bounds = array<i64: 128, 128>}, {pipeline_mode = #tpu.pipeline_mode<synchronous>, transform_indices = @transform_4, window_bounds = array<i64: 1, 128>}, {transform_indices = @transform_5, window_bounds = array<i64: 8, 128>}, {transform_indices = @transform_6, window_bounds = array<i64: 8, 128>}]} {
    %c0 = arith.constant 0 : index
    %c0_0 = arith.constant 0 : index
    %c0_1 = arith.constant 0 : index
    %0 = vector.load %arg1[%c0, %c0_0, %c0_1] : memref<8x128x49xbf16, #tpu.memory_space<vmem>>, vector<8x128x49xbf16>
    %cst = arith.constant dense<0xFF80> : vector<8x128xbf16>
    %1 = vector.multi_reduction <maximumf>, %0, %cst [2] : vector<8x128x49xbf16> to vector<8x128xbf16>
    %c0_2 = arith.constant 0 : index
    %c0_3 = arith.constant 0 : index
    %2 = vector.load %arg6[%c0_2, %c0_3] : memref<8x128xbf16, #tpu.memory_space<vmem>>, vector<8x128xbf16>
    tpu.vector_store %arg6[%c0_2, %c0_3], %1 {strides = array<i32>} : memref<8x128xbf16, #tpu.memory_space<vmem>>, vector<8x128xbf16>,
    %c0_4 = arith.constant 0 : index
    %c0_5 = arith.constant 0 : index
    %3 = vector.load %arg2[%c0_4, %c0_5] : memref<128x128xbf16, #tpu.memory_space<vmem>>, vector<128x128xbf16>
    %cst_6 = arith.constant dense<0.000000e+00> : vector<8x128xf32>
    %4 = tpu.matmul %1, %3, %cst_6 {dimension_numbers = #tpu.dot_dimension_numbers<[1], [0], [0], [1], [0, 0, 1, 1], [], []>} : vector<8x128xbf16>, vector<128x128xbf16>, vector<8x128xf32> -> vector<8x128xf32>
    %c0_7 = arith.constant 0 : index
    %c0_8 = arith.constant 0 : index
    %5 = vector.load %arg3[%c0_7, %c0_8] : memref<1x128xf32, #tpu.memory_space<vmem>>, vector<1x128xf32>
    %6 = vector.broadcast %5 : vector<1x128xf32> to vector<8x128xf32>
    %7 = arith.addf %4, %6 : vector<8x128xf32>
    %cst_9 = arith.constant 0.000000e+00 : f32
    %8 = vector.broadcast %cst_9 : f32 to vector<8x128xf32>
    %9 = arith.maximumf %7, %8 : vector<8x128xf32>
    %10 = arith.truncf %9 : vector<8x128xf32> to vector<8x128xbf16>
    %c0_10 = arith.constant 0 : index
    %c0_11 = arith.constant 0 : index
    %11 = vector.load %arg4[%c0_10, %c0_11] : memref<128x128xbf16, #tpu.memory_space<vmem>>, vector<128x128xbf16>
    %cst_12 = arith.constant dense<0.000000e+00> : vector<8x128xf32>
    %12 = tpu.matmul %10, %11, %cst_12 {dimension_numbers = #tpu.dot_dimension_numbers<[1], [0], [0], [1], [0, 0, 1, 1], [], []>} : vector<8x128xbf16>, vector<128x128xbf16>, vector<8x128xf32> -> vector<8x128xf32>
    %c0_13 = arith.constant 0 : index
    %c0_14 = arith.constant 0 : index
    %13 = vector.load %arg5[%c0_13, %c0_14] : memref<1x128xf32, #tpu.memory_space<vmem>>, vector<1x128xf32>
    %14 = vector.broadcast %13 : vector<1x128xf32> to vector<8x128xf32>
    %15 = arith.addf %12, %14 : vector<8x128xf32>
    %cst_15 = arith.constant 0.000000e+00 : f32
    %16 = vector.broadcast %cst_15 : f32 to vector<8x128xf32>
    %17 = arith.maximumf %15, %16 : vector<8x128xf32>
    %18 = arith.truncf %17 : vector<8x128xf32> to vector<8x128xbf16>
    %c0_16 = arith.constant 0 : index
    %c0_17 = arith.constant 0 : index
    %19 = vector.load %arg7[%c0_16, %c0_17] : memref<8x128xbf16, #tpu.memory_space<vmem>>, vector<8x128xbf16>
    tpu.vector_store %arg7[%c0_16, %c0_17], %18 {strides = array<i32>} : memref<8x128xbf16, #tpu.memory_space<vmem>>, vector<8x128xbf16>,
    return
  }
  func.func @transform_0(%arg0: i32) -> (i32, i32, i32) {
    %c0_i32 = arith.constant 0 : i32
    %c0_i32_0 = arith.constant 0 : i32
    %c0_i32_1 = arith.constant 0 : i32
    return %arg0, %c0_i32, %c0_i32_0 : i32, i32, i32
  }
  func.func @transform_1(%arg0: i32) -> (i32, i32) {
    %c0_i32 = arith.constant 0 : i32
    %c0_i32_0 = arith.constant 0 : i32
    %c0_i32_1 = arith.constant 0 : i32
    return %c0_i32, %c0_i32_0 : i32, i32
  }
  func.func @transform_2(%arg0: i32) -> (i32, i32) {
    %c0_i32 = arith.constant 0 : i32
    %c0_i32_0 = arith.constant 0 : i32
    %c0_i32_1 = arith.constant 0 : i32
    return %c0_i32, %c0_i32_0 : i32, i32
  }
  func.func @transform_3(%arg0: i32) -> (i32, i32) {
    %c0_i32 = arith.constant 0 : i32
    %c0_i32_0 = arith.constant 0 : i32
    %c0_i32_1 = arith.constant 0 : i32
    return %c0_i32, %c0_i32_0 : i32, i32
  }
  func.func @transform_4(%arg0: i32) -> (i32, i32) {
    %c0_i32 = arith.constant 0 : i32
    %c0_i32_0 = arith.constant 0 : i32
    %c0_i32_1 = arith.constant 0 : i32
    return %c0_i32, %c0_i32_0 : i32, i32
  }
  func.func @transform_5(%arg0: i32) -> (i32, i32) {
    %c0_i32 = arith.constant 0 : i32
    %c0_i32_0 = arith.constant 0 : i32
    return %arg0, %c0_i32 : i32, i32
  }
  func.func @transform_6(%arg0: i32) -> (i32, i32) {
    %c0_i32 = arith.constant 0 : i32
    %c0_i32_0 = arith.constant 0 : i32
    return %arg0, %c0_i32 : i32, i32
  }
}

module attributes {stable_mosaic.version = 11 : i64} {
  func.func @_mlp_head_kernel(%arg0: i32, %arg1: memref<8x128x49xbf16, #tpu.memory_space<vmem>>, %arg2: memref<128x128xbf16, #tpu.memory_space<vmem>>, %arg3: memref<1x128xf32, #tpu.memory_space<vmem>>, %arg4: memref<128x128xbf16, #tpu.memory_space<vmem>>, %arg5: memref<1x128xf32, #tpu.memory_space<vmem>>, %arg6: memref<8x128xbf16, #tpu.memory_space<vmem>>, %arg7: memref<8x128xbf16, #tpu.memory_space<vmem>>) attributes {dimension_semantics = [#tpu.dimension_semantics<parallel>], iteration_bounds = array<i64: 2>, scalar_prefetch = 0 : i64, scratch_operands = 0 : i64, tpu.core_type = #tpu.core_type<tc>, window_params = [{transform_indices = @transform_0, window_bounds = array<i64: 8, 128, 49>}, {pipeline_mode = #tpu.pipeline_mode<synchronous>, transform_indices = @transform_1, window_bounds = array<i64: 128, 128>}, {pipeline_mode = #tpu.pipeline_mode<synchronous>, transform_indices = @transform_2, window_bounds = array<i64: 1, 128>}, {pipeline_mode = #tpu.pipeline_mode<synchronous>, transform_indices = @transform_3, window_bounds = array<i64: 128, 128>}, {pipeline_mode = #tpu.pipeline_mode<synchronous>, transform_indices = @transform_4, window_bounds = array<i64: 1, 128>}, {transform_indices = @transform_5, window_bounds = array<i64: 8, 128>}, {transform_indices = @transform_6, window_bounds = array<i64: 8, 128>}]} {
    %c0 = arith.constant 0 : index
    %c0_0 = arith.constant 0 : index
    %c0_1 = arith.constant 0 : index
    %0 = vector.load %arg1[%c0, %c0_0, %c0_1] : memref<8x128x49xbf16, #tpu.memory_space<vmem>>, vector<8x128x49xbf16>
    %cst = arith.constant dense<0xFF80> : vector<8x128xbf16>
    %1 = vector.multi_reduction <maximumf>, %0, %cst [2] : vector<8x128x49xbf16> to vector<8x128xbf16>
    %c0_2 = arith.constant 0 : index
    %c0_3 = arith.constant 0 : index
    %2 = vector.load %arg6[%c0_2, %c0_3] : memref<8x128xbf16, #tpu.memory_space<vmem>>, vector<8x128xbf16>
    tpu.vector_store %arg6[%c0_2, %c0_3], %1 {strides = array<i32>} : memref<8x128xbf16, #tpu.memory_space<vmem>>, vector<8x128xbf16>,
    %c0_4 = arith.constant 0 : index
    %c0_5 = arith.constant 0 : index
    %3 = vector.load %arg2[%c0_4, %c0_5] : memref<128x128xbf16, #tpu.memory_space<vmem>>, vector<128x128xbf16>
    %cst_6 = arith.constant dense<0.000000e+00> : vector<8x128xf32>
    %4 = tpu.matmul %1, %3, %cst_6 {dimension_numbers = #tpu.dot_dimension_numbers<[1], [0], [0], [1], [0, 0, 1, 1], [], []>} : vector<8x128xbf16>, vector<128x128xbf16>, vector<8x128xf32> -> vector<8x128xf32>
    %c0_7 = arith.constant 0 : index
    %c0_8 = arith.constant 0 : index
    %5 = vector.load %arg3[%c0_7, %c0_8] : memref<1x128xf32, #tpu.memory_space<vmem>>, vector<1x128xf32>
    %6 = vector.broadcast %5 : vector<1x128xf32> to vector<8x128xf32>
    %7 = arith.addf %4, %6 : vector<8x128xf32>
    %cst_9 = arith.constant 0.000000e+00 : f32
    %8 = vector.broadcast %cst_9 : f32 to vector<8x128xf32>
    %9 = arith.maximumf %7, %8 : vector<8x128xf32>
    %10 = arith.truncf %9 : vector<8x128xf32> to vector<8x128xbf16>
    %c0_10 = arith.constant 0 : index
    %c0_11 = arith.constant 0 : index
    %11 = vector.load %arg4[%c0_10, %c0_11] : memref<128x128xbf16, #tpu.memory_space<vmem>>, vector<128x128xbf16>
    %cst_12 = arith.constant dense<0.000000e+00> : vector<8x128xf32>
    %12 = tpu.matmul %10, %11, %cst_12 {dimension_numbers = #tpu.dot_dimension_numbers<[1], [0], [0], [1], [0, 0, 1, 1], [], []>} : vector<8x128xbf16>, vector<128x128xbf16>, vector<8x128xf32> -> vector<8x128xf32>
    %c0_13 = arith.constant 0 : index
    %c0_14 = arith.constant 0 : index
    %13 = vector.load %arg5[%c0_13, %c0_14] : memref<1x128xf32, #tpu.memory_space<vmem>>, vector<1x128xf32>
    %14 = vector.broadcast %13 : vector<1x128xf32> to vector<8x128xf32>
    %15 = arith.addf %12, %14 : vector<8x128xf32>
    %cst_15 = arith.constant 0.000000e+00 : f32
    %16 = vector.broadcast %cst_15 : f32 to vector<8x128xf32>
    %17 = arith.maximumf %15, %16 : vector<8x128xf32>
    %18 = arith.truncf %17 : vector<8x128xf32> to vector<8x128xbf16>
    %c0_16 = arith.constant 0 : index
    %c0_17 = arith.constant 0 : index
    %19 = vector.load %arg7[%c0_16, %c0_17] : memref<8x128xbf16, #tpu.memory_space<vmem>>, vector<8x128xbf16>
    tpu.vector_store %arg7[%c0_16, %c0_17], %18 {strides = array<i32>} : memref<8x128xbf16, #tpu.memory_space<vmem>>, vector<8x128xbf16>,
    return
  }
  func.func @transform_0(%arg0: i32) -> (i32, i32, i32) {
    %c0_i32 = arith.constant 0 : i32
    %c0_i32_0 = arith.constant 0 : i32
    %c0_i32_1 = arith.constant 0 : i32
    return %arg0, %c0_i32, %c0_i32_0 : i32, i32, i32
  }
  func.func @transform_1(%arg0: i32) -> (i32, i32) {
    %c0_i32 = arith.constant 0 : i32
    %c0_i32_0 = arith.constant 0 : i32
    %c0_i32_1 = arith.constant 0 : i32
    return %c0_i32, %c0_i32_0 : i32, i32
  }
  func.func @transform_2(%arg0: i32) -> (i32, i32) {
    %c0_i32 = arith.constant 0 : i32
    %c0_i32_0 = arith.constant 0 : i32
    %c0_i32_1 = arith.constant 0 : i32
    return %c0_i32, %c0_i32_0 : i32, i32
  }
  func.func @transform_3(%arg0: i32) -> (i32, i32) {
    %c0_i32 = arith.constant 0 : i32
    %c0_i32_0 = arith.constant 0 : i32
    %c0_i32_1 = arith.constant 0 : i32
    return %c0_i32, %c0_i32_0 : i32, i32
  }
  func.func @transform_4(%arg0: i32) -> (i32, i32) {
    %c0_i32 = arith.constant 0 : i32
    %c0_i32_0 = arith.constant 0 : i32
    %c0_i32_1 = arith.constant 0 : i32
    return %c0_i32, %c0_i32_0 : i32, i32
  }
  func.func @transform_5(%arg0: i32) -> (i32, i32) {
    %c0_i32 = arith.constant 0 : i32
    %c0_i32_0 = arith.constant 0 : i32
    return %arg0, %c0_i32 : i32, i32
  }
  func.func @transform_6(%arg0: i32) -> (i32, i32) {
    %c0_i32 = arith.constant 0 : i32
    %c0_i32_0 = arith.constant 0 : i32
    return %arg0, %c0_i32 : i32, i32
  }
}

</mosaic_0001>

<bundles_post_ra>
// kernel: tpu_custom_call.1
= control target key start
LH: loop header
LB: loop body
LE: loop exit
PB: predicated region body
PF: predicated region fallthrough
CT: control target
= control target key end

     0   :  { %12 = vsyncpa [#allocation3], 0  ;;  %s5738_s0 = inlined_call_operand.vmem [shape: bf16[10,128,49], index: 0, kind: input, shape index: {}]   ;;  %s5739_s1 = inlined_call_operand.vmem [shape: bf16[128,128], index: 1, kind: input, shape index: {}]   ;;  %s5740_s2 = inlined_call_operand.vmem [shape: f32[1,128], index: 2, kind: input, shape index: {}]   ;;  %s5741_s3 = inlined_call_operand.vmem [shape: bf16[128,128], index: 3, kind: input, shape index: {}]   ;;  %s5742_s4 = inlined_call_operand.vmem [shape: f32[1,128], index: 4, kind: input, shape index: {}]   ;;  %s5743_s5 = inlined_call_operand.hbm [shape: bf16[10,128], index: 5, kind: output, shape index: {0}]   ;;  %s5744_s6 = inlined_call_operand.hbm [shape: bf16[10,128], index: 6, kind: output, shape index: {1}]  }
   0x1   :  { %14 = vsyncpa [#allocation3 + $0x1], 0 }
   0x2   :  { %15 = vsyncpa [#allocation5], 0 }
   0x3   :  { %17 = vsyncpa [#allocation5 + $0x1], 0  ;;  %s4372_s21 = smov 0   ;;  %s4374_s22 = smov 0  }
   0x4   :  { %s4376_s23 = smov 0   ;;  %s4378_s24 = smov 0  }
   0x5 LB: > { %s4393_s25 = sadd.s32 4294967295, %s4329_s24   ;;  %s3951_s26 = sadd.s32 4294967294, %s4329_s24   ;;  %s4329_s24 = sphi %s4378_s24, %s5750_s24   ;;  %s4325_s23 = sphi %s4376_s23, %s5749_s23   ;;  %s4321_s22 = sphi %s4374_s22, %s5748_s22   ;;  %s4317_s21 = sphi %s4372_s21, %s5747_s21  }
   0x6   : > { %s4397_s27 = sadd.s32 1, %s4329_s24   ;;  %s140_s28 = sadd.s32 1, %s4325_s23 }
   0x7   : > { %s137_s29 = ssub.s32 %s4329_s24, %s4397_s27  ;;  %p150_p0 = scmp.ne.s32.totalorder %s4325_s23, %s4321_s22 }
   0x8   : > { %p138_p1 = scmp.eq.s32.totalorder %s137_s29, 0  ;;  %p151_p2 = scmp.eq.s32.totalorder %s4393_s25, 1 }
   0x9   : > { %p156_p3 = scmp.ne.s32.totalorder %s4321_s22, %s4317_s21  ;;  %p157_p4 = scmp.eq.s32.totalorder %s3951_s26, 1 }
   0xa   : > { %s4408_s30 = scalar_select %p138_p1, %s4325_s23, %s140_s28  }
   0xb   : > { %p4410_p5 = por %p151_p2, %p150_p0  ;;  %p4414_p6 = por %p157_p4, %p156_p3 }
   0xc   : > { %p3954_p7 = scmp.ge.s32.totalorder %s4329_s24, 1  ;;  %p233_p8 = scmp.lt.s32.totalorder %s4329_s24, 3 }
   0xe   : > { %p234_p9 = pnand %p3954_p7, %p233_p8 }
   0xf   : > { %s3957_s9 = sshll.u32 (!%p234_p9), %s4393_s25, 3  ;;  %vm741_vm0 = vcmask (!%p234_p9), 400384   ;;  %vm2162_vm1 = vcmask (!%p234_p9), 130112   ;;  %vm2169_vm2 = vcmask (!%p234_p9), 195712   ;;  %vm2176_vm3 = vcmask (!%p234_p9), 261312   ;;  %s5625_s12 = sand.u32 (!%p234_p9), 1, %s4321_s22  }
  0x10   : > { %237 = sbr.rel (%p234_p9) target bundleno = 883 (0x373), region = 40  ;;  %p280_p10 = scmp.lt.s32.totalorder (!%p234_p9), %s3957_s9, 9  ;;  %vm2183_vm4 = vcmask (!%p234_p9), 326912   ;;  %vm2190_vm5 = vcmask (!%p234_p9), 392512   ;;  %vm2197_vm6 = vcmask (!%p234_p9), 458112   ;;  %vm2204_vm7 = vcmask (!%p234_p9), 523712  }
  0x11   : > { %vm2211_vm8 = vcmask (!%p234_p9), 589312   ;;  %vm2218_vm9 = vcmask (!%p234_p9), 654912   ;;  %vm2225_vm10 = vcmask (!%p234_p9), 720512   ;;  %vm4334_vm11 = vmmov (!%p234_p9), 0   ;;  %s4044_s26 = sshll.u32 (!%p234_p9), %s4393_s25, 6  ;;  %s3829_s11 = scalar_lea.sflag (!%p234_p9), [#allocation3], %s5625_s12 }
  0x12   : > { %vm2232_vm12 = vcmask (!%p234_p9), 786112   ;;  %vm2239_vm13 = vcmask (!%p234_p9), 851712   ;;  %vm2246_vm14 = vcmask (!%p234_p9), 917312   ;;  %vm2253_vm15 = vcmask (!%p234_p9), 982912   ;;  %s4335_s16 = smov (!%p234_p9), [#allocation2]  }
  0x13   : > { %s4239_s17 = sshll.u32 (!%p234_p9), %s4335_s16, 4  ;;  %s4240_s17 = int_to_ptr.vmem [resolvable:$false] %s4239_s17 }
  0x14   : > { %s4241_s18 = scalar_lea.vmem (!%p234_p9), %s4240_s17, 128 }
  0x17   : > { %s5752_s9 = smov (!%p280_p10, %s3957_s9), 9 }
  0x18   : > { %s4048_s10 = sshll.u32 %s5752_s9, 6  ;;  %s5665_s9 = scalar_lea.hbm %s5743_s5, %s4044_s26 }
  0x19   : > { %s4424_s13 = scalar_lea.vmem %s5738_s0, %s4048_s10 }
  0x1a   : > { %v4155_v0 = vld [vmem:[%s4424_s13 + $0x8] sm:$0xff]   ;;  %v4156_v1 = vld [vmem:[%s4424_s13] sm:$0xff]   ;;  %v4161_v12 = vld [vmem:[%s4424_s13 + $0x10] sm:$0xff]  }
  0x1b   : > { %v749_v2 = vsel %vm741_vm0, %v4155_v0, 4286644096  ;;  %v744_v3 = vsel %vm741_vm0, %v4156_v1, 4286644096  ;;  %v4157_v4 = vld [vmem:[%s4424_s13 + $0x48] sm:$0xff]   ;;  %v4158_v5 = vld [vmem:[%s4424_s13 + $0x40] sm:$0xff]  }
  0x1c   : > { %751 = vmax.xlane.bf16.xlu1 %v749_v2  ;;  %746 = vmax.xlane.bf16.xlu0 %v744_v3  ;;  %v789_v6 = vsel %vm741_vm0, %v4157_v4, 4286644096  ;;  %v784_v7 = vsel %vm741_vm0, %v4158_v5, 4286644096  ;;  %v4159_v8 = vld [vmem:[%s4424_s13 + $0x88] sm:$0xff]   ;;  %v4160_v9 = vld [vmem:[%s4424_s13 + $0x80] sm:$0xff]  }
  0x1d   : > { %v829_v10 = vsel %vm741_vm0, %v4159_v8, 4286644096  ;;  %v824_v11 = vsel %vm741_vm0, %v4160_v9, 4286644096  ;;  %v4162_v13 = vld [vmem:[%s4424_s13 + $0xc0] sm:$0xff]   ;;  %v4163_v16 = vld [vmem:[%s4424_s13 + $0xc8] sm:$0xff]  }
  0x1e   : > { %v754_v14 = vsel %vm741_vm0, %v4161_v12, 4286644096  ;;  %v864_v15 = vsel %vm741_vm0, %v4162_v13, 4286644096  ;;  %v4164_v17 = vld [vmem:[%s4424_s13 + $0x50] sm:$0xff]   ;;  %v4166_v21 = vld [vmem:[%s4424_s13 + $0x100] sm:$0xff]  }
  0x1f   : > { %v869_v18 = vsel %vm741_vm0, %v4163_v16, 4286644096  ;;  %v794_v19 = vsel %vm741_vm0, %v4164_v17, 4286644096  ;;  %v4165_v20 = vld [vmem:[%s4424_s13 + $0x90] sm:$0xff]   ;;  %v4167_v24 = vld [vmem:[%s4424_s13 + $0x140] sm:$0xff]  }
  0x20   : > { %v834_v22 = vsel %vm741_vm0, %v4165_v20, 4286644096  ;;  %v904_v23 = vsel %vm741_vm0, %v4166_v21, 4286644096  ;;  %v4168_v25 = vld [vmem:[%s4424_s13 + $0x108] sm:$0xff]   ;;  %v4169_v28 = vld [vmem:[%s4424_s13 + $0x58] sm:$0xff]  }
  0x21   : > { %v944_v26 = vsel %vm741_vm0, %v4167_v24, 4286644096  ;;  %v909_v27 = vsel %vm741_vm0, %v4168_v25, 4286644096  ;;  %v4170_v29 = vld [vmem:[%s4424_s13 + $0x18] sm:$0xff]   ;;  %v4171_v31 = vld [vmem:[%s4424_s13 + $0x148] sm:$0xff]  }
  0x22   : > { %v799_v30 = vsel %vm741_vm0, %v4169_v28, 4286644096  ;;  %v4172_v32 = vld [vmem:[%s4424_s13 + $0xd0] sm:$0xff]   ;;  %v759_v33 = vsel %vm741_vm0, %v4170_v29, 4286644096  ;;  %v4173_v36 = vld [vmem:[%s4424_s13 + $0x98] sm:$0xff]  }
  0x23   : > { %v949_v34 = vsel %vm741_vm0, %v4171_v31, 4286644096  ;;  %v874_v35 = vsel %vm741_vm0, %v4172_v32, 4286644096  ;;  %v4174_v37 = vld [vmem:[%s4424_s13 + $0x180] sm:$0xff]   ;;  %v4175_v40 = vld [vmem:[%s4424_s13 + $0x188] sm:$0xff]  }
  0x24   : > { %791 = vmax.xlane.bf16.xlu1 %v789_v6  ;;  %786 = vmax.xlane.bf16.xlu0 %v784_v7  ;;  %v839_v38 = vsel %vm741_vm0, %v4173_v36, 4286644096  ;;  %v984_v39 = vsel %vm741_vm0, %v4174_v37, 4286644096  ;;  %v4176_v41 = vld [vmem:[%s4424_s13 + $0x110] sm:$0xff]   ;;  %v4177_v44 = vld [vmem:[%s4424_s13 + $0x20] sm:$0xff]   ;;  %v1130_v6 = vlaneseq }
  0x25   : > { %v989_v42 = vsel %vm741_vm0, %v4175_v40, 4286644096  ;;  %v914_v43 = vsel %vm741_vm0, %v4176_v41, 4286644096  ;;  %v4178_v45 = vld [vmem:[%s4424_s13 + $0x1c0] sm:$0xff]   ;;  %v4179_v48 = vld [vmem:[%s4424_s13 + $0xd8] sm:$0xff]  }
  0x26   : > { %v764_v46 = vsel %vm741_vm0, %v4177_v44, 4286644096  ;;  %v1024_v47 = vsel %vm741_vm0, %v4178_v45, 4286644096  ;;  %v4180_v49 = vld [vmem:[%s4424_s13 + $0x60] sm:$0xff]   ;;  %v4181_v52 = vld [vmem:[%s4424_s13 + $0x1c8] sm:$0xff]  }
  0x27   : > { %v879_v50 = vsel %vm741_vm0, %v4179_v48, 4286644096  ;;  %v804_v51 = vsel %vm741_vm0, %v4180_v49, 4286644096  ;;  %v4182_v53 = vld [vmem:[%s4424_s13 + $0x150] sm:$0xff]   ;;  %v4183_v56 = vld [vmem:[%s4424_s13 + $0x118] sm:$0xff]  }
  0x28   : > { %v1029_v54 = vsel %vm741_vm0, %v4181_v52, 4286644096  ;;  %v954_v55 = vsel %vm741_vm0, %v4182_v53, 4286644096  ;;  %v4184_v57 = vld [vmem:[%s4424_s13 + $0xa0] sm:$0xff]   ;;  %v4185_v60 = vld [vmem:[%s4424_s13 + $0x28] sm:$0xff]  }
  0x29   : > { %v919_v58 = vsel %vm741_vm0, %v4183_v56, 4286644096  ;;  %v844_v59 = vsel %vm741_vm0, %v4184_v57, 4286644096  ;;  %v4186_v61 = vld [vmem:[%s4424_s13 + $0x190] sm:$0xff]   ;;  %v4187_v0 = vld [vmem:[%s4424_s13 + $0xe0] sm:$0xff]  }
  0x2a   : > { %v769_v62 = vsel %vm741_vm0, %v4185_v60, 4286644096  ;;  %v994_v63 = vsel %vm741_vm0, %v4186_v61, 4286644096  ;;  %v4188_v1 = vld [vmem:[%s4424_s13 + $0x68] sm:$0xff]   ;;  %v4189_v4 = vld [vmem:[%s4424_s13 + $0x1d0] sm:$0xff]  }
  0x2b   : > { %v884_v2 = vsel %vm741_vm0, %v4187_v0, 4286644096  ;;  %v809_v3 = vsel %vm741_vm0, %v4188_v1, 4286644096  ;;  %v4190_v5 = vld [vmem:[%s4424_s13 + $0x158] sm:$0xff]   ;;  %v4498_v13 = vand.u32 127, %v1130_v6 }
  0x2c   : > { %831 = vmax.xlane.bf16.xlu1 %v829_v10  ;;  %826 = vmax.xlane.bf16.xlu0 %v824_v11  ;;  %v1034_v7 = vsel %vm741_vm0, %v4189_v4, 4286644096  ;;  %v959_v8 = vsel %vm741_vm0, %v4190_v5, 4286644096  ;;  %v4331_v9 = vmov 839922192  }
  0x2d   : > { %v1128_v10 = vunpack.c.l.s4 %v4331_v9  ;;  %v4332_v11 = vmov 1985246804   ;;  %v4502_v17 = vshrl.u32 %v1130_v6, 7  ;;  %v2171_v20 = vadd.s32 4294967272, %v4498_v13  ;;  %v4196_v4 = vld [vmem:[%s4424_s13 + $0x70] sm:$0xff]  }
  0x2e   : > { %v1135_v12 = vunpack.c.l.s4 %v4332_v11 }
  0x2f   : > { %v1129_v16 = vunpack.c.0.s8 %v1128_v10  ;;  %v4524_v29 = vsub.s32 %v2171_v20, %v4502_v17 }
  0x31   : > { %v4511_v25 = vsub.s32 %v1129_v16, %v4502_v17 }
  0x34   : > { %756 = vmax.xlane.bf16.xlu1 %v754_v14  ;;  %866 = vmax.xlane.bf16.xlu0 %v864_v15  ;;  %v4191_v14 = vld [vmem:[%s4424_s13 + $0x120] sm:$0xff]   ;;  %v4192_v15 = vld [vmem:[%s4424_s13 + $0xa8] sm:$0xff]  }
  0x35   : > { %v924_v21 = vsel %vm741_vm0, %v4191_v14, 4286644096  ;;  %v849_v24 = vsel %vm741_vm0, %v4192_v15, 4286644096 }
  0x3c   : > { %871 = vmax.xlane.bf16.xlu1 %v869_v18  ;;  %796 = vmax.xlane.bf16.xlu0 %v794_v19  ;;  %v1136_v18 = vunpack.c.0.s8 %v1135_v12  ;;  %v2164_v19 = vadd.s32 4294967280, %v4498_v13 }
  0x3e   : > { %v4521_v28 = vsub.s32 %v2164_v19, %v4502_v17  ;;  %v4197_v19 = vld [vmem:[%s4424_s13 + $0x1d8] sm:$0xff]  }
  0x44   : > { %836 = vmax.xlane.bf16.xlu1 %v834_v22  ;;  %906 = vmax.xlane.bf16.xlu0 %v904_v23  ;;  %v2157_v22 = vadd.s32 4294967288, %v4498_v13  ;;  %v4193_v23 = vld [vmem:[%s4424_s13 + $0x30] sm:$0xff]  }
  0x45   : > { %v774_v32 = vsel %vm741_vm0, %v4193_v23, 4286644096  ;;  %v814_v23 = vsel %vm741_vm0, %v4196_v4, 4286644096 }
  0x4c   : > { %946 = vmax.xlane.bf16.xlu1 %v944_v26  ;;  %911 = vmax.xlane.bf16.xlu0 %v909_v27  ;;  %v4514_v26 = vsub.s32 %v1136_v18, %v4502_v17  ;;  %v4518_v27 = vsub.s32 %v4498_v13, %v4502_v17 }
  0x54   : > { %801 = vmax.xlane.bf16.xlu1 %v799_v30  ;;  %761 = vmax.xlane.bf16.xlu0 %v759_v33  ;;  %v4527_v30 = vsub.s32 %v2157_v22, %v4502_v17 }
  0x5c   : > { %951 = vmax.xlane.bf16.xlu1 %v949_v34  ;;  %876 = vmax.xlane.bf16.xlu0 %v874_v35 }
  0x64   : > { %841 = vmax.xlane.bf16.xlu1 %v839_v38  ;;  %986 = vmax.xlane.bf16.xlu0 %v984_v39  ;;  %v4194_v38 = vld [vmem:[%s4424_s13 + $0x198] sm:$0xff]  }
  0x65   : > { %v999_v53 = vsel %vm741_vm0, %v4194_v38, 4286644096  ;;  %v1039_v38 = vsel %vm741_vm0, %v4197_v19, 4286644096 }
  0x6c   : > { %991 = vmax.xlane.bf16.xlu1 %v989_v42  ;;  %916 = vmax.xlane.bf16.xlu0 %v914_v43 }
  0x74   : > { %766 = vmax.xlane.bf16.xlu1 %v764_v46  ;;  %1026 = vmax.xlane.bf16.xlu0 %v1024_v47 }
  0x7c   : > { %881 = vmax.xlane.bf16.xlu1 %v879_v50  ;;  %806 = vmax.xlane.bf16.xlu0 %v804_v51  ;;  %v4195_v51 = vld [vmem:[%s4424_s13 + $0xe8] sm:$0xff]  }
  0x84   : > { %1031 = vmax.xlane.bf16.xlu1 %v1029_v54  ;;  %956 = vmax.xlane.bf16.xlu0 %v954_v55 }
  0x8c   : > { %921 = vmax.xlane.bf16.xlu1 %v919_v58  ;;  %846 = vmax.xlane.bf16.xlu0 %v844_v59 }
  0x94   : > { %771 = vmax.xlane.bf16.xlu1 %v769_v62  ;;  %996 = vmax.xlane.bf16.xlu0 %v994_v63  ;;  %v889_v62 = vsel %vm741_vm0, %v4195_v51, 4286644096 }
  0x9c   : > { %886 = vmax.xlane.bf16.xlu1 %v884_v2  ;;  %811 = vmax.xlane.bf16.xlu0 %v809_v3 }
  0xa4   : > { %1036 = vmax.xlane.bf16.xlu1 %v1034_v7  ;;  %961 = vmax.xlane.bf16.xlu0 %v959_v8 }
  0xac   : > { %926 = vmax.xlane.bf16.xlu1 %v924_v21  ;;  %851 = vmax.xlane.bf16.xlu0 %v849_v24 }
  0xad   : > { %v752_v31 = vpop.xlane.xlu1 %751  ;;  %v747_v33 = vpop.xlane.xlu0 %746 }
  0xae   : > { %v1147_v34 = vrot.slane %v752_v31, %v4511_v25  ;;  %v1154_v35 = vrot.slane %v752_v31, %v4514_v26  ;;  %v2857_v36 = vunpack.c.l.b16 %v752_v31  ;;  %v2858_v37 = vunpack.c.h.b16 %v752_v31 }
  0xaf   : > { %v1133_v39 = vrot.slane %v747_v33, %v4511_v25  ;;  %v1140_v40 = vrot.slane %v747_v33, %v4514_v26  ;;  %v2855_v41 = vunpack.c.l.b16 %v747_v33  ;;  %v2856_v42 = vunpack.c.h.b16 %v747_v33 }
  0xb0   : > { %v2025_v43 = vunpack.c.l.b16 %v1147_v34  ;;  %v2026_v44 = vunpack.c.l.b16 %v1154_v35  ;;  %v2995_v45 = vrot.slane %v2857_v36, %v4521_v28  ;;  %v3000_v46 = vrot.slane %v2858_v37, %v4524_v29 }
  0xb1   : > { %v2023_v47 = vunpack.c.l.b16 %v1133_v39  ;;  %v2024_v48 = vunpack.c.l.b16 %v1140_v40  ;;  %v2986_v49 = vrot.slane %v2855_v41, %v4518_v27  ;;  %v2990_v50 = vrot.slane %v2856_v42, %v4527_v30 }
  0xb2   : > { %v2168_v52 = vrot.slane %v2025_v43, %v4521_v28  ;;  %v2175_v57 = vrot.slane %v2026_v44, %v4524_v29  ;;  %v2178_v34 = vadd.s32 4294967264, %v4498_v13  ;;  %v2185_v39 = vadd.s32 4294967256, %v4498_v13 }
  0xb3   : > { %v2156_v54 = vrot.slane %v2023_v47, %v4518_v27  ;;  %v2161_v55 = vrot.slane %v2024_v48, %v4527_v30  ;;  %v2991_v56 = vsel %vm2162_vm1, %v2990_v50, %v2986_v49 }
  0xb4   : > { %v2996_v58 = vsel %vm2169_vm2, %v2995_v45, %v2991_v56  ;;  %776 = vmax.xlane.bf16.xlu1 %v774_v32  ;;  %1001 = vmax.xlane.bf16.xlu0 %v999_v53  ;;  %v4198_v45 = vld [vmem:[%s4424_s13 + $0x160] sm:$0xff]  }
  0xb5   : > { %v2163_v59 = vsel %vm2162_vm1, %v2161_v55, %v2156_v54  ;;  %v4549_v60 = vsel %vm2176_vm3, %v3000_v46, %v2996_v58  ;;  %v792_v61 = vpop.xlane.xlu1 %791  ;;  %v787_v0 = vpop.xlane.xlu0 %786  ;;  %v4199_v58 = vld [vmem:[%s4424_s13 + $0x128] sm:$0xff]  }
  0xb6   : > { %v2170_v63 = vsel %vm2169_vm2, %v2168_v52, %v2163_v59  ;;  %v1259_v1 = vrot.slane %v792_v61, %v4511_v25  ;;  %v1266_v2 = vrot.slane %v792_v61, %v4514_v26  ;;  %v2873_v3 = vunpack.c.l.b16 %v792_v61  ;;  %v4200_v59 = vld [vmem:[%s4424_s13 + $0xb0] sm:$0xff]  }
  0xb7   : > { %v4557_v5 = vsel %vm2176_vm3, %v2175_v57, %v2170_v63  ;;  %v1245_v6 = vrot.slane %v787_v0, %v4511_v25  ;;  %v1252_v7 = vrot.slane %v787_v0, %v4514_v26  ;;  %v2871_v8 = vunpack.c.l.b16 %v787_v0 }
  0xb8   : > { %v2872_v9 = vunpack.c.h.b16 %v787_v0  ;;  %v2041_v10 = vunpack.c.l.b16 %v1259_v1  ;;  %v2042_v11 = vunpack.c.l.b16 %v1266_v2  ;;  %v2874_v12 = vunpack.c.h.b16 %v792_v61 }
  0xb9   : > { %v2039_v14 = vunpack.c.l.b16 %v1245_v6  ;;  %v2040_v15 = vunpack.c.l.b16 %v1252_v7  ;;  %v3065_v16 = vrot.slane %v2871_v8, %v4518_v27  ;;  %v3074_v18 = vrot.slane %v2873_v3, %v4521_v28 }
  0xba   : > { %v3069_v20 = vrot.slane %v2872_v9, %v4527_v30  ;;  %v2274_v21 = vrot.slane %v2041_v10, %v4521_v28  ;;  %v3079_v22 = vrot.slane %v2874_v12, %v4524_v29  ;;  %v2279_v32 = vrot.slane %v2042_v11, %v4524_v29 }
  0xbb   : > { %v2265_v24 = vrot.slane %v2039_v14, %v4518_v27  ;;  %v2269_v31 = vrot.slane %v2040_v15, %v4527_v30  ;;  %v964_v0 = vsel %vm741_vm0, %v4198_v45, 4286644096  ;;  %v4602_v7 = vsub.s32 %v2178_v34, %v4502_v17 }
  0xbc   : > { %v3070_v33 = vsel %vm2162_vm1, %v3069_v20, %v3065_v16  ;;  %891 = vmax.xlane.bf16.xlu1 %v889_v62  ;;  %816 = vmax.xlane.bf16.xlu0 %v814_v23  ;;  %v4605_v8 = vsub.s32 %v2185_v39, %v4502_v17  ;;  %v929_v12 = vsel %vm741_vm0, %v4199_v58, 4286644096  ;;  %v854_v14 = vsel %vm741_vm0, %v4200_v59, 4286644096  ;;  %v4201_v39 = vld [vmem:[%s4424_s13 + $0x38] sm:$0xff]  }
  0xbd   : > { %v2270_v35 = vsel %vm2162_vm1, %v2269_v31, %v2265_v24  ;;  %v3075_v36 = vsel %vm2169_vm2, %v3074_v18, %v3070_v33  ;;  %v832_v37 = vpop.xlane.xlu1 %831  ;;  %v827_v42 = vpop.xlane.xlu0 %826 }
  0xbe   : > { %v2275_v40 = vsel %vm2169_vm2, %v2274_v21, %v2270_v35  ;;  %v4579_v41 = vsel %vm2176_vm3, %v3079_v22, %v3075_v36  ;;  %v1371_v43 = vrot.slane %v832_v37, %v4511_v25  ;;  %v1378_v44 = vrot.slane %v832_v37, %v4514_v26 }
  0xbf   : > { %v4585_v46 = vsel %vm2176_vm3, %v2279_v32, %v2275_v40  ;;  %v1357_v47 = vrot.slane %v827_v42, %v4511_v25  ;;  %v1364_v48 = vrot.slane %v827_v42, %v4514_v26  ;;  %v2887_v49 = vunpack.c.l.b16 %v827_v42  ;;  %v4202_v40 = vld [vmem:[%s4424_s13 + $0x1a0] sm:$0xff]  }
  0xc0   : > { %v2888_v50 = vunpack.c.h.b16 %v827_v42  ;;  %v2057_v51 = vunpack.c.l.b16 %v1371_v43  ;;  %v2058_v52 = vunpack.c.l.b16 %v1378_v44  ;;  %v2889_v53 = vunpack.c.l.b16 %v832_v37 }
  0xc1   : > { %v2055_v54 = vunpack.c.l.b16 %v1357_v47  ;;  %v2056_v55 = vunpack.c.l.b16 %v1364_v48  ;;  %v3144_v56 = vrot.slane %v2887_v49, %v4518_v27  ;;  %v2890_v57 = vunpack.c.h.b16 %v832_v37 }
  0xc2   : > { %v3148_v61 = vrot.slane %v2888_v50, %v4527_v30  ;;  %v2353_v62 = vrot.slane %v2057_v51, %v4521_v28  ;;  %v3153_v63 = vrot.slane %v2889_v53, %v4521_v28  ;;  %v2358_v3 = vrot.slane %v2058_v52, %v4524_v29 }
  0xc3   : > { %v2344_v1 = vrot.slane %v2055_v54, %v4518_v27  ;;  %v2348_v2 = vrot.slane %v2056_v55, %v4527_v30  ;;  %v3158_v4 = vrot.slane %v2890_v57, %v4524_v29  ;;  %v779_v55 = vsel %vm741_vm0, %v4201_v39, 4286644096 }
  0xc4   : > { %v3149_v6 = vsel %vm2162_vm1, %v3148_v61, %v3144_v56  ;;  %1041 = vmax.xlane.bf16.xlu1 %v1039_v38  ;;  %966 = vmax.xlane.bf16.xlu0 %v964_v0  ;;  %v1004_v56 = vsel %vm741_vm0, %v4202_v40, 4286644096 }
  0xc5   : > { %v2349_v9 = vsel %vm2162_vm1, %v2348_v2, %v2344_v1  ;;  %v3154_v10 = vsel %vm2169_vm2, %v3153_v63, %v3149_v6  ;;  %v757_v11 = vpop.xlane.xlu1 %756  ;;  %v867_v20 = vpop.xlane.xlu0 %866 }
  0xc6   : > { %v2354_v15 = vsel %vm2169_vm2, %v2353_v62, %v2349_v9  ;;  %v4613_v16 = vsel %vm2176_vm3, %v3158_v4, %v3154_v10  ;;  %v1161_v18 = vrot.slane %v757_v11, %v4511_v25  ;;  %v1168_v19 = vrot.slane %v757_v11, %v4514_v26 }
  0xc7   : > { %v4618_v21 = vsel %vm2176_vm3, %v2358_v3, %v2354_v15  ;;  %v2859_v22 = vunpack.c.l.b16 %v757_v11  ;;  %v2860_v23 = vunpack.c.h.b16 %v757_v11  ;;  %v1469_v24 = vrot.slane %v867_v20, %v4511_v25 }
  0xc8   : > { %v2027_v31 = vunpack.c.l.b16 %v1161_v18  ;;  %v2028_v32 = vunpack.c.l.b16 %v1168_v19  ;;  %v1476_v33 = vrot.slane %v867_v20, %v4514_v26  ;;  %v2903_v34 = vunpack.c.l.b16 %v867_v20 }
  0xc9   : > { %v3005_v35 = vrot.slane %v2859_v22, %v4602_v7  ;;  %v3010_v36 = vrot.slane %v2860_v23, %v4605_v8  ;;  %v2071_v37 = vunpack.c.l.b16 %v1469_v24  ;;  %v2904_v38 = vunpack.c.h.b16 %v867_v20 }
  0xca   : > { %v2182_v42 = vrot.slane %v2027_v31, %v4602_v7  ;;  %v2189_v43 = vrot.slane %v2028_v32, %v4605_v8  ;;  %v2072_v44 = vunpack.c.l.b16 %v1476_v33  ;;  %v3223_v45 = vrot.slane %v2903_v34, %v4518_v27  ;;  %v4203_v31 = vld [vmem:[%s4424_s13 + $0xf0] sm:$0xff]   ;;  %v4204_v34 = vld [vmem:[%s4424_s13 + $0x78] sm:$0xff]  }
  0xcb   : > { %v3006_v47 = vsel %vm2183_vm4, %v3005_v35, %v4549_v60  ;;  %v2423_v48 = vrot.slane %v2071_v37, %v4518_v27  ;;  %v3227_v49 = vrot.slane %v2904_v38, %v4527_v30 }
  0xcc   : > { %v2184_v50 = vsel %vm2183_vm4, %v2182_v42, %v4557_v5  ;;  %v4636_v51 = vsel %vm2190_vm5, %v3010_v36, %v3006_v47  ;;  %v2427_v52 = vrot.slane %v2072_v44, %v4527_v30  ;;  %931 = vmax.xlane.bf16.xlu1 %v929_v12  ;;  %856 = vmax.xlane.bf16.xlu0 %v854_v14 }
  0xcd   : > { %v4640_v53 = vsel %vm2190_vm5, %v2189_v43, %v2184_v50  ;;  %v3228_v54 = vsel %vm2162_vm1, %v3227_v49, %v3223_v45  ;;  %v872_v60 = vpop.xlane.xlu1 %871  ;;  %v797_v61 = vpop.xlane.xlu0 %796  ;;  %v819_v50 = vsel %vm741_vm0, %v4204_v34, 4286644096 }
  0xce   : > { %v2428_v57 = vsel %vm2162_vm1, %v2427_v52, %v2423_v48  ;;  %v1483_v5 = vrot.slane %v872_v60, %v4511_v25  ;;  %v1490_v58 = vrot.slane %v872_v60, %v4514_v26  ;;  %v2905_v59 = vunpack.c.l.b16 %v872_v60  ;;  %v4205_v52 = vld [vmem:[%s4424_s13 + $0x1e0] sm:$0xff]  }
  0xcf   : > { %v2906_v62 = vunpack.c.h.b16 %v872_v60  ;;  %v1273_v63 = vrot.slane %v797_v61, %v4511_v25  ;;  %v1280_v0 = vrot.slane %v797_v61, %v4514_v26  ;;  %v2875_v1 = vunpack.c.l.b16 %v797_v61 }
  0xd0   : > { %v2073_v2 = vunpack.c.l.b16 %v1483_v5  ;;  %v2074_v3 = vunpack.c.l.b16 %v1490_v58  ;;  %v3232_v4 = vrot.slane %v2905_v59, %v4521_v28  ;;  %v2876_v6 = vunpack.c.h.b16 %v797_v61 }
  0xd1   : > { %v3237_v9 = vrot.slane %v2906_v62, %v4524_v29  ;;  %v2043_v10 = vunpack.c.l.b16 %v1273_v63  ;;  %v2044_v11 = vunpack.c.l.b16 %v1280_v0  ;;  %v3084_v12 = vrot.slane %v2875_v1, %v4602_v7 }
  0xd2   : > { %v2432_v14 = vrot.slane %v2073_v2, %v4521_v28  ;;  %v2437_v15 = vrot.slane %v2074_v3, %v4524_v29  ;;  %v3233_v18 = vsel %vm2169_vm2, %v3232_v4, %v3228_v54  ;;  %v3089_v19 = vrot.slane %v2876_v6, %v4605_v8  ;;  %v4206_v54 = vld [vmem:[%s4424_s13 + $0x168] sm:$0xff]  }
  0xd3   : > { %v4658_v20 = vsel %vm2176_vm3, %v3237_v9, %v3233_v18  ;;  %v2284_v22 = vrot.slane %v2043_v10, %v4602_v7  ;;  %v2289_v23 = vrot.slane %v2044_v11, %v4605_v8  ;;  %v3085_v24 = vsel %vm2183_vm4, %v3084_v12, %v4579_v41 }
  0xd4   : > { %v2433_v32 = vsel %vm2169_vm2, %v2432_v14, %v2428_v57  ;;  %v4667_v33 = vsel %vm2190_vm5, %v3089_v19, %v3085_v24  ;;  %781 = vmax.xlane.bf16.xlu1 %v779_v55  ;;  %1006 = vmax.xlane.bf16.xlu0 %v1004_v56  ;;  %v1044_v0 = vsel %vm741_vm0, %v4205_v52, 4286644096  ;;  %v969_v1 = vsel %vm741_vm0, %v4206_v54, 4286644096 }
  0xd5   : > { %v4671_v35 = vsel %vm2176_vm3, %v2437_v15, %v2433_v32  ;;  %v2285_v36 = vsel %vm2183_vm4, %v2284_v22, %v4585_v46  ;;  %v837_v37 = vpop.xlane.xlu1 %836  ;;  %v907_v42 = vpop.xlane.xlu0 %906  ;;  %v894_v46 = vsel %vm741_vm0, %v4203_v31, 4286644096  ;;  %v2192_v2 = vadd.s32 4294967248, %v4498_v13 }
  0xd6   : > { %v4676_v41 = vsel %vm2190_vm5, %v2289_v23, %v2285_v36  ;;  %v1385_v38 = vrot.slane %v837_v37, %v4511_v25  ;;  %v1392_v39 = vrot.slane %v837_v37, %v4514_v26  ;;  %v2891_v40 = vunpack.c.l.b16 %v837_v37  ;;  %v4207_v23 = vld [vmem:[%s4424_s13 + $0x130] sm:$0xff]   ;;  %v4208_v36 = vld [vmem:[%s4424_s13 + $0xb8] sm:$0xff]  }
  0xd7   : > { %v2892_v43 = vunpack.c.h.b16 %v837_v37  ;;  %v1581_v44 = vrot.slane %v907_v42, %v4511_v25  ;;  %v1588_v45 = vrot.slane %v907_v42, %v4514_v26  ;;  %v2919_v56 = vunpack.c.l.b16 %v907_v42 }
  0xd8   : > { %v2059_v47 = vunpack.c.l.b16 %v1385_v38  ;;  %v2060_v48 = vunpack.c.l.b16 %v1392_v39  ;;  %v3163_v49 = vrot.slane %v2891_v40, %v4602_v7  ;;  %v2920_v57 = vunpack.c.h.b16 %v907_v42 }
  0xd9   : > { %v3168_v60 = vrot.slane %v2892_v43, %v4605_v8  ;;  %v2087_v55 = vunpack.c.l.b16 %v1581_v44  ;;  %v2088_v61 = vunpack.c.l.b16 %v1588_v45  ;;  %v2199_v9 = vadd.s32 4294967240, %v4498_v13 }
  0xda   : > { %v2363_v5 = vrot.slane %v2059_v47, %v4602_v7  ;;  %v2368_v58 = vrot.slane %v2060_v48, %v4605_v8  ;;  %v3164_v59 = vsel %vm2183_vm4, %v3163_v49, %v4613_v16  ;;  %v3302_v16 = vrot.slane %v2919_v56, %v4518_v27 }
  0xdb   : > { %v4693_v62 = vsel %vm2190_vm5, %v3168_v60, %v3164_v59  ;;  %v3306_v4 = vrot.slane %v2920_v57, %v4527_v30  ;;  %v2506_v10 = vrot.slane %v2088_v61, %v4527_v30  ;;  %v4718_v43 = vsub.s32 %v2192_v2, %v4502_v17 }
  0xdc   : > { %v2364_v63 = vsel %vm2183_vm4, %v2363_v5, %v4618_v21  ;;  %896 = vmax.xlane.bf16.xlu1 %v894_v46  ;;  %821 = vmax.xlane.bf16.xlu0 %v819_v50  ;;  %v2502_v21 = vrot.slane %v2087_v55, %v4518_v27  ;;  %v4721_v44 = vsub.s32 %v2199_v9, %v4502_v17  ;;  %v934_v48 = vsel %vm741_vm0, %v4207_v23, 4286644096 }
  0xdd   : > { %v4701_v3 = vsel %vm2190_vm5, %v2368_v58, %v2364_v63  ;;  %v947_v6 = vpop.xlane.xlu1 %946  ;;  %v912_v11 = vpop.xlane.xlu0 %911  ;;  %v3307_v42 = vsel %vm2162_vm1, %v3306_v4, %v3302_v16  ;;  %v859_v54 = vsel %vm741_vm0, %v4208_v36, 4286644096 }
  0xde   : > { %v1693_v12 = vrot.slane %v947_v6, %v4511_v25  ;;  %v1700_v14 = vrot.slane %v947_v6, %v4514_v26  ;;  %v1595_v15 = vrot.slane %v912_v11, %v4511_v25  ;;  %v1602_v18 = vrot.slane %v912_v11, %v4514_v26 }
  0xdf   : > { %v2921_v19 = vunpack.c.l.b16 %v912_v11  ;;  %v2922_v22 = vunpack.c.h.b16 %v912_v11  ;;  %v2935_v32 = vunpack.c.l.b16 %v947_v6  ;;  %v2936_v34 = vunpack.c.h.b16 %v947_v6  ;;  %v4209_v11 = vld [vmem:[%s4424_s13 + $0xf8] sm:$0xff]  }
  0xe0   : > { %v2103_v24 = vunpack.c.l.b16 %v1693_v12  ;;  %v2104_v31 = vunpack.c.l.b16 %v1700_v14  ;;  %v2089_v37 = vunpack.c.l.b16 %v1595_v15  ;;  %v2090_v38 = vunpack.c.l.b16 %v1602_v18  ;;  %v4210_v12 = vld [vmem:[%s4424_s13 + $0x1a8] sm:$0xff]  }
  0xe1   : > { %v3311_v39 = vrot.slane %v2921_v19, %v4521_v28  ;;  %v3316_v40 = vrot.slane %v2922_v22, %v4524_v29  ;;  %v2507_v49 = vsel %vm2162_vm1, %v2506_v10, %v2502_v21  ;;  %v3381_v52 = vrot.slane %v2935_v32, %v4518_v27 }
  0xe2   : > { %v2511_v45 = vrot.slane %v2089_v37, %v4521_v28  ;;  %v2516_v46 = vrot.slane %v2090_v38, %v4524_v29  ;;  %v2581_v55 = vrot.slane %v2103_v24, %v4518_v27  ;;  %v2585_v56 = vrot.slane %v2104_v31, %v4527_v30 }
  0xe3   : > { %v3312_v47 = vsel %vm2169_vm2, %v3311_v39, %v3307_v42  ;;  %v3385_v57 = vrot.slane %v2936_v34, %v4527_v30 }
  0xe4   : > { %v4729_v50 = vsel %vm2176_vm3, %v3316_v40, %v3312_v47  ;;  %1046 = vmax.xlane.bf16.xlu1 %v1044_v0  ;;  %v2512_v60 = vsel %vm2169_vm2, %v2511_v45, %v2507_v49  ;;  %971 = vmax.xlane.bf16.xlu0 %v969_v1  ;;  %v1009_v40 = vsel %vm741_vm0, %v4210_v12, 4286644096  ;;  %v2586_v42 = vsel %vm2162_vm1, %v2585_v56, %v2581_v55 }
  0xe5   : > { %v802_v5 = vpop.xlane.xlu1 %801  ;;  %v4738_v58 = vsel %vm2176_vm3, %v2516_v46, %v2512_v60  ;;  %v762_v0 = vpop.xlane.xlu0 %761  ;;  %v3386_v45 = vsel %vm2162_vm1, %v3385_v57, %v3381_v52 }
  0xe6   : > { %v1287_v59 = vrot.slane %v802_v5, %v4511_v25  ;;  %v1294_v61 = vrot.slane %v802_v5, %v4514_v26  ;;  %v2877_v63 = vunpack.c.l.b16 %v802_v5  ;;  %v2878_v2 = vunpack.c.h.b16 %v802_v5 }
  0xe7   : > { %v1175_v16 = vrot.slane %v762_v0, %v4511_v25  ;;  %v1182_v4 = vrot.slane %v762_v0, %v4514_v26  ;;  %v2861_v6 = vunpack.c.l.b16 %v762_v0  ;;  %v2862_v10 = vunpack.c.h.b16 %v762_v0 }
  0xe8   : > { %v2045_v9 = vunpack.c.l.b16 %v1287_v59  ;;  %v2046_v21 = vunpack.c.l.b16 %v1294_v61  ;;  %v3094_v1 = vrot.slane %v2877_v63, %v4718_v43  ;;  %v3099_v14 = vrot.slane %v2878_v2, %v4721_v44 }
  0xe9   : > { %v2029_v15 = vunpack.c.l.b16 %v1175_v16  ;;  %v2030_v18 = vunpack.c.l.b16 %v1182_v4  ;;  %v3015_v19 = vrot.slane %v2861_v6, %v4718_v43  ;;  %v3020_v31 = vrot.slane %v2862_v10, %v4721_v44  ;;  %v4211_v4 = vld [vmem:[%s4424_s13 + $0x1e8] sm:$0xff]   ;;  %v4212_v6 = vld [vmem:[%s4424_s13 + $0x170] sm:$0xff]  }
  0xea   : > { %v2294_v22 = vrot.slane %v2045_v9, %v4718_v43  ;;  %v2299_v23 = vrot.slane %v2046_v21, %v4721_v44  ;;  %v3095_v24 = vsel %vm2197_vm6, %v3094_v1, %v4667_v33  ;;  %v899_v33 = vsel %vm741_vm0, %v4209_v11, 4286644096 }
  0xeb   : > { %v4755_v32 = vsel %vm2204_vm7, %v3099_v14, %v3095_v24  ;;  %v2196_v34 = vrot.slane %v2029_v15, %v4718_v43  ;;  %v2203_v36 = vrot.slane %v2030_v18, %v4721_v44  ;;  %v3016_v37 = vsel %vm2197_vm6, %v3015_v19, %v4636_v51 }
  0xec   : > { %v2295_v38 = vsel %vm2197_vm6, %v2294_v22, %v4676_v41  ;;  %v4764_v39 = vsel %vm2204_vm7, %v3020_v31, %v3016_v37  ;;  %936 = vmax.xlane.bf16.xlu1 %v934_v48  ;;  %861 = vmax.xlane.bf16.xlu0 %v859_v54  ;;  %v1049_v31 = vsel %vm741_vm0, %v4211_v4, 4286644096  ;;  %v2206_v4 = vadd.s32 4294967232, %v4498_v13 }
  0xed   : > { %v4771_v46 = vsel %vm2204_vm7, %v2299_v23, %v2295_v38  ;;  %v2198_v51 = vsel %vm2197_vm6, %v2196_v34, %v4640_v53  ;;  %v952_v41 = vpop.xlane.xlu1 %951  ;;  %v877_v55 = vpop.xlane.xlu0 %876 }
  0xee   : > { %v4776_v47 = vsel %vm2204_vm7, %v2203_v36, %v2198_v51  ;;  %v1707_v48 = vrot.slane %v952_v41, %v4511_v25  ;;  %v1714_v49 = vrot.slane %v952_v41, %v4514_v26  ;;  %v2937_v60 = vunpack.c.l.b16 %v952_v41  ;;  %v4213_v51 = vld [vmem:[%s4424_s13 + $0x1b0] sm:$0xff]  }
  0xef   : > { %v2938_v52 = vunpack.c.h.b16 %v952_v41  ;;  %v1497_v56 = vrot.slane %v877_v55, %v4511_v25  ;;  %v1504_v57 = vrot.slane %v877_v55, %v4514_v26  ;;  %v2907_v5 = vunpack.c.l.b16 %v877_v55 }
  0xf0   : > { %v2105_v53 = vunpack.c.l.b16 %v1707_v48  ;;  %v2106_v54 = vunpack.c.l.b16 %v1714_v49  ;;  %v3390_v59 = vrot.slane %v2937_v60, %v4521_v28  ;;  %v2908_v61 = vunpack.c.h.b16 %v877_v55  ;;  %v4214_v55 = vld [vmem:[%s4424_s13 + $0x138] sm:$0xff]  }
  0xf1   : > { %v3395_v63 = vrot.slane %v2938_v52, %v4524_v29  ;;  %v2075_v0 = vunpack.c.l.b16 %v1497_v56  ;;  %v2076_v2 = vunpack.c.l.b16 %v1504_v57  ;;  %v3242_v16 = vrot.slane %v2907_v5, %v4602_v7 }
  0xf2   : > { %v2590_v9 = vrot.slane %v2105_v53, %v4521_v28  ;;  %v2595_v21 = vrot.slane %v2106_v54, %v4524_v29  ;;  %v3391_v1 = vsel %vm2169_vm2, %v3390_v59, %v3386_v45  ;;  %v3247_v10 = vrot.slane %v2908_v61, %v4605_v8 }
  0xf3   : > { %v4792_v11 = vsel %vm2176_vm3, %v3395_v63, %v3391_v1  ;;  %v2442_v12 = vrot.slane %v2075_v0, %v4602_v7  ;;  %v2447_v14 = vrot.slane %v2076_v2, %v4605_v8  ;;  %v3243_v15 = vsel %vm2183_vm4, %v3242_v16, %v4658_v20 }
  0xf4   : > { %v2591_v18 = vsel %vm2169_vm2, %v2590_v9, %v2586_v42  ;;  %v4800_v19 = vsel %vm2190_vm5, %v3247_v10, %v3243_v15  ;;  %901 = vmax.xlane.bf16.xlu1 %v899_v33  ;;  %1011 = vmax.xlane.bf16.xlu0 %v1009_v40  ;;  %v974_v20 = vsel %vm741_vm0, %v4212_v6, 4286644096  ;;  %v1014_v0 = vsel %vm741_vm0, %v4213_v51, 4286644096 }
  0xf5   : > { %v4803_v22 = vsel %vm2176_vm3, %v2595_v21, %v2591_v18  ;;  %v2443_v23 = vsel %vm2183_vm4, %v2442_v12, %v4671_v35  ;;  %v842_v24 = vpop.xlane.xlu1 %841  ;;  %v987_v33 = vpop.xlane.xlu0 %986  ;;  %v939_v16 = vsel %vm741_vm0, %v4214_v55, 4286644096  ;;  %v2213_v6 = vadd.s32 4294967224, %v4498_v13 }
  0xf6   : > { %v4810_v34 = vsel %vm2190_vm5, %v2447_v14, %v2443_v23  ;;  %v1399_v36 = vrot.slane %v842_v24, %v4511_v25  ;;  %v1406_v37 = vrot.slane %v842_v24, %v4514_v26  ;;  %v2893_v38 = vunpack.c.l.b16 %v842_v24 }
  0xf7   : > { %v2894_v42 = vunpack.c.h.b16 %v842_v24  ;;  %v1805_v45 = vrot.slane %v987_v33, %v4511_v25  ;;  %v1812_v35 = vrot.slane %v987_v33, %v4514_v26  ;;  %v2951_v40 = vunpack.c.l.b16 %v987_v33 }
  0xf8   : > { %v2061_v41 = vunpack.c.l.b16 %v1399_v36  ;;  %v2062_v48 = vunpack.c.l.b16 %v1406_v37  ;;  %v3173_v49 = vrot.slane %v2893_v38, %v4718_v43  ;;  %v2952_v60 = vunpack.c.h.b16 %v987_v33 }
  0xf9   : > { %v3178_v52 = vrot.slane %v2894_v42, %v4721_v44  ;;  %v2119_v56 = vunpack.c.l.b16 %v1805_v45  ;;  %v2120_v57 = vunpack.c.l.b16 %v1812_v35  ;;  %v3460_v5 = vrot.slane %v2951_v40, %v4518_v27 }
  0xfa   : > { %v2373_v53 = vrot.slane %v2061_v41, %v4718_v43  ;;  %v2378_v54 = vrot.slane %v2062_v48, %v4721_v44  ;;  %v3174_v59 = vsel %vm2197_vm6, %v3173_v49, %v4693_v62  ;;  %v3464_v61 = vrot.slane %v2952_v60, %v4527_v30 }
  0xfb   : > { %v4827_v63 = vsel %vm2204_vm7, %v3178_v52, %v3174_v59  ;;  %v2660_v62 = vrot.slane %v2119_v56, %v4518_v27  ;;  %v2664_v21 = vrot.slane %v2120_v57, %v4527_v30 }
  0xfc   : > { %v2374_v2 = vsel %vm2197_vm6, %v2373_v53, %v4701_v3  ;;  %1051 = vmax.xlane.bf16.xlu1 %v1049_v31  ;;  %v3465_v1 = vsel %vm2162_vm1, %v3464_v61, %v3460_v5  ;;  %976 = vmax.xlane.bf16.xlu0 %v974_v20  ;;  %v4865_v53 = vsub.s32 %v2206_v4, %v4502_v17 }
  0xfd   : > { %v4836_v9 = vsel %vm2204_vm7, %v2378_v54, %v2374_v2  ;;  %v992_v10 = vpop.xlane.xlu1 %991  ;;  %v917_v18 = vpop.xlane.xlu0 %916  ;;  %v2665_v51 = vsel %vm2162_vm1, %v2664_v21, %v2660_v62  ;;  %v4873_v61 = vsub.s32 %v2213_v6, %v4502_v17  ;;  %v4215_v2 = vld [vmem:[%s4424_s13 + $0x1f0] sm:$0xff]  }
  0xfe   : > { %v1819_v3 = vrot.slane %v992_v10, %v4511_v25  ;;  %v1826_v12 = vrot.slane %v992_v10, %v4514_v26  ;;  %v2953_v14 = vunpack.c.l.b16 %v992_v10  ;;  %v2954_v15 = vunpack.c.h.b16 %v992_v10 }
  0xff   : > { %v1609_v23 = vrot.slane %v917_v18, %v4511_v25  ;;  %v1616_v24 = vrot.slane %v917_v18, %v4514_v26  ;;  %v2923_v31 = vunpack.c.l.b16 %v917_v18  ;;  %v2924_v36 = vunpack.c.h.b16 %v917_v18 }
 0x100   : > { %v2121_v37 = vunpack.c.l.b16 %v1819_v3  ;;  %v2122_v38 = vunpack.c.l.b16 %v1826_v12  ;;  %v3469_v33 = vrot.slane %v2953_v14, %v4521_v28  ;;  %v3474_v20 = vrot.slane %v2954_v15, %v4524_v29  ;;  %v4217_v14 = vld [vmem:[%s4424_s13 + $0x1f8] sm:$0xff]  }
 0x101   : > { %v2091_v42 = vunpack.c.l.b16 %v1609_v23  ;;  %v2092_v45 = vunpack.c.l.b16 %v1616_v24  ;;  %v3321_v35 = vrot.slane %v2923_v31, %v4602_v7  ;;  %v3326_v40 = vrot.slane %v2924_v36, %v4605_v8  ;;  %v4218_v15 = vld [vmem:[%s4424_s13 + $0x1b8] sm:$0xff]  }
 0x102   : > { %v2669_v41 = vrot.slane %v2121_v37, %v4521_v28  ;;  %v2674_v48 = vrot.slane %v2122_v38, %v4524_v29  ;;  %v3470_v49 = vsel %vm2169_vm2, %v3469_v33, %v3465_v1  ;;  %v4216_v1 = vld [vmem:[%s4424_s13 + $0x178] sm:$0xff]   ;;  %v1054_v12 = vsel %vm741_vm0, %v4215_v2, 4286644096  ;;  %s3955_s13 = sshll.u32 %s5625_s12, 2 }
 0x103   : > { %v4854_v60 = vsel %vm2176_vm3, %v3474_v20, %v3470_v49  ;;  %v2521_v55 = vrot.slane %v2091_v42, %v4602_v7  ;;  %v2526_v52 = vrot.slane %v2092_v45, %v4605_v8  ;;  %v3322_v56 = vsel %vm2183_vm4, %v3321_v35, %v4729_v50  ;;  %s266_s14 = scalar_lea.vmem [#allocation2], %s3955_s13 }
 0x104   : > { %v2670_v57 = vsel %vm2169_vm2, %v2669_v41, %v2665_v51  ;;  %v4862_v5 = vsel %vm2190_vm5, %v3326_v40, %v3322_v56  ;;  %1016 = vmax.xlane.bf16.xlu1 %v1014_v0  ;;  %941 = vmax.xlane.bf16.xlu0 %v939_v16  ;;  %v979_v36 = vsel %vm741_vm0, %v4216_v1, 4286644096  ;;  %v1059_v42 = vsel %vm741_vm0, %v4217_v14, 4286644096  ;;  %s3847_s10 = sshll.u32 %s266_s14, 4  ;;  %s3848_s10 = int_to_ptr.vmem [resolvable:$true] %s3847_s10 }
 0x105   : > { %v4868_v54 = vsel %vm2176_vm3, %v2674_v48, %v2670_v57  ;;  %v2522_v59 = vsel %vm2183_vm4, %v2521_v55, %v4738_v58  ;;  %v767_v50 = vpop.xlane.xlu1 %766  ;;  %v4891_v31 = vpop.xlane.xlu0 %1026  ;;  %v4333_v14 = vmov 0.0   ;;  %s4235_s15 = scalar_lea.vmem %s3848_s10, 64  ;;  %p4242_p0 = scmp.lt.s32.totalorder %s3848_s10, %s4240_s17 }
 0x106   : > { %v4877_v62 = vsel %vm2190_vm5, %v2526_v52, %v2522_v59  ;;  %v1189_v0 = vrot.slane %v767_v50, %v4511_v25  ;;  %v1196_v4 = vrot.slane %v767_v50, %v4514_v26  ;;  %v2863_v21 = vunpack.c.l.b16 %v767_v50  ;;  %4067 = vmatprep.subr.bf16.mxu0 %v4333_v14  ;;  %4087 = vmatprep.subr.bf16.mxu1 %v4333_v14  ;;  %p4236_p11 = scmp.ne.s32.totalorder %s3848_s10, %s4235_s15  ;;  %p4243_p1 = scmp.lt.s32.totalorder %s4241_s18, %s4235_s15 }
 0x107   : > { %v2864_v10 = vunpack.c.h.b16 %v767_v50  ;;  %4083 = vmatprep.mubr.msk.bf16.mxu0 %vm4334_vm11, %v4333_v14  ;;  %4103 = vmatprep.mubr.msk.bf16.mxu1 %vm4334_vm11, %v4333_v14 }
 0x108   : > { %v2031_v58 = vunpack.c.l.b16 %v1189_v0  ;;  %v2032_v16 = vunpack.c.l.b16 %v1196_v4  ;;  %v3025_v6 = vrot.slane %v2863_v21, %v4865_v53  ;;  %p4237_p12 = pnand %p4236_p11, %p4410_p5  ;;  %p4244_p2 = por %p4243_p1, %p4242_p0 }
 0x109   : > { %v3030_v3 = vrot.slane %v2864_v10, %v4873_v61 }
 0x10a   : > { %v2210_v18 = vrot.slane %v2031_v58, %v4865_v53  ;;  %v2217_v23 = vrot.slane %v2032_v16, %v4873_v61  ;;  %v3026_v24 = vsel %vm2211_vm8, %v3025_v6, %v4764_v39  ;;  %v1019_v39 = vsel %vm741_vm0, %v4218_v15, 4286644096  ;;  %v4219_v58 = vld [vmem:[%s5739_s1] sm:$0xff]   ;;  %p4238_p13 = pneg %p4237_p12 }
 0x10b   : > { %v4895_v37 = vsel %vm2218_vm9, %v3030_v3, %v3026_v24  ;;  %4068 = vmatpush3.bf16.msra.mxu0 %v4219_v58  ;;  %v4221_v24 = vld [vmem:[%s5739_s1 + $0x10] sm:$0xff]   ;;  %vm2260_vm0 = vcmask 1048512  }
 0x10c   : > { %v2212_v38 = vsel %vm2211_vm8, %v2210_v18, %v4776_v47  ;;  %1056 = vmax.xlane.bf16.xlu1 %v1054_v12  ;;  %981 = vmax.xlane.bf16.xlu0 %v979_v36  ;;  %v1924_v36 = vrot.slane %v4891_v31, %v4514_v26  ;;  %p4245_p3 = pnand %p4244_p2, %p4238_p13 }
 0x10d   : > { %v4900_v33 = vsel %vm2218_vm9, %v2217_v23, %v2212_v38  ;;  %v882_v20 = vpop.xlane.xlu1 %881  ;;  %v807_v41 = vpop.xlane.xlu0 %806  ;;  %4069 = vmatprep.subr.bf16.mxu0 %v4333_v14 }
 0x10e   : > { %v1511_v45 = vrot.slane %v882_v20, %v4511_v25  ;;  %v1518_v35 = vrot.slane %v882_v20, %v4514_v26  ;;  %v2909_v40 = vunpack.c.l.b16 %v882_v20  ;;  %v2910_v51 = vunpack.c.h.b16 %v882_v20 }
 0x10f   : > { %v1301_v48 = vrot.slane %v807_v41, %v4511_v25  ;;  %v1308_v47 = vrot.slane %v807_v41, %v4514_v26  ;;  %v2879_v49 = vunpack.c.l.b16 %v807_v41  ;;  %v2880_v55 = vunpack.c.h.b16 %v807_v41 }
 0x110   : > { %v2077_v52 = vunpack.c.l.b16 %v1511_v45  ;;  %v2078_v56 = vunpack.c.l.b16 %v1518_v35  ;;  %v3252_v57 = vrot.slane %v2909_v40, %v4718_v43  ;;  %v3257_v59 = vrot.slane %v2910_v51, %v4721_v44 }
 0x111   : > { %v2047_v50 = vunpack.c.l.b16 %v1301_v48  ;;  %v2048_v2 = vunpack.c.l.b16 %v1308_v47  ;;  %v3104_v0 = vrot.slane %v2879_v49, %v4865_v53  ;;  %v3109_v4 = vrot.slane %v2880_v55, %v4873_v61 }
 0x112   : > { %v2452_v21 = vrot.slane %v2077_v52, %v4718_v43  ;;  %v2457_v1 = vrot.slane %v2078_v56, %v4721_v44  ;;  %v3253_v10 = vsel %vm2197_vm6, %v3252_v57, %v4800_v19  ;;  %v2220_v20 = vadd.s32 4294967216, %v4498_v13  ;;  %v4223_v56 = vld [vmem:[%s5739_s1 + $0x20] sm:$0xff]  }
 0x113   : > { %v4920_v16 = vsel %vm2204_vm7, %v3257_v59, %v3253_v10  ;;  %v2304_v6 = vrot.slane %v2047_v50, %v4865_v53  ;;  %v2309_v3 = vrot.slane %v2048_v2, %v4873_v61  ;;  %v3105_v12 = vsel %vm2211_vm8, %v3104_v0, %v4755_v32 }
 0x114   : > { %v2453_v19 = vsel %vm2197_vm6, %v2452_v21, %v4810_v34  ;;  %v4930_v15 = vsel %vm2218_vm9, %v3109_v4, %v3105_v12  ;;  %1061 = vmax.xlane.bf16.xlu1 %v1059_v42  ;;  %1021 = vmax.xlane.bf16.xlu0 %v1019_v39  ;;  %v4220_v34 = vld [vmem:[%s5739_s1 + $0x8] sm:$0xff]   ;;  %v4222_v42 = vld [vmem:[%s5739_s1 + $0x18] sm:$0xff]   ;;  %v2227_v39 = vadd.s32 4294967208, %v4498_v13  ;;  %v2234_v40 = vadd.s32 4294967200, %v4498_v13 }
 0x115   : > { %v4933_v18 = vsel %vm2204_vm7, %v2457_v1, %v2453_v19  ;;  %v2305_v23 = vsel %vm2211_vm8, %v2304_v6, %v4771_v46  ;;  %4070 = vmatpush3.bf16.msra.mxu0 %v4220_v34  ;;  %v1917_v46 = vrot.slane %v4891_v31, %v4511_v25  ;;  %v1032_v38 = vpop.xlane.xlu1 %1031  ;;  %v957_v35 = vpop.xlane.xlu0 %956  ;;  %v2136_v41 = vunpack.c.l.b16 %v1924_v36  ;;  %v4224_v12 = vld [vmem:[%s5739_s1 + $0x28] sm:$0xff]  }
 0x116   : > { %v4939_v32 = vsel %vm2218_vm9, %v2309_v3, %v2305_v23  ;;  %4071 = vmatprep.subr.bf16.mxu0 %v4333_v14  ;;  %v1931_v45 = vrot.slane %v1032_v38, %v4511_v25  ;;  %v2967_v48 = vunpack.c.l.b16 %v4891_v31  ;;  %v2968_v47 = vunpack.c.h.b16 %v4891_v31 }
 0x117   : > { %v2135_v51 = vunpack.c.l.b16 %v1917_v46  ;;  %v1938_v49 = vrot.slane %v1032_v38, %v4514_v26  ;;  %v4966_v55 = vsub.s32 %v2220_v20, %v4502_v17  ;;  %v2241_v52 = vadd.s32 4294967192, %v4498_v13 }
 0x118   : > { %v2969_v57 = vunpack.c.l.b16 %v1032_v38  ;;  %v1721_v59 = vrot.slane %v957_v35, %v4511_v25  ;;  %v4974_v50 = vsub.s32 %v2227_v39, %v4502_v17  ;;  %v2248_v31 = vadd.s32 4294967184, %v4498_v13 }
 0x119   : > { %4072 = vmatpush3.bf16.msra.mxu0 %v4221_v24  ;;  %v2137_v2 = vunpack.c.l.b16 %v1931_v45  ;;  %v2939_v0 = vunpack.c.l.b16 %v957_v35  ;;  %v4978_v4 = vsub.s32 %v2234_v40, %v4502_v17  ;;  %v2255_v21 = vadd.s32 4294967176, %v4498_v13 }
 0x11a   : > { %4073 = vmatprep.subr.bf16.mxu0 %v4333_v14  ;;  %v2739_v1 = vrot.slane %v2135_v51, %v4518_v27  ;;  %v2743_v10 = vrot.slane %v2136_v41, %v4527_v30  ;;  %v3539_v58 = vrot.slane %v2967_v48, %v4518_v27  ;;  %v3543_v6 = vrot.slane %v2968_v47, %v4527_v30  ;;  %v4225_v47 = vld [vmem:[%s5739_s1 + $0x30] sm:$0xff]  }
 0x11b   : > { %v2138_v19 = vunpack.c.l.b16 %v1938_v49  ;;  %v2970_v23 = vunpack.c.h.b16 %v1032_v38  ;;  %v1728_v13 = vrot.slane %v957_v35, %v4514_v26  ;;  %v4995_v24 = vsub.s32 %v2241_v52, %v4502_v17 }
 0x11c   : > { %v3548_v27 = vrot.slane %v2969_v57, %v4521_v28  ;;  %v2107_v30 = vunpack.c.l.b16 %v1721_v59  ;;  %v2940_v46 = vunpack.c.h.b16 %v957_v35  ;;  %v4999_v36 = vsub.s32 %v2248_v31, %v4502_v17 }
 0x11d   : > { %4074 = vmatpush3.bf16.msra.mxu0 %v4222_v42  ;;  %v4985_v3 = vpop.xlane.xlu1 %921  ;;  %v4992_v34 = vpop.xlane.xlu0 %846  ;;  %v2748_v20 = vrot.slane %v2137_v2, %v4521_v28  ;;  %v3400_v42 = vrot.slane %v2939_v0, %v4602_v7  ;;  %v5006_v39 = vsub.s32 %v2255_v21, %v4502_v17  ;;  %v2744_v45 = vsel %vm2162_vm1, %v2743_v10, %v2739_v1 }
 0x11e   : > { %4075 = vmatprep.subr.bf16.mxu0 %v4333_v14  ;;  %v1623_v38 = vrot.slane %v4985_v3, %v4511_v25  ;;  %v3544_v40 = vsel %vm2162_vm1, %v3543_v6, %v3539_v58  ;;  %v1630_v35 = vrot.slane %v4985_v3, %v4514_v26  ;;  %v1413_v51 = vrot.slane %v4992_v34, %v4511_v25  ;;  %v4226_v58 = vld [vmem:[%s5739_s1 + $0x38] sm:$0xff]  }
 0x11f   : > { %v2753_v28 = vrot.slane %v2138_v19, %v4524_v29  ;;  %v3553_v41 = vrot.slane %v2970_v23, %v4524_v29  ;;  %v2108_v48 = vunpack.c.l.b16 %v1728_v13  ;;  %v2925_v17 = vunpack.c.l.b16 %v4985_v3 }
 0x120   : > { %v3549_v49 = vsel %vm2169_vm2, %v3548_v27, %v3544_v40  ;;  %v2600_v52 = vrot.slane %v2107_v30, %v4602_v7  ;;  %v1420_v57 = vrot.slane %v4992_v34, %v4514_v26  ;;  %v2749_v59 = vsel %vm2169_vm2, %v2748_v20, %v2744_v45 }
 0x121   : > { %4076 = vmatpush3.bf16.msra.mxu0 %v4223_v56  ;;  %v3405_v56 = vrot.slane %v2940_v46, %v4605_v8  ;;  %v3401_v29 = vsel %vm2183_vm4, %v3400_v42, %v4792_v11  ;;  %v2093_v31 = vunpack.c.l.b16 %v1623_v38  ;;  %v2895_v2 = vunpack.c.l.b16 %v4992_v34 }
 0x122   : > { %4077 = vmatprep.subr.bf16.mxu0 %v4333_v14  ;;  %v2094_v21 = vunpack.c.l.b16 %v1630_v35  ;;  %v2926_v1 = vunpack.c.h.b16 %v4985_v3  ;;  %v2063_v10 = vunpack.c.l.b16 %v1413_v51  ;;  %v5036_v6 = vsel %vm2176_vm3, %v3553_v41, %v3549_v49  ;;  %v4227_v35 = vld [vmem:[%s5741_s3] sm:$0xff]  }
 0x123   : > { %v2605_v11 = vrot.slane %v2108_v48, %v4605_v8  ;;  %v5043_v3 = vsel %vm2190_vm5, %v3405_v56, %v3401_v29  ;;  %v2064_v19 = vunpack.c.l.b16 %v1420_v57  ;;  %v2896_v23 = vunpack.c.h.b16 %v4992_v34  ;;  %4088 = vmatpush3.bf16.msra.mxu1 %v4227_v35  ;;  %v4228_v56 = vld [vmem:[%s5741_s3 + $0x8] sm:$0xff]  }
 0x124   : > { %v5048_v30 = vsel %vm2176_vm3, %v2753_v28, %v2749_v59  ;;  %v2531_v46 = vrot.slane %v2093_v31, %v4718_v43  ;;  %v3183_v20 = vrot.slane %v2895_v2, %v4865_v53  ;;  %v2601_v38 = vsel %vm2183_vm4, %v2600_v52, %v4803_v22  ;;  %4089 = vmatprep.subr.bf16.mxu1 %v4333_v14 }
 0x125   : > { %4078 = vmatpush3.bf16.msra.mxu0 %v4224_v12  ;;  %v772_v0 = vpop.xlane.xlu1 %771  ;;  %v3331_v12 = vrot.slane %v2925_v17, %v4718_v43  ;;  %v997_v27 = vpop.xlane.xlu0 %996  ;;  %v2536_v45 = vrot.slane %v2094_v21, %v4721_v44  ;;  %v3336_v34 = vrot.slane %v2926_v1, %v4721_v44  ;;  %v2383_v40 = vrot.slane %v2063_v10, %v4865_v53 }
 0x126   : > { %4079 = vmatprep.subr.bf16.mxu0 %v4333_v14  ;;  %v1203_v13 = vrot.slane %v772_v0, %v4511_v25  ;;  %v2865_v42 = vunpack.c.l.b16 %v772_v0  ;;  %v1210_v28 = vrot.slane %v772_v0, %v4514_v26  ;;  %v1833_v41 = vrot.slane %v997_v27, %v4511_v25 }
 0x127   : > { %v3332_v51 = vsel %vm2197_vm6, %v3331_v12, %v4862_v5  ;;  %v2955_v48 = vunpack.c.l.b16 %v997_v27  ;;  %v2388_v22 = vrot.slane %v2064_v19, %v4873_v61  ;;  %v3188_v17 = vrot.slane %v2896_v23, %v4873_v61  ;;  %4090 = vmatpush3.bf16.msra.mxu1 %v4228_v56 }
 0x128   : > { %v2866_v49 = vunpack.c.h.b16 %v772_v0  ;;  %v2532_v5 = vsel %vm2197_vm6, %v2531_v46, %v4877_v62  ;;  %v3184_v57 = vsel %vm2211_vm8, %v3183_v20, %v4827_v63  ;;  %v3035_v59 = vrot.slane %v2865_v42, %v4966_v55  ;;  %4091 = vmatprep.subr.bf16.mxu1 %v4333_v14 }
 0x129   : > { %4080 = vmatpush3.bf16.msra.mxu0 %v4225_v47  ;;  %v2033_v47 = vunpack.c.l.b16 %v1203_v13  ;;  %v1840_v29 = vrot.slane %v997_v27, %v4514_v26  ;;  %v5077_v31 = vsel %vm2190_vm5, %v2605_v11, %v2601_v38  ;;  %v5080_v2 = vsel %vm2204_vm7, %v3336_v34, %v3332_v51 }
 0x12a   : > { %4081 = vmatprep.subr.bf16.mxu0 %v4333_v14  ;;  %v2384_v0 = vsel %vm2211_vm8, %v2383_v40, %v4836_v9  ;;  %v2956_v21 = vunpack.c.h.b16 %v997_v27  ;;  %v2034_v62 = vunpack.c.l.b16 %v1210_v28  ;;  %v2123_v1 = vunpack.c.l.b16 %v1833_v41  ;;  %v4229_v9 = vld [vmem:[%s5741_s3 + $0x10] sm:$0xff]  }
 0x12b   : > { %v3479_v63 = vrot.slane %v2955_v48, %v4602_v7  ;;  %v5087_v12 = vsel %vm2204_vm7, %v2536_v45, %v2532_v5  ;;  %v5090_v11 = vsel %vm2218_vm9, %v3188_v17, %v3184_v57  ;;  %v2224_v19 = vrot.slane %v2033_v47, %v4966_v55  ;;  %4092 = vmatpush3.bf16.msra.mxu1 %v4229_v9  ;;  %v4230_v47 = vld [vmem:[%s5741_s3 + $0x18] sm:$0xff]  }
 0x12c   : > { %v3040_v23 = vrot.slane %v2866_v49, %v4974_v50  ;;  %v5098_v13 = vsel %vm2218_vm9, %v2388_v22, %v2384_v0  ;;  %v3036_v27 = vsel %vm2225_vm10, %v3035_v59, %v4895_v37  ;;  %v2124_v46 = vunpack.c.l.b16 %v1840_v29  ;;  %4093 = vmatprep.subr.bf16.mxu1 %v4333_v14 }
 0x12d   : > { %4082 = vmatpush3.bf16.msra.mxu0 %v4226_v58  ;;  %v887_v52 = vpop.xlane.xlu1 %886  ;;  %v812_v58 = vpop.xlane.xlu0 %811  ;;  %v3484_v42 = vrot.slane %v2956_v21, %v4605_v8  ;;  %v2231_v35 = vrot.slane %v2034_v62, %v4974_v50  ;;  %v2679_v51 = vrot.slane %v2123_v1, %v4602_v7  ;;  %v3480_v28 = vsel %vm2183_vm4, %v3479_v63, %v4854_v60 }
 0x12e   : > { %v1525_v10 = vrot.slane %v887_v52, %v4511_v25  ;;  %v2911_v20 = vunpack.c.l.b16 %v887_v52  ;;  %v1532_v38 = vrot.slane %v887_v52, %v4514_v26  ;;  %v1315_v45 = vrot.slane %v812_v58, %v4511_v25 }
 0x12f   : > { %v2881_v34 = vunpack.c.l.b16 %v812_v58  ;;  %v2226_v41 = vsel %vm2225_vm10, %v2224_v19, %v4900_v33  ;;  %v5113_v48 = vsel %vm2232_vm12, %v3040_v23, %v3036_v27  ;;  %v2912_v22 = vunpack.c.h.b16 %v887_v52  ;;  %4094 = vmatpush3.bf16.msra.mxu1 %v4230_v47  ;;  %v4231_v23 = vld [vmem:[%s5741_s3 + $0x20] sm:$0xff]  }
 0x130   : > { %v2079_v37 = vunpack.c.l.b16 %v1525_v10  ;;  %v1322_v17 = vrot.slane %v812_v58, %v4514_v26  ;;  %v2684_v49 = vrot.slane %v2124_v46, %v4605_v8  ;;  %v3262_v56 = vrot.slane %v2911_v20, %v4865_v53  ;;  %4095 = vmatprep.subr.bf16.mxu1 %v4333_v14 }
 0x131   : > { %v2882_v60 = vunpack.c.h.b16 %v812_v58  ;;  %v5124_v33 = vsel %vm2190_vm5, %v3484_v42, %v3480_v28  ;;  %v2080_v52 = vunpack.c.l.b16 %v1532_v38  ;;  %v2049_v59 = vunpack.c.l.b16 %v1315_v45 }
 0x132   : > { %v3114_v29 = vrot.slane %v2881_v34, %v4966_v55  ;;  %v5128_v0 = vsel %vm2232_vm12, %v2231_v35, %v2226_v41  ;;  %v2680_v21 = vsel %vm2183_vm4, %v2679_v51, %v4868_v54  ;;  %v2462_v62 = vrot.slane %v2079_v37, %v4865_v53 }
 0x133   : > { %v3267_v63 = vrot.slane %v2912_v22, %v4873_v61  ;;  %v2050_v10 = vunpack.c.l.b16 %v1322_v17  ;;  %v3263_v9 = vsel %vm2211_vm8, %v3262_v56, %v4920_v16  ;;  %v3119_v54 = vrot.slane %v2882_v60, %v4974_v50  ;;  %4096 = vmatpush3.bf16.msra.mxu1 %v4231_v23 }
 0x134   : > { %v2467_v20 = vrot.slane %v2080_v52, %v4873_v61  ;;  %v2314_v42 = vrot.slane %v2049_v59, %v4966_v55  ;;  %v3115_v38 = vsel %vm2225_vm10, %v3114_v29, %v4930_v15  ;;  %v5148_v34 = vsel %vm2190_vm5, %v2684_v49, %v2680_v21  ;;  %v4232_v15 = vld [vmem:[%s5741_s3 + $0x28] sm:$0xff]   ;;  %4097 = vmatprep.subr.bf16.mxu1 %v4333_v14 }
 0x135   : > { %v1037_v40 = vpop.xlane.xlu1 %1036  ;;  %v962_v57 = vpop.xlane.xlu0 %961  ;;  %v2463_v16 = vsel %vm2211_vm8, %v2462_v62, %v4933_v18  ;;  %v5155_v37 = vsel %vm2218_vm9, %v3267_v63, %v3263_v9  ;;  %v5162_v18 = vsel %vm2232_vm12, %v3119_v54, %v3115_v38  ;;  %vm2815_vm1 = vcmask 1041409  }
 0x136   : > { %v1945_v5 = vrot.slane %v1037_v40, %v4511_v25  ;;  %v2971_v1 = vunpack.c.l.b16 %v1037_v40  ;;  %v1952_v58 = vrot.slane %v1037_v40, %v4514_v26  ;;  %v1735_v19 = vrot.slane %v962_v57, %v4511_v25 }
 0x137   : > { %v2941_v46 = vunpack.c.l.b16 %v962_v57  ;;  %v2972_v45 = vunpack.c.h.b16 %v1037_v40  ;;  %v1742_v51 = vrot.slane %v962_v57, %v4514_v26  ;;  %v2942_v17 = vunpack.c.h.b16 %v962_v57  ;;  %4098 = vmatpush3.bf16.msra.mxu1 %v4232_v15 }
 0x138   : > { %v2139_v27 = vunpack.c.l.b16 %v1945_v5  ;;  %v3558_v35 = vrot.slane %v2971_v1, %v4602_v7  ;;  %v2140_v41 = vunpack.c.l.b16 %v1952_v58  ;;  %v2109_v22 = vunpack.c.l.b16 %v1735_v19  ;;  %4099 = vmatprep.subr.bf16.mxu1 %v4333_v14 }
 0x139   : > { %v2319_v40 = vrot.slane %v2050_v10, %v4974_v50  ;;  %v3410_v56 = vrot.slane %v2941_v46, %v4718_v43  ;;  %v5168_v60 = vsel %vm2218_vm9, %v2467_v20, %v2463_v16  ;;  %v2315_v5 = vsel %vm2225_vm10, %v2314_v42, %v4939_v32 }
 0x13a   : > { %v2758_v49 = vrot.slane %v2139_v27, %v4602_v7  ;;  %v3563_v57 = vrot.slane %v2972_v45, %v4605_v8  ;;  %v3559_v59 = vsel %vm2183_vm4, %v3558_v35, %v5036_v6  ;;  %v2110_v29 = vunpack.c.l.b16 %v1742_v51 }
 0x13b   : > { %v2763_v62 = vrot.slane %v2140_v41, %v4605_v8  ;;  %v2610_v1 = vrot.slane %v2109_v22, %v4718_v43  ;;  %v3415_v63 = vrot.slane %v2942_v17, %v4721_v44  ;;  %v3411_v19 = vsel %vm2197_vm6, %v3410_v56, %v5043_v3 }
 0x13c   : > { %v2759_v32 = vsel %vm2183_vm4, %v2758_v49, %v5048_v30  ;;  %v5187_v8 = vsel %vm2232_vm12, %v2319_v40, %v2315_v5  ;;  %v5190_v9 = vsel %vm2190_vm5, %v3563_v57, %v3559_v59  ;;  %v2615_v45 = vrot.slane %v2110_v29, %v4721_v44 }
 0x13d   : > { %v927_v28 = vpop.xlane.xlu1 %926  ;;  %v852_v47 = vpop.xlane.xlu0 %851  ;;  %v5196_v38 = vsel %vm2190_vm5, %v2763_v62, %v2759_v32  ;;  %v5200_v16 = vsel %vm2204_vm7, %v3415_v63, %v3411_v19  ;;  %v2611_v51 = vsel %vm2197_vm6, %v2610_v1, %v5077_v31  ;;  %vm2817_vm2 = vcmask 1042434  }
 0x13e   : > { %v1637_v52 = vrot.slane %v927_v28, %v4511_v25  ;;  %v2927_v21 = vunpack.c.l.b16 %v927_v28  ;;  %v1427_v7 = vrot.slane %v852_v47, %v4511_v25  ;;  %v2897_v10 = vunpack.c.l.b16 %v852_v47 }
 0x13f   : > { %v1644_v6 = vrot.slane %v927_v28, %v4514_v26  ;;  %v2928_v23 = vunpack.c.h.b16 %v927_v28  ;;  %v1434_v27 = vrot.slane %v852_v47, %v4514_v26  ;;  %v2898_v20 = vunpack.c.h.b16 %v852_v47 }
 0x140   : > { %v2095_v54 = vunpack.c.l.b16 %v1637_v52  ;;  %v3341_v30 = vrot.slane %v2927_v21, %v4865_v53  ;;  %v2065_v46 = vunpack.c.l.b16 %v1427_v7  ;;  %v3193_v35 = vrot.slane %v2897_v10, %v4966_v55 }
 0x141   : > { %v2096_v28 = vunpack.c.l.b16 %v1644_v6  ;;  %v3346_v41 = vrot.slane %v2928_v23, %v4873_v61  ;;  %v2066_v47 = vunpack.c.l.b16 %v1434_v27  ;;  %v3198_v5 = vrot.slane %v2898_v20, %v4974_v50 }
 0x142   : > { %v2541_v17 = vrot.slane %v2095_v54, %v4865_v53  ;;  %v3342_v49 = vsel %vm2211_vm8, %v3341_v30, %v5080_v2  ;;  %v2393_v56 = vrot.slane %v2065_v46, %v4966_v55  ;;  %v5213_v31 = vsel %vm2204_vm7, %v2615_v45, %v2611_v51 }
 0x143   : > { %v3194_v52 = vsel %vm2225_vm10, %v3193_v35, %v5090_v11  ;;  %v2546_v21 = vrot.slane %v2096_v28, %v4873_v61  ;;  %v5222_v10 = vsel %vm2218_vm9, %v3346_v41, %v3342_v49  ;;  %v2398_v32 = vrot.slane %v2066_v47, %v4974_v50 }
 0x144   : > { %v2394_v6 = vsel %vm2225_vm10, %v2393_v56, %v5098_v13  ;;  %v5231_v23 = vsel %vm2232_vm12, %v3198_v5, %v3194_v52  ;;  %vm2819_vm3 = vcmask 1043459   ;;  %vm2821_vm4 = vcmask 1044484  }
 0x145   : > { %v777_v58 = vpop.xlane.xlu1 %776  ;;  %v1002_v42 = vpop.xlane.xlu0 %1001  ;;  %v5248_v41 = vsel %vm2232_vm12, %v2398_v32, %v2394_v6  ;;  %vm2823_vm5 = vcmask 1045509  }
 0x146   : > { %v1217_v3 = vrot.slane %v777_v58, %v4511_v25  ;;  %v2867_v22 = vunpack.c.l.b16 %v777_v58  ;;  %v1224_v15 = vrot.slane %v777_v58, %v4514_v26  ;;  %v2957_v40 = vunpack.c.l.b16 %v1002_v42 }
 0x147   : > { %v2868_v59 = vunpack.c.h.b16 %v777_v58  ;;  %v1847_v29 = vrot.slane %v1002_v42, %v4511_v25  ;;  %v1854_v2 = vrot.slane %v1002_v42, %v4514_v26  ;;  %v2958_v62 = vunpack.c.h.b16 %v1002_v42 }
 0x148   : > { %v2035_v57 = vunpack.c.l.b16 %v1217_v3  ;;  %v3045_v7 = vrot.slane %v2867_v22, %v4978_v4  ;;  %v2036_v19 = vunpack.c.l.b16 %v1224_v15  ;;  %v3489_v11 = vrot.slane %v2957_v40, %v4718_v43 }
 0x149   : > { %v2542_v58 = vsel %vm2211_vm8, %v2541_v17, %v5087_v12  ;;  %v3050_v27 = vrot.slane %v2868_v59, %v4995_v24  ;;  %v2125_v30 = vunpack.c.l.b16 %v1847_v29  ;;  %v2126_v42 = vunpack.c.l.b16 %v1854_v2 }
 0x14a   : > { %v2238_v54 = vrot.slane %v2035_v57, %v4978_v4  ;;  %v3046_v3 = vsel %vm2239_vm13, %v3045_v7, %v5113_v48  ;;  %v3494_v12 = vrot.slane %v2958_v62, %v4721_v44  ;;  %v5242_v45 = vsel %vm2218_vm9, %v2546_v21, %v2542_v58 }
 0x14b   : > { %v2245_v35 = vrot.slane %v2036_v19, %v4995_v24  ;;  %v3490_v51 = vsel %vm2197_vm6, %v3489_v11, %v5124_v33  ;;  %v5254_v15 = vsel %vm2246_vm14, %v3050_v27, %v3046_v3  ;;  %v2689_v40 = vrot.slane %v2125_v30, %v4718_v43 }
 0x14c   : > { %v2240_v48 = vsel %vm2239_vm13, %v2238_v54, %v5128_v0  ;;  %v2694_v33 = vrot.slane %v2126_v42, %v4721_v44  ;;  %v5259_v57 = vsel %vm2204_vm7, %v3494_v12, %v3490_v51 }
 0x14d   : > { %v892_v1 = vpop.xlane.xlu1 %891  ;;  %v817_v63 = vpop.xlane.xlu0 %816  ;;  %v5262_v0 = vsel %vm2246_vm14, %v2245_v35, %v2240_v48  ;;  %v2690_v11 = vsel %vm2197_vm6, %v2689_v40, %v5148_v34 }
 0x14e   : > { %v1539_v46 = vrot.slane %v892_v1, %v4511_v25  ;;  %v1329_v20 = vrot.slane %v817_v63, %v4511_v25  ;;  %v1546_v13 = vrot.slane %v892_v1, %v4514_v26  ;;  %v2913_v28 = vunpack.c.l.b16 %v892_v1 }
 0x14f   : > { %v1336_v22 = vrot.slane %v817_v63, %v4514_v26  ;;  %v2883_v17 = vunpack.c.l.b16 %v817_v63  ;;  %v2914_v59 = vunpack.c.h.b16 %v892_v1  ;;  %v2884_v62 = vunpack.c.h.b16 %v817_v63 }
 0x150   : > { %v2081_v49 = vunpack.c.l.b16 %v1539_v46  ;;  %v2051_v56 = vunpack.c.l.b16 %v1329_v20  ;;  %v2082_v52 = vunpack.c.l.b16 %v1546_v13  ;;  %v3272_v29 = vrot.slane %v2913_v28, %v4966_v55 }
 0x151   : > { %v2052_v2 = vunpack.c.l.b16 %v1336_v22  ;;  %v3124_v32 = vrot.slane %v2883_v17, %v4978_v4  ;;  %v3277_v27 = vrot.slane %v2914_v59, %v4974_v50  ;;  %v3129_v13 = vrot.slane %v2884_v62, %v4995_v24 }
 0x152   : > { %v2472_v58 = vrot.slane %v2081_v49, %v4966_v55  ;;  %v2324_v1 = vrot.slane %v2051_v56, %v4978_v4  ;;  %v2477_v54 = vrot.slane %v2082_v52, %v4974_v50  ;;  %v3273_v46 = vsel %vm2225_vm10, %v3272_v29, %v5155_v37 }
 0x153   : > { %v2329_v42 = vrot.slane %v2052_v2, %v4995_v24  ;;  %v3125_v12 = vsel %vm2239_vm13, %v3124_v32, %v5162_v18  ;;  %v5288_v17 = vsel %vm2204_vm7, %v2694_v33, %v2690_v11 }
 0x154   : > { %v2473_v28 = vsel %vm2225_vm10, %v2472_v58, %v5168_v60  ;;  %v2325_v48 = vsel %vm2239_vm13, %v2324_v1, %v5187_v8  ;;  %v5306_v59 = vsel %vm2246_vm14, %v3129_v13, %v3125_v12 }
 0x155   : > { %v1042_v47 = vpop.xlane.xlu1 %1041  ;;  %v967_v5 = vpop.xlane.xlu0 %966  ;;  %v5303_v33 = vsel %vm2246_vm14, %v2329_v42, %v2325_v48 }
 0x156   : > { %v1959_v21 = vrot.slane %v1042_v47, %v4511_v25  ;;  %v2973_v7 = vunpack.c.l.b16 %v1042_v47  ;;  %v1749_v19 = vrot.slane %v967_v5, %v4511_v25  ;;  %v1966_v6 = vrot.slane %v1042_v47, %v4514_v26 }
 0x157   : > { %v2974_v30 = vunpack.c.h.b16 %v1042_v47  ;;  %v1756_v63 = vrot.slane %v967_v5, %v4514_v26  ;;  %v2943_v34 = vunpack.c.l.b16 %v967_v5  ;;  %v2944_v22 = vunpack.c.h.b16 %v967_v5 }
 0x158   : > { %v2141_v20 = vunpack.c.l.b16 %v1959_v21  ;;  %v3568_v3 = vrot.slane %v2973_v7, %v4718_v43  ;;  %v2111_v35 = vunpack.c.l.b16 %v1749_v19  ;;  %v2142_v37 = vunpack.c.l.b16 %v1966_v6 }
 0x159   : > { %v5291_v47 = vsel %vm2232_vm12, %v3277_v27, %v3273_v46  ;;  %v3573_v18 = vrot.slane %v2974_v30, %v4721_v44  ;;  %v2112_v40 = vunpack.c.l.b16 %v1756_v63  ;;  %v3420_v60 = vrot.slane %v2943_v34, %v4865_v53 }
 0x15a   : > { %v2768_v49 = vrot.slane %v2141_v20, %v4718_v43  ;;  %v3569_v56 = vsel %vm2197_vm6, %v3568_v3, %v5190_v9  ;;  %v5300_v5 = vsel %vm2232_vm12, %v2477_v54, %v2473_v28  ;;  %v2620_v29 = vrot.slane %v2111_v35, %v4865_v53 }
 0x15b   : > { %v2773_v43 = vrot.slane %v2142_v37, %v4721_v44  ;;  %v3425_v9 = vrot.slane %v2944_v22, %v4873_v61  ;;  %v5313_v2 = vsel %vm2204_vm7, %v3573_v18, %v3569_v56  ;;  %v2625_v58 = vrot.slane %v2112_v40, %v4873_v61 }
 0x15c   : > { %v2769_v11 = vsel %vm2197_vm6, %v2768_v49, %v5196_v38  ;;  %v3421_v44 = vsel %vm2211_vm8, %v3420_v60, %v5200_v16  ;;  %v2621_v54 = vsel %vm2211_vm8, %v2620_v29, %v5213_v31  ;;  %vm2825_vm6 = vcmask 1046534  }
 0x15d   : > { %v932_v51 = vpop.xlane.xlu1 %931  ;;  %v857_v52 = vpop.xlane.xlu0 %856  ;;  %v5337_v13 = vsel %vm2204_vm7, %v2773_v43, %v2769_v11  ;;  %v5340_v35 = vsel %vm2218_vm9, %v2625_v58, %v2621_v54  ;;  %vm2827_vm7 = vcmask 1047559  }
 0x15e   : > { %v1651_v8 = vrot.slane %v932_v51, %v4511_v25  ;;  %v1658_v21 = vrot.slane %v932_v51, %v4514_v26  ;;  %v2929_v7 = vunpack.c.l.b16 %v932_v51  ;;  %v1441_v62 = vrot.slane %v857_v52, %v4511_v25 }
 0x15f   : > { %v1448_v32 = vrot.slane %v857_v52, %v4514_v26  ;;  %v2899_v19 = vunpack.c.l.b16 %v857_v52  ;;  %v2930_v27 = vunpack.c.h.b16 %v932_v51  ;;  %v2900_v38 = vunpack.c.h.b16 %v857_v52 }
 0x160   : > { %v2097_v1 = vunpack.c.l.b16 %v1651_v8  ;;  %v5326_v46 = vunpack.c.l.b16 %v1658_v21  ;;  %v3351_v20 = vrot.slane %v2929_v7, %v4966_v55  ;;  %v5331_v16 = vunpack.c.l.b16 %v1441_v62 }
 0x161   : > { %v5333_v42 = vunpack.c.l.b16 %v1448_v32  ;;  %v3203_v31 = vrot.slane %v2899_v19, %v4978_v4  ;;  %v5343_v51 = vsel %vm2218_vm9, %v3425_v9, %v3421_v44  ;;  %v5347_v48 = vrot.slane %v2930_v27, %v4974_v50 }
 0x162   : > { %v2551_v28 = vrot.slane %v2097_v1, %v4966_v55  ;;  %v2556_v40 = vrot.slane %v5326_v46, %v4974_v50  ;;  %v5355_v49 = vsel %vm2225_vm10, %v3351_v20, %v5222_v10  ;;  %v5358_v56 = vrot.slane %v2900_v38, %v4995_v24 }
 0x163   : > { %v2403_v8 = vrot.slane %v5331_v16, %v4978_v4  ;;  %v2408_v52 = vrot.slane %v5333_v42, %v4995_v24  ;;  %v5367_v29 = vsel %vm2239_vm13, %v3203_v31, %v5231_v23 }
 0x164   : > { %v2552_v10 = vsel %vm2225_vm10, %v2551_v28, %v5242_v45 }
 0x165   : > { %v782_v6 = vpop.xlane.xlu1 %781  ;;  %v5329_v34 = vpop.xlane.xlu0 %1006 }
 0x166   : > { %v1231_v30 = vrot.slane %v782_v6, %v4511_v25  ;;  %v1238_v63 = vrot.slane %v782_v6, %v4514_v26  ;;  %v2869_v3 = vunpack.c.l.b16 %v782_v6  ;;  %v2870_v22 = vunpack.c.h.b16 %v782_v6 }
 0x167   : > { %v1861_v18 = vrot.slane %v5329_v34, %v4511_v25  ;;  %v1868_v9 = vrot.slane %v5329_v34, %v4514_v26  ;;  %v2959_v21 = vunpack.c.l.b16 %v5329_v34  ;;  %v2960_v7 = vunpack.c.h.b16 %v5329_v34 }
 0x168   : > { %v2037_v12 = vunpack.c.l.b16 %v1231_v30  ;;  %v2038_v37 = vunpack.c.l.b16 %v1238_v63  ;;  %v3055_v60 = vrot.slane %v2869_v3, %v4999_v36  ;;  %v3060_v19 = vrot.slane %v2870_v22, %v5006_v39 }
 0x169   : > { %v2127_v11 = vunpack.c.l.b16 %v1861_v18  ;;  %v3499_v31 = vrot.slane %v2959_v21, %v4865_v53 }
 0x16a   : > { %v2252_v43 = vrot.slane %v2037_v12, %v4999_v36  ;;  %v2259_v32 = vrot.slane %v2038_v37, %v5006_v39  ;;  %v3056_v44 = vsel %vm2253_vm15, %v3055_v60, %v5254_v15  ;;  %v2128_v15 = vunpack.c.l.b16 %v1868_v9 }
 0x16b   : > { %v3061_v16 = vsel %vm2260_vm0, %v3060_v19, %v3056_v44  ;;  %v2699_v28 = vrot.slane %v2127_v11, %v4865_v53 }
 0x16c   : > { %v2254_v54 = vsel %vm2253_vm15, %v2252_v43, %v5262_v0 }
 0x16d   : > { %v897_v62 = vpop.xlane.xlu1 %896  ;;  %v822_v58 = vpop.xlane.xlu0 %821  ;;  %v2261_v18 = vsel %vm2260_vm0, %v2259_v32, %v2254_v54  ;;  %v3504_v54 = vrot.slane %v2960_v7, %v4873_v61 }
 0x16e   : > { %v1553_v23 = vrot.slane %v897_v62, %v4511_v25  ;;  %v1343_v45 = vrot.slane %v822_v58, %v4511_v25  ;;  %v1350_v1 = vrot.slane %v822_v58, %v4514_v26  ;;  %v2885_v6 = vunpack.c.l.b16 %v822_v58 }
 0x16f   : > { %v1560_v27 = vrot.slane %v897_v62, %v4514_v26  ;;  %v2915_v30 = vunpack.c.l.b16 %v897_v62  ;;  %v2886_v63 = vunpack.c.h.b16 %v822_v58  ;;  %v2916_v43 = vunpack.c.h.b16 %v897_v62 }
 0x170   : > { %v2083_v20 = vunpack.c.l.b16 %v1553_v23  ;;  %v2053_v38 = vunpack.c.l.b16 %v1343_v45  ;;  %v2054_v3 = vunpack.c.l.b16 %v1350_v1  ;;  %v3134_v34 = vrot.slane %v2885_v6, %v4999_v36 }
 0x171   : > { %v3139_v12 = vrot.slane %v2886_v63, %v5006_v39  ;;  %v2084_v60 = vunpack.c.l.b16 %v1560_v27  ;;  %v3282_v21 = vrot.slane %v2915_v30, %v4978_v4  ;;  %v2404_v1 = vsel %vm2239_vm13, %v2403_v8, %v5248_v41 }
 0x172   : > { %v2334_v0 = vrot.slane %v2053_v38, %v4999_v36  ;;  %v2339_v37 = vrot.slane %v2054_v3, %v5006_v39  ;;  %v3135_v22 = vsel %vm2253_vm15, %v3134_v34, %v5306_v59  ;;  %v2482_v9 = vrot.slane %v2083_v20, %v4978_v4 }
 0x173   : > { %v3140_v19 = vsel %vm2260_vm0, %v3139_v12, %v3135_v22  ;;  %v2704_v6 = vrot.slane %v2128_v15, %v4873_v61  ;;  %v2700_v27 = vsel %vm2211_vm8, %v2699_v28, %v5288_v17  ;;  %v3500_v30 = vsel %vm2211_vm8, %v3499_v31, %v5259_v57 }
 0x174   : > { %v2335_v11 = vsel %vm2253_vm15, %v2334_v0, %v5303_v33  ;;  %v5402_v23 = vsel %vm2815_vm1, %v3140_v19, %v3061_v16  ;;  %v3287_v63 = vrot.slane %v2916_v43, %v4995_v24  ;;  %v2487_v38 = vrot.slane %v2084_v60, %v4995_v24 }
 0x175   : > { %v1047_v58 = vpop.xlane.xlu1 %1046  ;;  %v2340_v44 = vsel %vm2260_vm0, %v2339_v37, %v2335_v11  ;;  %v972_v45 = vpop.xlane.xlu0 %971  ;;  %v3283_v41 = vsel %vm2239_vm13, %v3282_v21, %v5291_v47  ;;  %v2483_v3 = vsel %vm2239_vm13, %v2482_v9, %v5300_v5  ;;  %v5433_v16 = vsel %vm2232_vm12, %v2556_v40, %v2552_v10 }
 0x176   : > { %v1973_v59 = vrot.slane %v1047_v58, %v4511_v25  ;;  %v1980_v32 = vrot.slane %v1047_v58, %v4514_v26  ;;  %v2975_v62 = vunpack.c.l.b16 %v1047_v58  ;;  %v5412_v33 = vsel %vm2815_vm1, %v2340_v44, %v2261_v18 }
 0x177   : > { %v2976_v20 = vunpack.c.h.b16 %v1047_v58  ;;  %v1763_v7 = vrot.slane %v972_v45, %v4511_v25  ;;  %v1770_v57 = vrot.slane %v972_v45, %v4514_v26  ;;  %v5438_v47 = vsel %vm2232_vm12, %v5347_v48, %v5355_v49 }
 0x178   : > { %v3578_v8 = vrot.slane %v2975_v62, %v4865_v53  ;;  %v2143_v34 = vunpack.c.l.b16 %v1973_v59  ;;  %v5426_v17 = vunpack.c.l.b16 %v1980_v32  ;;  %v2409_v5 = vsel %vm2246_vm14, %v2408_v52, %v2404_v1 }
 0x179   : > { %v3209_v15 = vsel %vm2246_vm14, %v5358_v56, %v5367_v29  ;;  %v5448_v31 = vsel %vm2218_vm9, %v2704_v6, %v2700_v27  ;;  %v5451_v46 = vsel %vm2218_vm9, %v3504_v54, %v3500_v30  ;;  %v3583_v40 = vrot.slane %v2976_v20, %v4873_v61 }
 0x17a   : > { %v2945_v10 = vunpack.c.l.b16 %v972_v45  ;;  %v5455_v48 = vsel %vm2246_vm14, %v2487_v38, %v2483_v3  ;;  %v3288_v42 = vsel %vm2246_vm14, %v3287_v63, %v3283_v41  ;;  %v3579_v49 = vsel %vm2211_vm8, %v3578_v8, %v5313_v2 }
 0x17b   : > { %v2113_v52 = vunpack.c.l.b16 %v1763_v7  ;;  %v2778_v56 = vrot.slane %v2143_v34, %v4865_v53  ;;  %v2783_v29 = vrot.slane %v5426_v17, %v4873_v61  ;;  %v5463_v28 = vunpack.c.l.b16 %v1770_v57 }
 0x17c   : > { %v2946_v0 = vunpack.c.h.b16 %v972_v45  ;;  %v5469_v2 = vsel %vm2218_vm9, %v3583_v40, %v3579_v49  ;;  %v3430_v19 = vrot.slane %v2945_v10, %v4966_v55 }
 0x17d   : > { %v937_v12 = vpop.xlane.xlu1 %936  ;;  %v862_v37 = vpop.xlane.xlu0 %861  ;;  %v2630_v44 = vrot.slane %v2113_v52, %v4966_v55  ;;  %v2635_v59 = vrot.slane %v5463_v28, %v4974_v50  ;;  %v2779_v27 = vsel %vm2211_vm8, %v2778_v56, %v5337_v13 }
 0x17e   : > { %v1665_v22 = vrot.slane %v937_v12, %v4511_v25  ;;  %v1455_v18 = vrot.slane %v862_v37, %v4511_v25  ;;  %v1462_v60 = vrot.slane %v862_v37, %v4514_v26  ;;  %v2901_v43 = vunpack.c.l.b16 %v862_v37 }
 0x17f   : > { %v1672_v53 = vrot.slane %v937_v12, %v4514_v26  ;;  %v2902_v9 = vunpack.c.h.b16 %v862_v37  ;;  %v2931_v61 = vunpack.c.l.b16 %v937_v12  ;;  %v5478_v32 = vrot.slane %v2946_v0, %v4974_v50 }
 0x180   : > { %v2069_v21 = vunpack.c.l.b16 %v1455_v18  ;;  %v2070_v11 = vunpack.c.l.b16 %v1462_v60  ;;  %v3213_v58 = vrot.slane %v2901_v43, %v4999_v36  ;;  %v2099_v45 = vunpack.c.l.b16 %v1665_v22 }
 0x181   : > { %v3218_v62 = vrot.slane %v2902_v9, %v5006_v39  ;;  %v3431_v30 = vsel %vm2225_vm10, %v3430_v19, %v5343_v51  ;;  %v2932_v63 = vunpack.c.h.b16 %v937_v12  ;;  %v5489_v38 = vunpack.c.l.b16 %v1672_v53 }
 0x182   : > { %v2413_v1 = vrot.slane %v2069_v21, %v4999_v36  ;;  %v2418_v6 = vrot.slane %v2070_v11, %v5006_v39  ;;  %v3214_v54 = vsel %vm2253_vm15, %v3213_v58, %v3209_v15  ;;  %v3361_v41 = vrot.slane %v2931_v61, %v4978_v4 }
 0x183   : > { %v3219_v20 = vsel %vm2260_vm0, %v3218_v62, %v3214_v54  ;;  %v2561_v15 = vrot.slane %v2099_v45, %v4978_v4  ;;  %v2784_v18 = vsel %vm2218_vm9, %v2783_v29, %v2779_v27  ;;  %v2631_v19 = vsel %vm2225_vm10, %v2630_v44, %v5340_v35 }
 0x184   : > { %v2414_v8 = vsel %vm2253_vm15, %v2413_v1, %v2409_v5  ;;  %v3616_v7 = vsel %vm2817_vm2, %v3219_v20, %v5402_v23  ;;  %v3366_v53 = vrot.slane %v2932_v63, %v4995_v24  ;;  %v2566_v21 = vrot.slane %v5489_v38, %v4995_v24 }
 0x185   : > { %v902_v3 = vpop.xlane.xlu1 %901  ;;  %v2419_v34 = vsel %vm2260_vm0, %v2418_v6, %v2414_v8  ;;  %v1012_v57 = vpop.xlane.xlu0 %1011  ;;  %v3362_v29 = vsel %vm2239_vm13, %v3361_v41, %v5438_v47  ;;  %v2562_v35 = vsel %vm2239_vm13, %v2561_v15, %v5433_v16 }
 0x186   : > { %v1567_v13 = vrot.slane %v902_v3, %v4511_v25  ;;  %v1574_v17 = vrot.slane %v902_v3, %v4514_v26  ;;  %v2917_v51 = vunpack.c.l.b16 %v902_v3  ;;  %v2818_v40 = vsel %vm2817_vm2, %v2419_v34, %v5412_v33 }
 0x187   : > { %v2918_v10 = vunpack.c.h.b16 %v902_v3  ;;  %v1875_v5 = vrot.slane %v1012_v57, %v4511_v25  ;;  %v2961_v12 = vunpack.c.l.b16 %v1012_v57  ;;  %v1882_v0 = vrot.slane %v1012_v57, %v4514_v26 }
 0x188   : > { %v2085_v49 = vunpack.c.l.b16 %v1567_v13  ;;  %v2086_v52 = vunpack.c.l.b16 %v1574_v17  ;;  %v3292_v23 = vrot.slane %v2917_v51, %v4999_v36  ;;  %v2962_v22 = vunpack.c.h.b16 %v1012_v57 }
 0x189   : > { %v3297_v56 = vrot.slane %v2918_v10, %v5006_v39  ;;  %v2129_v37 = vunpack.c.l.b16 %v1875_v5  ;;  %v3509_v43 = vrot.slane %v2961_v12, %v4966_v55  ;;  %v2130_v58 = vunpack.c.l.b16 %v1882_v0 }
 0x18a   : > { %v2492_v60 = vrot.slane %v2085_v49, %v4999_v36  ;;  %v3293_v33 = vsel %vm2253_vm15, %v3292_v23, %v3288_v42  ;;  %v2497_v9 = vrot.slane %v2086_v52, %v5006_v39  ;;  %v3514_v62 = vrot.slane %v2962_v22, %v4974_v50 }
 0x18b   : > { %v3298_v61 = vsel %vm2260_vm0, %v3297_v56, %v3293_v33  ;;  %v2709_v44 = vrot.slane %v2129_v37, %v4966_v55  ;;  %v3510_v1 = vsel %vm2225_vm10, %v3509_v43, %v5451_v46  ;;  %v2636_v17 = vsel %vm2232_vm12, %v2635_v59, %v2631_v19 }
 0x18c   : > { %v2493_v42 = vsel %vm2253_vm15, %v2492_v60, %v5455_v48  ;;  %v5521_v11 = vsel %vm2819_vm3, %v3298_v61, %v3616_v7  ;;  %v3436_v51 = vsel %vm2232_vm12, %v5478_v32, %v3431_v30  ;;  %v3367_v57 = vsel %vm2246_vm14, %v3366_v53, %v3362_v29 }
 0x18d   : > { %v1052_v45 = vpop.xlane.xlu1 %1051  ;;  %v977_v54 = vpop.xlane.xlu0 %976  ;;  %v2498_v27 = vsel %vm2260_vm0, %v2497_v9, %v2493_v42  ;;  %v2567_v10 = vsel %vm2246_vm14, %v2566_v21, %v2562_v35  ;;  %v2710_v5 = vsel %vm2225_vm10, %v2709_v44, %v5448_v31  ;;  %v2714_v49 = vrot.slane %v2130_v58, %v4974_v50 }
 0x18e   : > { %v1987_v47 = vrot.slane %v1052_v45, %v4511_v25  ;;  %v1994_v6 = vrot.slane %v1052_v45, %v4514_v26  ;;  %v2977_v48 = vunpack.c.l.b16 %v1052_v45  ;;  %v1777_v63 = vrot.slane %v977_v54, %v4511_v25 }
 0x18f   : > { %v1784_v16 = vrot.slane %v977_v54, %v4514_v26  ;;  %v2947_v20 = vunpack.c.l.b16 %v977_v54  ;;  %v2978_v8 = vunpack.c.h.b16 %v1052_v45  ;;  %v2948_v34 = vunpack.c.h.b16 %v977_v54 }
 0x190   : > { %v2145_v38 = vunpack.c.l.b16 %v1987_v47  ;;  %v2146_v41 = vunpack.c.l.b16 %v1994_v6  ;;  %v3588_v7 = vrot.slane %v2977_v48, %v4966_v55  ;;  %v2115_v3 = vunpack.c.l.b16 %v1777_v63 }
 0x191   : > { %v2116_v46 = vunpack.c.l.b16 %v1784_v16  ;;  %v3440_v13 = vrot.slane %v2947_v20, %v4978_v4  ;;  %v3515_v28 = vsel %vm2232_vm12, %v3514_v62, %v3510_v1  ;;  %v3593_v32 = vrot.slane %v2978_v8, %v4974_v50 }
 0x192   : > { %v2788_v15 = vrot.slane %v2145_v38, %v4966_v55  ;;  %v2640_v52 = vrot.slane %v2115_v3, %v4978_v4  ;;  %v2793_v59 = vrot.slane %v2146_v41, %v4974_v50  ;;  %v5553_v30 = vsel %vm2819_vm3, %v2498_v27, %v2818_v40 }
 0x193   : > { %v3589_v55 = vsel %vm2225_vm10, %v3588_v7, %v5469_v2  ;;  %v2645_v23 = vrot.slane %v2116_v46, %v4995_v24  ;;  %v3441_v31 = vsel %vm2239_vm13, %v3440_v13, %v3436_v51  ;;  %v3445_v12 = vrot.slane %v2948_v34, %v4995_v24 }
 0x194   : > { %v2789_v0 = vsel %vm2225_vm10, %v2788_v15, %v2784_v18  ;;  %v2641_v40 = vsel %vm2239_vm13, %v2640_v52, %v2636_v17  ;;  %v2715_v35 = vsel %vm2232_vm12, %v2714_v49, %v2710_v5  ;;  %v3594_v58 = vsel %vm2232_vm12, %v3593_v32, %v3589_v55 }
 0x195   : > { %v1017_v56 = vpop.xlane.xlu1 %1016  ;;  %v942_v60 = vpop.xlane.xlu0 %941  ;;  %v3446_v44 = vsel %vm2246_vm14, %v3445_v12, %v3441_v31  ;;  %v2794_v45 = vsel %vm2232_vm12, %v2793_v59, %v2789_v0  ;;  %v2646_v48 = vsel %vm2246_vm14, %v2645_v23, %v2641_v40 }
 0x196   : > { %v1889_v37 = vrot.slane %v1017_v56, %v4511_v25  ;;  %v1896_v22 = vrot.slane %v1017_v56, %v4514_v26  ;;  %v2963_v50 = vunpack.c.l.b16 %v1017_v56  ;;  %v1679_v33 = vrot.slane %v942_v60, %v4511_v25 }
 0x197   : > { %v1686_v2 = vrot.slane %v942_v60, %v4514_v26  ;;  %v2933_v43 = vunpack.c.l.b16 %v942_v60  ;;  %v2964_v9 = vunpack.c.h.b16 %v1017_v56  ;;  %v2934_v61 = vunpack.c.h.b16 %v942_v60 }
 0x198   : > { %v2131_v19 = vunpack.c.l.b16 %v1889_v37  ;;  %v5566_v53 = vunpack.c.l.b16 %v1896_v22  ;;  %v3519_v18 = vrot.slane %v2963_v50, %v4978_v4  ;;  %v2101_v21 = vunpack.c.l.b16 %v1679_v33 }
 0x199   : > { %v2102_v29 = vunpack.c.l.b16 %v1686_v2  ;;  %v3371_v42 = vrot.slane %v2933_v43, %v4999_v36  ;;  %v3376_v62 = vrot.slane %v2934_v61, %v5006_v39  ;;  %v3524_v27 = vrot.slane %v2964_v9, %v4995_v24 }
 0x19a   : > { %v2571_v1 = vrot.slane %v2101_v21, %v4999_v36  ;;  %v2719_v54 = vrot.slane %v2131_v19, %v4978_v4  ;;  %v2724_v16 = vrot.slane %v5566_v53, %v4995_v24  ;;  %v3520_v20 = vsel %vm2239_vm13, %v3519_v18, %v3515_v28 }
 0x19b   : > { %v2576_v47 = vrot.slane %v2102_v29, %v5006_v39  ;;  %v3372_v6 = vsel %vm2253_vm15, %v3371_v42, %v3367_v57  ;;  %v3525_v22 = vsel %vm2246_vm14, %v3524_v27, %v3520_v20 }
 0x19c   : > { %v3377_v63 = vsel %vm2260_vm0, %v3376_v62, %v3372_v6  ;;  %v2572_v38 = vsel %vm2253_vm15, %v2571_v1, %v2567_v10  ;;  %v2720_v56 = vsel %vm2239_vm13, %v2719_v54, %v2715_v35 }
 0x19d   : > { %v1057_v41 = vpop.xlane.xlu1 %1056  ;;  %v3618_v8 = vsel %vm2821_vm4, %v3377_v63, %v5521_v11  ;;  %v2577_v7 = vsel %vm2260_vm0, %v2576_v47, %v2572_v38  ;;  %v982_v13 = vpop.xlane.xlu0 %981 }
 0x19e   : > { %v2001_v3 = vrot.slane %v1057_v41, %v4511_v25  ;;  %v2008_v46 = vrot.slane %v1057_v41, %v4514_v26  ;;  %v2979_v34 = vunpack.c.l.b16 %v1057_v41  ;;  %v2980_v17 = vunpack.c.h.b16 %v1057_v41 }
 0x19f   : > { %v1791_v51 = vrot.slane %v982_v13, %v4511_v25  ;;  %v1798_v57 = vrot.slane %v982_v13, %v4514_v26  ;;  %v2949_v15 = vunpack.c.l.b16 %v982_v13  ;;  %v2950_v52 = vunpack.c.h.b16 %v982_v13 }
 0x1a0   : > { %v2147_v5 = vunpack.c.l.b16 %v2001_v3  ;;  %v2148_v10 = vunpack.c.l.b16 %v2008_v46  ;;  %v3598_v49 = vrot.slane %v2979_v34, %v4978_v4  ;;  %v3603_v11 = vrot.slane %v2980_v17, %v4995_v24 }
 0x1a1   : > { %v2117_v28 = vunpack.c.l.b16 %v1791_v51  ;;  %v2118_v59 = vunpack.c.l.b16 %v1798_v57  ;;  %v3450_v32 = vrot.slane %v2949_v15, %v4999_v36  ;;  %v3455_v12 = vrot.slane %v2950_v52, %v5006_v39 }
 0x1a2   : > { %v2798_v55 = vrot.slane %v2147_v5, %v4978_v4  ;;  %v2803_v23 = vrot.slane %v2148_v10, %v4995_v24  ;;  %v3599_v31 = vsel %vm2239_vm13, %v3598_v49, %v3594_v58  ;;  %v2822_v40 = vsel %vm2821_vm4, %v2577_v7, %v5553_v30  ;;  %v4233_v5 = vld [vmem:[%s5741_s3 + $0x30] sm:$0xff]   ;;  %v4234_v10 = vld [vmem:[%s5741_s3 + $0x38] sm:$0xff]   ;;  %v4024_v49 = vld [vmem:[%s5740_s2] ss:$0 sm:$0xff] }
 0x1a3   : > { %v2650_v0 = vrot.slane %v2117_v28, %v4999_v36  ;;  %v3451_v37 = vsel %vm2253_vm15, %v3450_v32, %v3446_v44  ;;  %v2655_v4 = vrot.slane %v2118_v59, %v5006_v39  ;;  %v3604_v43 = vsel %vm2246_vm14, %v3603_v11, %v3599_v31  ;;  %4100 = vmatpush3.bf16.msra.mxu1 %v4233_v5 }
 0x1a4   : > { %v2799_v50 = vsel %vm2239_vm13, %v2798_v55, %v2794_v45  ;;  %v3456_v60 = vsel %vm2260_vm0, %v3455_v12, %v3451_v37  ;;  %v2725_v3 = vsel %vm2246_vm14, %v2724_v16, %v2720_v56  ;;  %4101 = vmatprep.subr.bf16.mxu1 %v4333_v14 }
 0x1a5   : > { %v2651_v33 = vsel %vm2253_vm15, %v2650_v0, %v2646_v48  ;;  %v1062_v2 = vpop.xlane.xlu1 %1061  ;;  %v3619_v19 = vsel %vm2823_vm5, %v3456_v60, %v3618_v8  ;;  %v2804_v9 = vsel %vm2246_vm14, %v2803_v23, %v2799_v50  ;;  %v1022_v42 = vpop.xlane.xlu0 %1021 }
 0x1a6   : > { %v2015_v61 = vrot.slane %v1062_v2, %v4511_v25  ;;  %v2022_v18 = vrot.slane %v1062_v2, %v4514_v26  ;;  %v2981_v21 = vunpack.c.l.b16 %v1062_v2  ;;  %v2982_v29 = vunpack.c.h.b16 %v1062_v2 }
 0x1a7   : > { %v1903_v35 = vrot.slane %v1022_v42, %v4511_v25  ;;  %v1910_v30 = vrot.slane %v1022_v42, %v4514_v26  ;;  %v2965_v58 = vunpack.c.l.b16 %v1022_v42  ;;  %v2966_v44 = vunpack.c.h.b16 %v1022_v42  ;;  %4102 = vmatpush3.bf16.msra.mxu1 %v4234_v10 }
 0x1a8   : > { %v2149_v62 = vunpack.c.l.b16 %v2015_v61  ;;  %v2150_v45 = vunpack.c.l.b16 %v2022_v18  ;;  %v3608_v1 = vrot.slane %v2981_v21, %v4999_v36  ;;  %v3613_v47 = vrot.slane %v2982_v29, %v5006_v39 }
 0x1a9   : > { %v2133_v6 = vunpack.c.l.b16 %v1903_v35  ;;  %v2134_v48 = vunpack.c.l.b16 %v1910_v30  ;;  %v3529_v54 = vrot.slane %v2965_v58, %v4999_v36  ;;  %v3534_v27 = vrot.slane %v2966_v44, %v5006_v39 }
 0x1aa   : > { %v2808_v63 = vrot.slane %v2149_v62, %v4999_v36  ;;  %v2813_v25 = vrot.slane %v2150_v45, %v5006_v39  ;;  %v3609_v26 = vsel %vm2253_vm15, %v3608_v1, %v3604_v43  ;;  %v2656_v20 = vsel %vm2260_vm0, %v2655_v4, %v2651_v33 }
 0x1ab   : > { %v2729_v38 = vrot.slane %v2133_v6, %v4999_v36  ;;  %v2734_v41 = vrot.slane %v2134_v48, %v5006_v39  ;;  %v3530_v8 = vsel %vm2253_vm15, %v3529_v54, %v3525_v22  ;;  %v3614_v7 = vsel %vm2260_vm0, %v3613_v47, %v3609_v26 }
 0x1ac   : > { %v3535_v46 = vsel %vm2260_vm0, %v3534_v27, %v3530_v8  ;;  %v2809_v34 = vsel %vm2253_vm15, %v2808_v63, %v2804_v9  ;;  %v2824_v13 = vsel %vm2823_vm5, %v2656_v20, %v2822_v40 }
 0x1ad   : > { %v2730_v36 = vsel %vm2253_vm15, %v2729_v38, %v2725_v3  ;;  %v3620_v39 = vsel %vm2825_vm6, %v3535_v46, %v3619_v19  ;;  %v2814_v17 = vsel %vm2260_vm0, %v2813_v25, %v2809_v34 }
 0x1ae   : > { %v3621_v51 = vsel %vm2827_vm7, %v3614_v7, %v3620_v39  ;;  %v2735_v24 = vsel %vm2260_vm0, %v2734_v41, %v2730_v36 }
 0x1af   : > { %v3622_v53 = vpack.c.b16 %v3621_v51, %v3621_v51  ;;  %v2826_v16 = vsel %vm2825_vm6, %v2735_v24, %v2824_v13 }
 0x1b0   : > { %v2828_v57 = vsel %vm2827_vm7, %v2814_v17, %v2826_v16 }
 0x1b1   : > { %4084 = vmatmul.mubr.bf16.vlgmr.msra.gmra.mrb[0].mxu0 %v3622_v53  ;;  %v2829_v15 = vpack.c.b16 %v2828_v57, %v2828_v57 }
 0x1b3   : > { %2831 = vst [vmem:[%s266_s14] sm:$0xf] %v2829_v15 }
 0x284   : > { %v3706_v52 = vpop.f32.mrb[0].mxu0 }
 0x285   : > { %v3707_v11 = vadd.f32 %v4024_v49, %v3706_v52  ;;  %v4085_v28 = vpop.f32.mrb[1].mxu0 }
 0x286   : > { %v3709_v59 = vpop.f32.mrb[2].mxu0 }
 0x287   : > { %v3712_v32 = vmax.f32 %v3707_v11, 0.0  ;;  %v4086_v55 = vpop.f32.mrb[3].mxu0 }
 0x289   : > { %v3713_v23 = vpack.c.bf16 %v3712_v32, %v3712_v32 }
 0x28b   : > { %4104 = vmatmul.mubr.bf16.vlgmr.msra.gmra.mrb[0].mxu1 %v3713_v23 }
 0x28c   : > { %4248 = shalt.err (!%p4245_p3)
}
 0x28d   : > { %s4249_s14 = scalar_lea.hbm %s5665_s9, 64  ;;  %s4253_s28 = scalar_lea.hbm %s5743_s5, 128 }
 0x28e   : > { %p4250_p4 = scmp.ne.s32.totalorder %s5665_s9, %s4249_s14  ;;  %p4254_p9 = scmp.lt.u32.totalorder %s5665_s9, %s5743_s5 }
 0x28f   : > { %p4255_p10 = scmp.lt.u32.totalorder %s4253_s28, %s4249_s14  ;;  %p4257_p12 = scmp.lt.u32.totalorder %s4249_s14, %s5665_s9 }
 0x290   : > { %p4251_p7 = pnand %p4250_p4, %p4410_p5 }
 0x291   : > { %p4256_p11 = por %p4255_p10, %p4254_p9 }
 0x292   : > { %p4252_p8 = pneg %p4251_p7 }
 0x293   : > { %p4258_p13 = por %p4257_p12, %p4256_p11 }
 0x295   : > { %p4259_p0 = pnand %p4258_p13, %p4252_p8 }
 0x297   : > { %4262 = shalt.err (!%p4259_p0)
}
 0x298   : > { %4107 = dma.vmem_to_hbm [thread:$0]  (%p4410_p5), %s3848_s10, 64, %s5665_s9, %s3829_s11   ;;  %v4033_v14 = vld [vmem:[%s5742_s4] ss:$0 sm:$0xff] }
 0x299   : > { %s273_s18 = scalar_lea.vmem [#allocation4], %s3955_s13  ;;  %s5695_s9 = scalar_lea.hbm %s5744_s6, %s4044_s26 }
 0x29a   : > { %s3860_s14 = sshll.u32 %s273_s18, 4  ;;  %s3834_s10 = scalar_lea.sflag [#allocation5], %s5625_s12  ;;  %s5697_s14 = int_to_ptr.vmem [resolvable:$true] %s3860_s14 }
 0x29b   : > { %s4263_s11 = scalar_lea.vmem %s5697_s14, 64  ;;  %s4336_s13 = smov [#allocation4]  }
 0x29c   : > { %p4264_p1 = scmp.ne.s32.totalorder %s5697_s14, %s4263_s11  ;;  %s4267_s28 = sshll.u32 %s4336_s13, 4  ;;  %s4268_s28 = int_to_ptr.vmem [resolvable:$false] %s4267_s28 }
 0x29d   : > { %s4269_s25 = scalar_lea.vmem %s4268_s28, 128  ;;  %p4270_p4 = scmp.lt.s32.totalorder %s5697_s14, %s4268_s28 }
 0x29e   : > { %p4265_p2 = pnand %p4264_p1, %p4410_p5  ;;  %p4271_p7 = scmp.lt.s32.totalorder %s4269_s25, %s4263_s11 }
 0x2a0   : > { %p4266_p3 = pneg %p4265_p2  ;;  %p4272_p8 = por %p4271_p7, %p4270_p4 }
 0x2a2   : > { %p4273_p9 = pnand %p4272_p8, %p4266_p3 }
 0x35e   : > { %v3819_v31 = vpop.f32.mrb[0].mxu1 }
 0x35f   : > { %v3820_v12 = vadd.f32 %v4033_v14, %v3819_v31  ;;  %v4105_v56 = vpop.f32.mrb[1].mxu1 }
 0x360   : > { %v3822_v0 = vpop.f32.mrb[2].mxu1 }
 0x361   : > { %v3825_v37 = vmax.f32 %v3820_v12, 0.0  ;;  %v4106_v22 = vpop.f32.mrb[3].mxu1 }
 0x363   : > { %v3826_v50 = vpack.c.bf16 %v3825_v37, %v3825_v37 }
 0x365   : > { %3827 = vst [vmem:[%s273_s18] sm:$0xf] %v3826_v50 }
 0x366   : > { %4276 = shalt.err (!%p4273_p9)
}
 0x367   : > { %s4277_s12 = scalar_lea.hbm %s5695_s9, 64  ;;  %s4281_s16 = scalar_lea.hbm %s5744_s6, 128 }
 0x368   : > { %p4278_p10 = scmp.ne.s32.totalorder %s5695_s9, %s4277_s12  ;;  %p4282_p13 = scmp.lt.u32.totalorder %s5695_s9, %s5744_s6 }
 0x369   : > { %p4283_p0 = scmp.lt.u32.totalorder %s4281_s16, %s4277_s12  ;;  %p4285_p2 = scmp.lt.u32.totalorder %s4277_s12, %s5695_s9 }
 0x36a   : > { %p4279_p11 = pnand %p4278_p10, %p4410_p5 }
 0x36b   : > { %p4284_p1 = por %p4283_p0, %p4282_p13 }
 0x36c   : > { %p4280_p12 = pneg %p4279_p11 }
 0x36d   : > { %p4286_p3 = por %p4285_p2, %p4284_p1 }
 0x36f   : > { %p4287_p4 = pnand %p4286_p3, %p4280_p12 }
 0x371   : > { %4290 = shalt.err (!%p4287_p4)
}
 0x372   : > { %4108 = dma.vmem_to_hbm [thread:$0]  (%p4410_p5), %s5697_s14, 64, %s5695_s9, %s3834_s10  }
 0x373 PF: > { %p4118_p7 = scmp.ge.s32.totalorder %s4329_s24, 2  ;;  %s3872_s18 = sand.u32 1, %s4317_s21  }
 0x374   : > { %s3873_s19 = scalar_lea.sflag [#allocation3], %s3872_s18 }
 0x375   : > { %p4112_p8 = pnand %p4118_p7, %p4414_p6 }
 0x377   : > { %4308 = dma.done.wait (!%p4112_p8), %s3873_s19, 64  }
 0x378   : > { %4310 = vsyncadd (!%p4112_p8), %s3873_s19, 4294967232  ;;  %s3882_s20 = scalar_lea.sflag [#allocation5], %s3872_s18 }
 0x379   : > { %4312 = dma.done.wait (!%p4112_p8), %s3882_s20, 64  }
 0x37a   : > { %4314 = vsyncadd (!%p4112_p8), %s3882_s20, 4294967232  ;;  %p20_p5 = scmp.ge.s32.totalorder %s4397_s27, 4   ;;  %s5747_s21 = smov %s4321_s22 }
 0x37b   : > { %s5748_s22 = smov %s4325_s23  ;;  %s5749_s23 = smov %s4408_s30 }
 0x37c   : > { %s5750_s24 = smov %s4397_s27  ;;  %22 = sbr.rel (!%p20_p5) target bundleno = 5 (0x5), region = 92 }
 0x383   :  { %3887 = vsyncpa [#allocation3], 1 }
 0x384   :  { %3889 = vsyncpa [#allocation3 + $0x1], 1 }
 0x385   :  { %3890 = vsyncpa [#allocation5], 1 }
 0x386   :  { %3892 = vsyncpa [#allocation5 + $0x1], 1 }

// kernel: tpu_custom_call.1
= control target key start
LH: loop header
LB: loop body
LE: loop exit
PB: predicated region body
PF: predicated region fallthrough
CT: control target
= control target key end

     0   :  { %12 = vsyncpa [#allocation3], 0  ;;  %s5738_s0 = inlined_call_operand.vmem [shape: bf16[10,128,49], index: 0, kind: input, shape index: {}]   ;;  %s5739_s1 = inlined_call_operand.vmem [shape: bf16[128,128], index: 1, kind: input, shape index: {}]   ;;  %s5740_s2 = inlined_call_operand.vmem [shape: f32[1,128], index: 2, kind: input, shape index: {}]   ;;  %s5741_s3 = inlined_call_operand.vmem [shape: bf16[128,128], index: 3, kind: input, shape index: {}]   ;;  %s5742_s4 = inlined_call_operand.vmem [shape: f32[1,128], index: 4, kind: input, shape index: {}]   ;;  %s5743_s5 = inlined_call_operand.hbm [shape: bf16[10,128], index: 5, kind: output, shape index: {0}]   ;;  %s5744_s6 = inlined_call_operand.hbm [shape: bf16[10,128], index: 6, kind: output, shape index: {1}]  }
   0x1   :  { %14 = vsyncpa [#allocation3 + $0x1], 0 }
   0x2   :  { %15 = vsyncpa [#allocation5], 0 }
   0x3   :  { %17 = vsyncpa [#allocation5 + $0x1], 0  ;;  %s4372_s21 = smov 0   ;;  %s4374_s22 = smov 0  }
   0x4   :  { %s4376_s23 = smov 0   ;;  %s4378_s24 = smov 0  }
   0x5 LB: > { %s4393_s25 = sadd.s32 4294967295, %s4329_s24   ;;  %s3951_s26 = sadd.s32 4294967294, %s4329_s24   ;;  %s4329_s24 = sphi %s4378_s24, %s5750_s24   ;;  %s4325_s23 = sphi %s4376_s23, %s5749_s23   ;;  %s4321_s22 = sphi %s4374_s22, %s5748_s22   ;;  %s4317_s21 = sphi %s4372_s21, %s5747_s21  }
   0x6   : > { %s4397_s27 = sadd.s32 1, %s4329_s24   ;;  %s140_s28 = sadd.s32 1, %s4325_s23 }
   0x7   : > { %s137_s29 = ssub.s32 %s4329_s24, %s4397_s27  ;;  %p150_p0 = scmp.ne.s32.totalorder %s4325_s23, %s4321_s22 }
   0x8   : > { %p138_p1 = scmp.eq.s32.totalorder %s137_s29, 0  ;;  %p151_p2 = scmp.eq.s32.totalorder %s4393_s25, 1 }
   0x9   : > { %p156_p3 = scmp.ne.s32.totalorder %s4321_s22, %s4317_s21  ;;  %p157_p4 = scmp.eq.s32.totalorder %s3951_s26, 1 }
   0xa   : > { %s4408_s30 = scalar_select %p138_p1, %s4325_s23, %s140_s28  }
   0xb   : > { %p4410_p5 = por %p151_p2, %p150_p0  ;;  %p4414_p6 = por %p157_p4, %p156_p3 }
   0xc   : > { %p3954_p7 = scmp.ge.s32.totalorder %s4329_s24, 1  ;;  %p233_p8 = scmp.lt.s32.totalorder %s4329_s24, 3 }
   0xe   : > { %p234_p9 = pnand %p3954_p7, %p233_p8 }
   0xf   : > { %s3957_s9 = sshll.u32 (!%p234_p9), %s4393_s25, 3  ;;  %vm741_vm0 = vcmask (!%p234_p9), 400384   ;;  %vm2162_vm1 = vcmask (!%p234_p9), 130112   ;;  %vm2169_vm2 = vcmask (!%p234_p9), 195712   ;;  %vm2176_vm3 = vcmask (!%p234_p9), 261312   ;;  %s5625_s12 = sand.u32 (!%p234_p9), 1, %s4321_s22  }
  0x10   : > { %237 = sbr.rel (%p234_p9) target bundleno = 883 (0x373), region = 40  ;;  %p280_p10 = scmp.lt.s32.totalorder (!%p234_p9), %s3957_s9, 9  ;;  %vm2183_vm4 = vcmask (!%p234_p9), 326912   ;;  %vm2190_vm5 = vcmask (!%p234_p9), 392512   ;;  %vm2197_vm6 = vcmask (!%p234_p9), 458112   ;;  %vm2204_vm7 = vcmask (!%p234_p9), 523712  }
  0x11   : > { %vm2211_vm8 = vcmask (!%p234_p9), 589312   ;;  %vm2218_vm9 = vcmask (!%p234_p9), 654912   ;;  %vm2225_vm10 = vcmask (!%p234_p9), 720512   ;;  %vm4334_vm11 = vmmov (!%p234_p9), 0   ;;  %s4044_s26 = sshll.u32 (!%p234_p9), %s4393_s25, 6  ;;  %s3829_s11 = scalar_lea.sflag (!%p234_p9), [#allocation3], %s5625_s12 }
  0x12   : > { %vm2232_vm12 = vcmask (!%p234_p9), 786112   ;;  %vm2239_vm13 = vcmask (!%p234_p9), 851712   ;;  %vm2246_vm14 = vcmask (!%p234_p9), 917312   ;;  %vm2253_vm15 = vcmask (!%p234_p9), 982912   ;;  %s4335_s16 = smov (!%p234_p9), [#allocation2]  }
  0x13   : > { %s4239_s17 = sshll.u32 (!%p234_p9), %s4335_s16, 4  ;;  %s4240_s17 = int_to_ptr.vmem [resolvable:$false] %s4239_s17 }
  0x14   : > { %s4241_s18 = scalar_lea.vmem (!%p234_p9), %s4240_s17, 128 }
  0x17   : > { %s5752_s9 = smov (!%p280_p10, %s3957_s9), 9 }
  0x18   : > { %s4048_s10 = sshll.u32 %s5752_s9, 6  ;;  %s5665_s9 = scalar_lea.hbm %s5743_s5, %s4044_s26 }
  0x19   : > { %s4424_s13 = scalar_lea.vmem %s5738_s0, %s4048_s10 }
  0x1a   : > { %v4155_v0 = vld [vmem:[%s4424_s13 + $0x8] sm:$0xff]   ;;  %v4156_v1 = vld [vmem:[%s4424_s13] sm:$0xff]   ;;  %v4161_v12 = vld [vmem:[%s4424_s13 + $0x10] sm:$0xff]  }
  0x1b   : > { %v749_v2 = vsel %vm741_vm0, %v4155_v0, 4286644096  ;;  %v744_v3 = vsel %vm741_vm0, %v4156_v1, 4286644096  ;;  %v4157_v4 = vld [vmem:[%s4424_s13 + $0x48] sm:$0xff]   ;;  %v4158_v5 = vld [vmem:[%s4424_s13 + $0x40] sm:$0xff]  }
  0x1c   : > { %751 = vmax.xlane.bf16.xlu1 %v749_v2  ;;  %746 = vmax.xlane.bf16.xlu0 %v744_v3  ;;  %v789_v6 = vsel %vm741_vm0, %v4157_v4, 4286644096  ;;  %v784_v7 = vsel %vm741_vm0, %v4158_v5, 4286644096  ;;  %v4159_v8 = vld [vmem:[%s4424_s13 + $0x88] sm:$0xff]   ;;  %v4160_v9 = vld [vmem:[%s4424_s13 + $0x80] sm:$0xff]  }
  0x1d   : > { %v829_v10 = vsel %vm741_vm0, %v4159_v8, 4286644096  ;;  %v824_v11 = vsel %vm741_vm0, %v4160_v9, 4286644096  ;;  %v4162_v13 = vld [vmem:[%s4424_s13 + $0xc0] sm:$0xff]   ;;  %v4163_v16 = vld [vmem:[%s4424_s13 + $0xc8] sm:$0xff]  }
  0x1e   : > { %v754_v14 = vsel %vm741_vm0, %v4161_v12, 4286644096  ;;  %v864_v15 = vsel %vm741_vm0, %v4162_v13, 4286644096  ;;  %v4164_v17 = vld [vmem:[%s4424_s13 + $0x50] sm:$0xff]   ;;  %v4166_v21 = vld [vmem:[%s4424_s13 + $0x100] sm:$0xff]  }
  0x1f   : > { %v869_v18 = vsel %vm741_vm0, %v4163_v16, 4286644096  ;;  %v794_v19 = vsel %vm741_vm0, %v4164_v17, 4286644096  ;;  %v4165_v20 = vld [vmem:[%s4424_s13 + $0x90] sm:$0xff]   ;;  %v4167_v24 = vld [vmem:[%s4424_s13 + $0x140] sm:$0xff]  }
  0x20   : > { %v834_v22 = vsel %vm741_vm0, %v4165_v20, 4286644096  ;;  %v904_v23 = vsel %vm741_vm0, %v4166_v21, 4286644096  ;;  %v4168_v25 = vld [vmem:[%s4424_s13 + $0x108] sm:$0xff]   ;;  %v4169_v28 = vld [vmem:[%s4424_s13 + $0x58] sm:$0xff]  }
  0x21   : > { %v944_v26 = vsel %vm741_vm0, %v4167_v24, 4286644096  ;;  %v909_v27 = vsel %vm741_vm0, %v4168_v25, 4286644096  ;;  %v4170_v29 = vld [vmem:[%s4424_s13 + $0x18] sm:$0xff]   ;;  %v4171_v31 = vld [vmem:[%s4424_s13 + $0x148] sm:$0xff]  }
  0x22   : > { %v799_v30 = vsel %vm741_vm0, %v4169_v28, 4286644096  ;;  %v4172_v32 = vld [vmem:[%s4424_s13 + $0xd0] sm:$0xff]   ;;  %v759_v33 = vsel %vm741_vm0, %v4170_v29, 4286644096  ;;  %v4173_v36 = vld [vmem:[%s4424_s13 + $0x98] sm:$0xff]  }
  0x23   : > { %v949_v34 = vsel %vm741_vm0, %v4171_v31, 4286644096  ;;  %v874_v35 = vsel %vm741_vm0, %v4172_v32, 4286644096  ;;  %v4174_v37 = vld [vmem:[%s4424_s13 + $0x180] sm:$0xff]   ;;  %v4175_v40 = vld [vmem:[%s4424_s13 + $0x188] sm:$0xff]  }
  0x24   : > { %791 = vmax.xlane.bf16.xlu1 %v789_v6  ;;  %786 = vmax.xlane.bf16.xlu0 %v784_v7  ;;  %v839_v38 = vsel %vm741_vm0, %v4173_v36, 4286644096  ;;  %v984_v39 = vsel %vm741_vm0, %v4174_v37, 4286644096  ;;  %v4176_v41 = vld [vmem:[%s4424_s13 + $0x110] sm:$0xff]   ;;  %v4177_v44 = vld [vmem:[%s4424_s13 + $0x20] sm:$0xff]   ;;  %v1130_v6 = vlaneseq }
  0x25   : > { %v989_v42 = vsel %vm741_vm0, %v4175_v40, 4286644096  ;;  %v914_v43 = vsel %vm741_vm0, %v4176_v41, 4286644096  ;;  %v4178_v45 = vld [vmem:[%s4424_s13 + $0x1c0] sm:$0xff]   ;;  %v4179_v48 = vld [vmem:[%s4424_s13 + $0xd8] sm:$0xff]  }
  0x26   : > { %v764_v46 = vsel %vm741_vm0, %v4177_v44, 4286644096  ;;  %v1024_v47 = vsel %vm741_vm0, %v4178_v45, 4286644096  ;;  %v4180_v49 = vld [vmem:[%s4424_s13 + $0x60] sm:$0xff]   ;;  %v4181_v52 = vld [vmem:[%s4424_s13 + $0x1c8] sm:$0xff]  }
  0x27   : > { %v879_v50 = vsel %vm741_vm0, %v4179_v48, 4286644096  ;;  %v804_v51 = vsel %vm741_vm0, %v4180_v49, 4286644096  ;;  %v4182_v53 = vld [vmem:[%s4424_s13 + $0x150] sm:$0xff]   ;;  %v4183_v56 = vld [vmem:[%s4424_s13 + $0x118] sm:$0xff]  }
  0x28   : > { %v1029_v54 = vsel %vm741_vm0, %v4181_v52, 4286644096  ;;  %v954_v55 = vsel %vm741_vm0, %v4182_v53, 4286644096  ;;  %v4184_v57 = vld [vmem:[%s4424_s13 + $0xa0] sm:$0xff]   ;;  %v4185_v60 = vld [vmem:[%s4424_s13 + $0x28] sm:$0xff]  }
  0x29   : > { %v919_v58 = vsel %vm741_vm0, %v4183_v56, 4286644096  ;;  %v844_v59 = vsel %vm741_vm0, %v4184_v57, 4286644096  ;;  %v4186_v61 = vld [vmem:[%s4424_s13 + $0x190] sm:$0xff]   ;;  %v4187_v0 = vld [vmem:[%s4424_s13 + $0xe0] sm:$0xff]  }
  0x2a   : > { %v769_v62 = vsel %vm741_vm0, %v4185_v60, 4286644096  ;;  %v994_v63 = vsel %vm741_vm0, %v4186_v61, 4286644096  ;;  %v4188_v1 = vld [vmem:[%s4424_s13 + $0x68] sm:$0xff]   ;;  %v4189_v4 = vld [vmem:[%s4424_s13 + $0x1d0] sm:$0xff]  }
  0x2b   : > { %v884_v2 = vsel %vm741_vm0, %v4187_v0, 4286644096  ;;  %v809_v3 = vsel %vm741_vm0, %v4188_v1, 4286644096  ;;  %v4190_v5 = vld [vmem:[%s4424_s13 + $0x158] sm:$0xff]   ;;  %v4498_v13 = vand.u32 127, %v1130_v6 }
  0x2c   : > { %831 = vmax.xlane.bf16.xlu1 %v829_v10  ;;  %826 = vmax.xlane.bf16.xlu0 %v824_v11  ;;  %v1034_v7 = vsel %vm741_vm0, %v4189_v4, 4286644096  ;;  %v959_v8 = vsel %vm741_vm0, %v4190_v5, 4286644096  ;;  %v4331_v9 = vmov 839922192  }
  0x2d   : > { %v1128_v10 = vunpack.c.l.s4 %v4331_v9  ;;  %v4332_v11 = vmov 1985246804   ;;  %v4502_v17 = vshrl.u32 %v1130_v6, 7  ;;  %v2171_v20 = vadd.s32 4294967272, %v4498_v13  ;;  %v4196_v4 = vld [vmem:[%s4424_s13 + $0x70] sm:$0xff]  }
  0x2e   : > { %v1135_v12 = vunpack.c.l.s4 %v4332_v11 }
  0x2f   : > { %v1129_v16 = vunpack.c.0.s8 %v1128_v10  ;;  %v4524_v29 = vsub.s32 %v2171_v20, %v4502_v17 }
  0x31   : > { %v4511_v25 = vsub.s32 %v1129_v16, %v4502_v17 }
  0x34   : > { %756 = vmax.xlane.bf16.xlu1 %v754_v14  ;;  %866 = vmax.xlane.bf16.xlu0 %v864_v15  ;;  %v4191_v14 = vld [vmem:[%s4424_s13 + $0x120] sm:$0xff]   ;;  %v4192_v15 = vld [vmem:[%s4424_s13 + $0xa8] sm:$0xff]  }
  0x35   : > { %v924_v21 = vsel %vm741_vm0, %v4191_v14, 4286644096  ;;  %v849_v24 = vsel %vm741_vm0, %v4192_v15, 4286644096 }
  0x3c   : > { %871 = vmax.xlane.bf16.xlu1 %v869_v18  ;;  %796 = vmax.xlane.bf16.xlu0 %v794_v19  ;;  %v1136_v18 = vunpack.c.0.s8 %v1135_v12  ;;  %v2164_v19 = vadd.s32 4294967280, %v4498_v13 }
  0x3e   : > { %v4521_v28 = vsub.s32 %v2164_v19, %v4502_v17  ;;  %v4197_v19 = vld [vmem:[%s4424_s13 + $0x1d8] sm:$0xff]  }
  0x44   : > { %836 = vmax.xlane.bf16.xlu1 %v834_v22  ;;  %906 = vmax.xlane.bf16.xlu0 %v904_v23  ;;  %v2157_v22 = vadd.s32 4294967288, %v4498_v13  ;;  %v4193_v23 = vld [vmem:[%s4424_s13 + $0x30] sm:$0xff]  }
  0x45   : > { %v774_v32 = vsel %vm741_vm0, %v4193_v23, 4286644096  ;;  %v814_v23 = vsel %vm741_vm0, %v4196_v4, 4286644096 }
  0x4c   : > { %946 = vmax.xlane.bf16.xlu1 %v944_v26  ;;  %911 = vmax.xlane.bf16.xlu0 %v909_v27  ;;  %v4514_v26 = vsub.s32 %v1136_v18, %v4502_v17  ;;  %v4518_v27 = vsub.s32 %v4498_v13, %v4502_v17 }
  0x54   : > { %801 = vmax.xlane.bf16.xlu1 %v799_v30  ;;  %761 = vmax.xlane.bf16.xlu0 %v759_v33  ;;  %v4527_v30 = vsub.s32 %v2157_v22, %v4502_v17 }
  0x5c   : > { %951 = vmax.xlane.bf16.xlu1 %v949_v34  ;;  %876 = vmax.xlane.bf16.xlu0 %v874_v35 }
  0x64   : > { %841 = vmax.xlane.bf16.xlu1 %v839_v38  ;;  %986 = vmax.xlane.bf16.xlu0 %v984_v39  ;;  %v4194_v38 = vld [vmem:[%s4424_s13 + $0x198] sm:$0xff]  }
  0x65   : > { %v999_v53 = vsel %vm741_vm0, %v4194_v38, 4286644096  ;;  %v1039_v38 = vsel %vm741_vm0, %v4197_v19, 4286644096 }
  0x6c   : > { %991 = vmax.xlane.bf16.xlu1 %v989_v42  ;;  %916 = vmax.xlane.bf16.xlu0 %v914_v43 }
  0x74   : > { %766 = vmax.xlane.bf16.xlu1 %v764_v46  ;;  %1026 = vmax.xlane.bf16.xlu0 %v1024_v47 }
  0x7c   : > { %881 = vmax.xlane.bf16.xlu1 %v879_v50  ;;  %806 = vmax.xlane.bf16.xlu0 %v804_v51  ;;  %v4195_v51 = vld [vmem:[%s4424_s13 + $0xe8] sm:$0xff]  }
  0x84   : > { %1031 = vmax.xlane.bf16.xlu1 %v1029_v54  ;;  %956 = vmax.xlane.bf16.xlu0 %v954_v55 }
  0x8c   : > { %921 = vmax.xlane.bf16.xlu1 %v919_v58  ;;  %846 = vmax.xlane.bf16.xlu0 %v844_v59 }
  0x94   : > { %771 = vmax.xlane.bf16.xlu1 %v769_v62  ;;  %996 = vmax.xlane.bf16.xlu0 %v994_v63  ;;  %v889_v62 = vsel %vm741_vm0, %v4195_v51, 4286644096 }
  0x9c   : > { %886 = vmax.xlane.bf16.xlu1 %v884_v2  ;;  %811 = vmax.xlane.bf16.xlu0 %v809_v3 }
  0xa4   : > { %1036 = vmax.xlane.bf16.xlu1 %v1034_v7  ;;  %961 = vmax.xlane.bf16.xlu0 %v959_v8 }
  0xac   : > { %926 = vmax.xlane.bf16.xlu1 %v924_v21  ;;  %851 = vmax.xlane.bf16.xlu0 %v849_v24 }
  0xad   : > { %v752_v31 = vpop.xlane.xlu1 %751  ;;  %v747_v33 = vpop.xlane.xlu0 %746 }
  0xae   : > { %v1147_v34 = vrot.slane %v752_v31, %v4511_v25  ;;  %v1154_v35 = vrot.slane %v752_v31, %v4514_v26  ;;  %v2857_v36 = vunpack.c.l.b16 %v752_v31  ;;  %v2858_v37 = vunpack.c.h.b16 %v752_v31 }
  0xaf   : > { %v1133_v39 = vrot.slane %v747_v33, %v4511_v25  ;;  %v1140_v40 = vrot.slane %v747_v33, %v4514_v26  ;;  %v2855_v41 = vunpack.c.l.b16 %v747_v33  ;;  %v2856_v42 = vunpack.c.h.b16 %v747_v33 }
  0xb0   : > { %v2025_v43 = vunpack.c.l.b16 %v1147_v34  ;;  %v2026_v44 = vunpack.c.l.b16 %v1154_v35  ;;  %v2995_v45 = vrot.slane %v2857_v36, %v4521_v28  ;;  %v3000_v46 = vrot.slane %v2858_v37, %v4524_v29 }
  0xb1   : > { %v2023_v47 = vunpack.c.l.b16 %v1133_v39  ;;  %v2024_v48 = vunpack.c.l.b16 %v1140_v40  ;;  %v2986_v49 = vrot.slane %v2855_v41, %v4518_v27  ;;  %v2990_v50 = vrot.slane %v2856_v42, %v4527_v30 }
  0xb2   : > { %v2168_v52 = vrot.slane %v2025_v43, %v4521_v28  ;;  %v2175_v57 = vrot.slane %v2026_v44, %v4524_v29  ;;  %v2178_v34 = vadd.s32 4294967264, %v4498_v13  ;;  %v2185_v39 = vadd.s32 4294967256, %v4498_v13 }
  0xb3   : > { %v2156_v54 = vrot.slane %v2023_v47, %v4518_v27  ;;  %v2161_v55 = vrot.slane %v2024_v48, %v4527_v30  ;;  %v2991_v56 = vsel %vm2162_vm1, %v2990_v50, %v2986_v49 }
  0xb4   : > { %v2996_v58 = vsel %vm2169_vm2, %v2995_v45, %v2991_v56  ;;  %776 = vmax.xlane.bf16.xlu1 %v774_v32  ;;  %1001 = vmax.xlane.bf16.xlu0 %v999_v53  ;;  %v4198_v45 = vld [vmem:[%s4424_s13 + $0x160] sm:$0xff]  }
  0xb5   : > { %v2163_v59 = vsel %vm2162_vm1, %v2161_v55, %v2156_v54  ;;  %v4549_v60 = vsel %vm2176_vm3, %v3000_v46, %v2996_v58  ;;  %v792_v61 = vpop.xlane.xlu1 %791  ;;  %v787_v0 = vpop.xlane.xlu0 %786  ;;  %v4199_v58 = vld [vmem:[%s4424_s13 + $0x128] sm:$0xff]  }
  0xb6   : > { %v2170_v63 = vsel %vm2169_vm2, %v2168_v52, %v2163_v59  ;;  %v1259_v1 = vrot.slane %v792_v61, %v4511_v25  ;;  %v1266_v2 = vrot.slane %v792_v61, %v4514_v26  ;;  %v2873_v3 = vunpack.c.l.b16 %v792_v61  ;;  %v4200_v59 = vld [vmem:[%s4424_s13 + $0xb0] sm:$0xff]  }
  0xb7   : > { %v4557_v5 = vsel %vm2176_vm3, %v2175_v57, %v2170_v63  ;;  %v1245_v6 = vrot.slane %v787_v0, %v4511_v25  ;;  %v1252_v7 = vrot.slane %v787_v0, %v4514_v26  ;;  %v2871_v8 = vunpack.c.l.b16 %v787_v0 }
  0xb8   : > { %v2872_v9 = vunpack.c.h.b16 %v787_v0  ;;  %v2041_v10 = vunpack.c.l.b16 %v1259_v1  ;;  %v2042_v11 = vunpack.c.l.b16 %v1266_v2  ;;  %v2874_v12 = vunpack.c.h.b16 %v792_v61 }
  0xb9   : > { %v2039_v14 = vunpack.c.l.b16 %v1245_v6  ;;  %v2040_v15 = vunpack.c.l.b16 %v1252_v7  ;;  %v3065_v16 = vrot.slane %v2871_v8, %v4518_v27  ;;  %v3074_v18 = vrot.slane %v2873_v3, %v4521_v28 }
  0xba   : > { %v3069_v20 = vrot.slane %v2872_v9, %v4527_v30  ;;  %v2274_v21 = vrot.slane %v2041_v10, %v4521_v28  ;;  %v3079_v22 = vrot.slane %v2874_v12, %v4524_v29  ;;  %v2279_v32 = vrot.slane %v2042_v11, %v4524_v29 }
  0xbb   : > { %v2265_v24 = vrot.slane %v2039_v14, %v4518_v27  ;;  %v2269_v31 = vrot.slane %v2040_v15, %v4527_v30  ;;  %v964_v0 = vsel %vm741_vm0, %v4198_v45, 4286644096  ;;  %v4602_v7 = vsub.s32 %v2178_v34, %v4502_v17 }
  0xbc   : > { %v3070_v33 = vsel %vm2162_vm1, %v3069_v20, %v3065_v16  ;;  %891 = vmax.xlane.bf16.xlu1 %v889_v62  ;;  %816 = vmax.xlane.bf16.xlu0 %v814_v23  ;;  %v4605_v8 = vsub.s32 %v2185_v39, %v4502_v17  ;;  %v929_v12 = vsel %vm741_vm0, %v4199_v58, 4286644096  ;;  %v854_v14 = vsel %vm741_vm0, %v4200_v59, 4286644096  ;;  %v4201_v39 = vld [vmem:[%s4424_s13 + $0x38] sm:$0xff]  }
  0xbd   : > { %v2270_v35 = vsel %vm2162_vm1, %v2269_v31, %v2265_v24  ;;  %v3075_v36 = vsel %vm2169_vm2, %v3074_v18, %v3070_v33  ;;  %v832_v37 = vpop.xlane.xlu1 %831  ;;  %v827_v42 = vpop.xlane.xlu0 %826 }
  0xbe   : > { %v2275_v40 = vsel %vm2169_vm2, %v2274_v21, %v2270_v35  ;;  %v4579_v41 = vsel %vm2176_vm3, %v3079_v22, %v3075_v36  ;;  %v1371_v43 = vrot.slane %v832_v37, %v4511_v25  ;;  %v1378_v44 = vrot.slane %v832_v37, %v4514_v26 }
  0xbf   : > { %v4585_v46 = vsel %vm2176_vm3, %v2279_v32, %v2275_v40  ;;  %v1357_v47 = vrot.slane %v827_v42, %v4511_v25  ;;  %v1364_v48 = vrot.slane %v827_v42, %v4514_v26  ;;  %v2887_v49 = vunpack.c.l.b16 %v827_v42  ;;  %v4202_v40 = vld [vmem:[%s4424_s13 + $0x1a0] sm:$0xff]  }
  0xc0   : > { %v2888_v50 = vunpack.c.h.b16 %v827_v42  ;;  %v2057_v51 = vunpack.c.l.b16 %v1371_v43  ;;  %v2058_v52 = vunpack.c.l.b16 %v1378_v44  ;;  %v2889_v53 = vunpack.c.l.b16 %v832_v37 }
  0xc1   : > { %v2055_v54 = vunpack.c.l.b16 %v1357_v47  ;;  %v2056_v55 = vunpack.c.l.b16 %v1364_v48  ;;  %v3144_v56 = vrot.slane %v2887_v49, %v4518_v27  ;;  %v2890_v57 = vunpack.c.h.b16 %v832_v37 }
  0xc2   : > { %v3148_v61 = vrot.slane %v2888_v50, %v4527_v30  ;;  %v2353_v62 = vrot.slane %v2057_v51, %v4521_v28  ;;  %v3153_v63 = vrot.slane %v2889_v53, %v4521_v28  ;;  %v2358_v3 = vrot.slane %v2058_v52, %v4524_v29 }
  0xc3   : > { %v2344_v1 = vrot.slane %v2055_v54, %v4518_v27  ;;  %v2348_v2 = vrot.slane %v2056_v55, %v4527_v30  ;;  %v3158_v4 = vrot.slane %v2890_v57, %v4524_v29  ;;  %v779_v55 = vsel %vm741_vm0, %v4201_v39, 4286644096 }
  0xc4   : > { %v3149_v6 = vsel %vm2162_vm1, %v3148_v61, %v3144_v56  ;;  %1041 = vmax.xlane.bf16.xlu1 %v1039_v38  ;;  %966 = vmax.xlane.bf16.xlu0 %v964_v0  ;;  %v1004_v56 = vsel %vm741_vm0, %v4202_v40, 4286644096 }
  0xc5   : > { %v2349_v9 = vsel %vm2162_vm1, %v2348_v2, %v2344_v1  ;;  %v3154_v10 = vsel %vm2169_vm2, %v3153_v63, %v3149_v6  ;;  %v757_v11 = vpop.xlane.xlu1 %756  ;;  %v867_v20 = vpop.xlane.xlu0 %866 }
  0xc6   : > { %v2354_v15 = vsel %vm2169_vm2, %v2353_v62, %v2349_v9  ;;  %v4613_v16 = vsel %vm2176_vm3, %v3158_v4, %v3154_v10  ;;  %v1161_v18 = vrot.slane %v757_v11, %v4511_v25  ;;  %v1168_v19 = vrot.slane %v757_v11, %v4514_v26 }
  0xc7   : > { %v4618_v21 = vsel %vm2176_vm3, %v2358_v3, %v2354_v15  ;;  %v2859_v22 = vunpack.c.l.b16 %v757_v11  ;;  %v2860_v23 = vunpack.c.h.b16 %v757_v11  ;;  %v1469_v24 = vrot.slane %v867_v20, %v4511_v25 }
  0xc8   : > { %v2027_v31 = vunpack.c.l.b16 %v1161_v18  ;;  %v2028_v32 = vunpack.c.l.b16 %v1168_v19  ;;  %v1476_v33 = vrot.slane %v867_v20, %v4514_v26  ;;  %v2903_v34 = vunpack.c.l.b16 %v867_v20 }
  0xc9   : > { %v3005_v35 = vrot.slane %v2859_v22, %v4602_v7  ;;  %v3010_v36 = vrot.slane %v2860_v23, %v4605_v8  ;;  %v2071_v37 = vunpack.c.l.b16 %v1469_v24  ;;  %v2904_v38 = vunpack.c.h.b16 %v867_v20 }
  0xca   : > { %v2182_v42 = vrot.slane %v2027_v31, %v4602_v7  ;;  %v2189_v43 = vrot.slane %v2028_v32, %v4605_v8  ;;  %v2072_v44 = vunpack.c.l.b16 %v1476_v33  ;;  %v3223_v45 = vrot.slane %v2903_v34, %v4518_v27  ;;  %v4203_v31 = vld [vmem:[%s4424_s13 + $0xf0] sm:$0xff]   ;;  %v4204_v34 = vld [vmem:[%s4424_s13 + $0x78] sm:$0xff]  }
  0xcb   : > { %v3006_v47 = vsel %vm2183_vm4, %v3005_v35, %v4549_v60  ;;  %v2423_v48 = vrot.slane %v2071_v37, %v4518_v27  ;;  %v3227_v49 = vrot.slane %v2904_v38, %v4527_v30 }
  0xcc   : > { %v2184_v50 = vsel %vm2183_vm4, %v2182_v42, %v4557_v5  ;;  %v4636_v51 = vsel %vm2190_vm5, %v3010_v36, %v3006_v47  ;;  %v2427_v52 = vrot.slane %v2072_v44, %v4527_v30  ;;  %931 = vmax.xlane.bf16.xlu1 %v929_v12  ;;  %856 = vmax.xlane.bf16.xlu0 %v854_v14 }
  0xcd   : > { %v4640_v53 = vsel %vm2190_vm5, %v2189_v43, %v2184_v50  ;;  %v3228_v54 = vsel %vm2162_vm1, %v3227_v49, %v3223_v45  ;;  %v872_v60 = vpop.xlane.xlu1 %871  ;;  %v797_v61 = vpop.xlane.xlu0 %796  ;;  %v819_v50 = vsel %vm741_vm0, %v4204_v34, 4286644096 }
  0xce   : > { %v2428_v57 = vsel %vm2162_vm1, %v2427_v52, %v2423_v48  ;;  %v1483_v5 = vrot.slane %v872_v60, %v4511_v25  ;;  %v1490_v58 = vrot.slane %v872_v60, %v4514_v26  ;;  %v2905_v59 = vunpack.c.l.b16 %v872_v60  ;;  %v4205_v52 = vld [vmem:[%s4424_s13 + $0x1e0] sm:$0xff]  }
  0xcf   : > { %v2906_v62 = vunpack.c.h.b16 %v872_v60  ;;  %v1273_v63 = vrot.slane %v797_v61, %v4511_v25  ;;  %v1280_v0 = vrot.slane %v797_v61, %v4514_v26  ;;  %v2875_v1 = vunpack.c.l.b16 %v797_v61 }
  0xd0   : > { %v2073_v2 = vunpack.c.l.b16 %v1483_v5  ;;  %v2074_v3 = vunpack.c.l.b16 %v1490_v58  ;;  %v3232_v4 = vrot.slane %v2905_v59, %v4521_v28  ;;  %v2876_v6 = vunpack.c.h.b16 %v797_v61 }
  0xd1   : > { %v3237_v9 = vrot.slane %v2906_v62, %v4524_v29  ;;  %v2043_v10 = vunpack.c.l.b16 %v1273_v63  ;;  %v2044_v11 = vunpack.c.l.b16 %v1280_v0  ;;  %v3084_v12 = vrot.slane %v2875_v1, %v4602_v7 }
  0xd2   : > { %v2432_v14 = vrot.slane %v2073_v2, %v4521_v28  ;;  %v2437_v15 = vrot.slane %v2074_v3, %v4524_v29  ;;  %v3233_v18 = vsel %vm2169_vm2, %v3232_v4, %v3228_v54  ;;  %v3089_v19 = vrot.slane %v2876_v6, %v4605_v8  ;;  %v4206_v54 = vld [vmem:[%s4424_s13 + $0x168] sm:$0xff]  }
  0xd3   : > { %v4658_v20 = vsel %vm2176_vm3, %v3237_v9, %v3233_v18  ;;  %v2284_v22 = vrot.slane %v2043_v10, %v4602_v7  ;;  %v2289_v23 = vrot.slane %v2044_v11, %v4605_v8  ;;  %v3085_v24 = vsel %vm2183_vm4, %v3084_v12, %v4579_v41 }
  0xd4   : > { %v2433_v32 = vsel %vm2169_vm2, %v2432_v14, %v2428_v57  ;;  %v4667_v33 = vsel %vm2190_vm5, %v3089_v19, %v3085_v24  ;;  %781 = vmax.xlane.bf16.xlu1 %v779_v55  ;;  %1006 = vmax.xlane.bf16.xlu0 %v1004_v56  ;;  %v1044_v0 = vsel %vm741_vm0, %v4205_v52, 4286644096  ;;  %v969_v1 = vsel %vm741_vm0, %v4206_v54, 4286644096 }
  0xd5   : > { %v4671_v35 = vsel %vm2176_vm3, %v2437_v15, %v2433_v32  ;;  %v2285_v36 = vsel %vm2183_vm4, %v2284_v22, %v4585_v46  ;;  %v837_v37 = vpop.xlane.xlu1 %836  ;;  %v907_v42 = vpop.xlane.xlu0 %906  ;;  %v894_v46 = vsel %vm741_vm0, %v4203_v31, 4286644096  ;;  %v2192_v2 = vadd.s32 4294967248, %v4498_v13 }
  0xd6   : > { %v4676_v41 = vsel %vm2190_vm5, %v2289_v23, %v2285_v36  ;;  %v1385_v38 = vrot.slane %v837_v37, %v4511_v25  ;;  %v1392_v39 = vrot.slane %v837_v37, %v4514_v26  ;;  %v2891_v40 = vunpack.c.l.b16 %v837_v37  ;;  %v4207_v23 = vld [vmem:[%s4424_s13 + $0x130] sm:$0xff]   ;;  %v4208_v36 = vld [vmem:[%s4424_s13 + $0xb8] sm:$0xff]  }
  0xd7   : > { %v2892_v43 = vunpack.c.h.b16 %v837_v37  ;;  %v1581_v44 = vrot.slane %v907_v42, %v4511_v25  ;;  %v1588_v45 = vrot.slane %v907_v42, %v4514_v26  ;;  %v2919_v56 = vunpack.c.l.b16 %v907_v42 }
  0xd8   : > { %v2059_v47 = vunpack.c.l.b16 %v1385_v38  ;;  %v2060_v48 = vunpack.c.l.b16 %v1392_v39  ;;  %v3163_v49 = vrot.slane %v2891_v40, %v4602_v7  ;;  %v2920_v57 = vunpack.c.h.b16 %v907_v42 }
  0xd9   : > { %v3168_v60 = vrot.slane %v2892_v43, %v4605_v8  ;;  %v2087_v55 = vunpack.c.l.b16 %v1581_v44  ;;  %v2088_v61 = vunpack.c.l.b16 %v1588_v45  ;;  %v2199_v9 = vadd.s32 4294967240, %v4498_v13 }
  0xda   : > { %v2363_v5 = vrot.slane %v2059_v47, %v4602_v7  ;;  %v2368_v58 = vrot.slane %v2060_v48, %v4605_v8  ;;  %v3164_v59 = vsel %vm2183_vm4, %v3163_v49, %v4613_v16  ;;  %v3302_v16 = vrot.slane %v2919_v56, %v4518_v27 }
  0xdb   : > { %v4693_v62 = vsel %vm2190_vm5, %v3168_v60, %v3164_v59  ;;  %v3306_v4 = vrot.slane %v2920_v57, %v4527_v30  ;;  %v2506_v10 = vrot.slane %v2088_v61, %v4527_v30  ;;  %v4718_v43 = vsub.s32 %v2192_v2, %v4502_v17 }
  0xdc   : > { %v2364_v63 = vsel %vm2183_vm4, %v2363_v5, %v4618_v21  ;;  %896 = vmax.xlane.bf16.xlu1 %v894_v46  ;;  %821 = vmax.xlane.bf16.xlu0 %v819_v50  ;;  %v2502_v21 = vrot.slane %v2087_v55, %v4518_v27  ;;  %v4721_v44 = vsub.s32 %v2199_v9, %v4502_v17  ;;  %v934_v48 = vsel %vm741_vm0, %v4207_v23, 4286644096 }
  0xdd   : > { %v4701_v3 = vsel %vm2190_vm5, %v2368_v58, %v2364_v63  ;;  %v947_v6 = vpop.xlane.xlu1 %946  ;;  %v912_v11 = vpop.xlane.xlu0 %911  ;;  %v3307_v42 = vsel %vm2162_vm1, %v3306_v4, %v3302_v16  ;;  %v859_v54 = vsel %vm741_vm0, %v4208_v36, 4286644096 }
  0xde   : > { %v1693_v12 = vrot.slane %v947_v6, %v4511_v25  ;;  %v1700_v14 = vrot.slane %v947_v6, %v4514_v26  ;;  %v1595_v15 = vrot.slane %v912_v11, %v4511_v25  ;;  %v1602_v18 = vrot.slane %v912_v11, %v4514_v26 }
  0xdf   : > { %v2921_v19 = vunpack.c.l.b16 %v912_v11  ;;  %v2922_v22 = vunpack.c.h.b16 %v912_v11  ;;  %v2935_v32 = vunpack.c.l.b16 %v947_v6  ;;  %v2936_v34 = vunpack.c.h.b16 %v947_v6  ;;  %v4209_v11 = vld [vmem:[%s4424_s13 + $0xf8] sm:$0xff]  }
  0xe0   : > { %v2103_v24 = vunpack.c.l.b16 %v1693_v12  ;;  %v2104_v31 = vunpack.c.l.b16 %v1700_v14  ;;  %v2089_v37 = vunpack.c.l.b16 %v1595_v15  ;;  %v2090_v38 = vunpack.c.l.b16 %v1602_v18  ;;  %v4210_v12 = vld [vmem:[%s4424_s13 + $0x1a8] sm:$0xff]  }
  0xe1   : > { %v3311_v39 = vrot.slane %v2921_v19, %v4521_v28  ;;  %v3316_v40 = vrot.slane %v2922_v22, %v4524_v29  ;;  %v2507_v49 = vsel %vm2162_vm1, %v2506_v10, %v2502_v21  ;;  %v3381_v52 = vrot.slane %v2935_v32, %v4518_v27 }
  0xe2   : > { %v2511_v45 = vrot.slane %v2089_v37, %v4521_v28  ;;  %v2516_v46 = vrot.slane %v2090_v38, %v4524_v29  ;;  %v2581_v55 = vrot.slane %v2103_v24, %v4518_v27  ;;  %v2585_v56 = vrot.slane %v2104_v31, %v4527_v30 }
  0xe3   : > { %v3312_v47 = vsel %vm2169_vm2, %v3311_v39, %v3307_v42  ;;  %v3385_v57 = vrot.slane %v2936_v34, %v4527_v30 }
  0xe4   : > { %v4729_v50 = vsel %vm2176_vm3, %v3316_v40, %v3312_v47  ;;  %1046 = vmax.xlane.bf16.xlu1 %v1044_v0  ;;  %v2512_v60 = vsel %vm2169_vm2, %v2511_v45, %v2507_v49  ;;  %971 = vmax.xlane.bf16.xlu0 %v969_v1  ;;  %v1009_v40 = vsel %vm741_vm0, %v4210_v12, 4286644096  ;;  %v2586_v42 = vsel %vm2162_vm1, %v2585_v56, %v2581_v55 }
  0xe5   : > { %v802_v5 = vpop.xlane.xlu1 %801  ;;  %v4738_v58 = vsel %vm2176_vm3, %v2516_v46, %v2512_v60  ;;  %v762_v0 = vpop.xlane.xlu0 %761  ;;  %v3386_v45 = vsel %vm2162_vm1, %v3385_v57, %v3381_v52 }
  0xe6   : > { %v1287_v59 = vrot.slane %v802_v5, %v4511_v25  ;;  %v1294_v61 = vrot.slane %v802_v5, %v4514_v26  ;;  %v2877_v63 = vunpack.c.l.b16 %v802_v5  ;;  %v2878_v2 = vunpack.c.h.b16 %v802_v5 }
  0xe7   : > { %v1175_v16 = vrot.slane %v762_v0, %v4511_v25  ;;  %v1182_v4 = vrot.slane %v762_v0, %v4514_v26  ;;  %v2861_v6 = vunpack.c.l.b16 %v762_v0  ;;  %v2862_v10 = vunpack.c.h.b16 %v762_v0 }
  0xe8   : > { %v2045_v9 = vunpack.c.l.b16 %v1287_v59  ;;  %v2046_v21 = vunpack.c.l.b16 %v1294_v61  ;;  %v3094_v1 = vrot.slane %v2877_v63, %v4718_v43  ;;  %v3099_v14 = vrot.slane %v2878_v2, %v4721_v44 }
  0xe9   : > { %v2029_v15 = vunpack.c.l.b16 %v1175_v16  ;;  %v2030_v18 = vunpack.c.l.b16 %v1182_v4  ;;  %v3015_v19 = vrot.slane %v2861_v6, %v4718_v43  ;;  %v3020_v31 = vrot.slane %v2862_v10, %v4721_v44  ;;  %v4211_v4 = vld [vmem:[%s4424_s13 + $0x1e8] sm:$0xff]   ;;  %v4212_v6 = vld [vmem:[%s4424_s13 + $0x170] sm:$0xff]  }
  0xea   : > { %v2294_v22 = vrot.slane %v2045_v9, %v4718_v43  ;;  %v2299_v23 = vrot.slane %v2046_v21, %v4721_v44  ;;  %v3095_v24 = vsel %vm2197_vm6, %v3094_v1, %v4667_v33  ;;  %v899_v33 = vsel %vm741_vm0, %v4209_v11, 4286644096 }
  0xeb   : > { %v4755_v32 = vsel %vm2204_vm7, %v3099_v14, %v3095_v24  ;;  %v2196_v34 = vrot.slane %v2029_v15, %v4718_v43  ;;  %v2203_v36 = vrot.slane %v2030_v18, %v4721_v44  ;;  %v3016_v37 = vsel %vm2197_vm6, %v3015_v19, %v4636_v51 }
  0xec   : > { %v2295_v38 = vsel %vm2197_vm6, %v2294_v22, %v4676_v41  ;;  %v4764_v39 = vsel %vm2204_vm7, %v3020_v31, %v3016_v37  ;;  %936 = vmax.xlane.bf16.xlu1 %v934_v48  ;;  %861 = vmax.xlane.bf16.xlu0 %v859_v54  ;;  %v1049_v31 = vsel %vm741_vm0, %v4211_v4, 4286644096  ;;  %v2206_v4 = vadd.s32 4294967232, %v4498_v13 }
  0xed   : > { %v4771_v46 = vsel %vm2204_vm7, %v2299_v23, %v2295_v38  ;;  %v2198_v51 = vsel %vm2197_vm6, %v2196_v34, %v4640_v53  ;;  %v952_v41 = vpop.xlane.xlu1 %951  ;;  %v877_v55 = vpop.xlane.xlu0 %876 }
  0xee   : > { %v4776_v47 = vsel %vm2204_vm7, %v2203_v36, %v2198_v51  ;;  %v1707_v48 = vrot.slane %v952_v41, %v4511_v25  ;;  %v1714_v49 = vrot.slane %v952_v41, %v4514_v26  ;;  %v2937_v60 = vunpack.c.l.b16 %v952_v41  ;;  %v4213_v51 = vld [vmem:[%s4424_s13 + $0x1b0] sm:$0xff]  }
  0xef   : > { %v2938_v52 = vunpack.c.h.b16 %v952_v41  ;;  %v1497_v56 = vrot.slane %v877_v55, %v4511_v25  ;;  %v1504_v57 = vrot.slane %v877_v55, %v4514_v26  ;;  %v2907_v5 = vunpack.c.l.b16 %v877_v55 }
  0xf0   : > { %v2105_v53 = vunpack.c.l.b16 %v1707_v48  ;;  %v2106_v54 = vunpack.c.l.b16 %v1714_v49  ;;  %v3390_v59 = vrot.slane %v2937_v60, %v4521_v28  ;;  %v2908_v61 = vunpack.c.h.b16 %v877_v55  ;;  %v4214_v55 = vld [vmem:[%s4424_s13 + $0x138] sm:$0xff]  }
  0xf1   : > { %v3395_v63 = vrot.slane %v2938_v52, %v4524_v29  ;;  %v2075_v0 = vunpack.c.l.b16 %v1497_v56  ;;  %v2076_v2 = vunpack.c.l.b16 %v1504_v57  ;;  %v3242_v16 = vrot.slane %v2907_v5, %v4602_v7 }
  0xf2   : > { %v2590_v9 = vrot.slane %v2105_v53, %v4521_v28  ;;  %v2595_v21 = vrot.slane %v2106_v54, %v4524_v29  ;;  %v3391_v1 = vsel %vm2169_vm2, %v3390_v59, %v3386_v45  ;;  %v3247_v10 = vrot.slane %v2908_v61, %v4605_v8 }
  0xf3   : > { %v4792_v11 = vsel %vm2176_vm3, %v3395_v63, %v3391_v1  ;;  %v2442_v12 = vrot.slane %v2075_v0, %v4602_v7  ;;  %v2447_v14 = vrot.slane %v2076_v2, %v4605_v8  ;;  %v3243_v15 = vsel %vm2183_vm4, %v3242_v16, %v4658_v20 }
  0xf4   : > { %v2591_v18 = vsel %vm2169_vm2, %v2590_v9, %v2586_v42  ;;  %v4800_v19 = vsel %vm2190_vm5, %v3247_v10, %v3243_v15  ;;  %901 = vmax.xlane.bf16.xlu1 %v899_v33  ;;  %1011 = vmax.xlane.bf16.xlu0 %v1009_v40  ;;  %v974_v20 = vsel %vm741_vm0, %v4212_v6, 4286644096  ;;  %v1014_v0 = vsel %vm741_vm0, %v4213_v51, 4286644096 }
  0xf5   : > { %v4803_v22 = vsel %vm2176_vm3, %v2595_v21, %v2591_v18  ;;  %v2443_v23 = vsel %vm2183_vm4, %v2442_v12, %v4671_v35  ;;  %v842_v24 = vpop.xlane.xlu1 %841  ;;  %v987_v33 = vpop.xlane.xlu0 %986  ;;  %v939_v16 = vsel %vm741_vm0, %v4214_v55, 4286644096  ;;  %v2213_v6 = vadd.s32 4294967224, %v4498_v13 }
  0xf6   : > { %v4810_v34 = vsel %vm2190_vm5, %v2447_v14, %v2443_v23  ;;  %v1399_v36 = vrot.slane %v842_v24, %v4511_v25  ;;  %v1406_v37 = vrot.slane %v842_v24, %v4514_v26  ;;  %v2893_v38 = vunpack.c.l.b16 %v842_v24 }
  0xf7   : > { %v2894_v42 = vunpack.c.h.b16 %v842_v24  ;;  %v1805_v45 = vrot.slane %v987_v33, %v4511_v25  ;;  %v1812_v35 = vrot.slane %v987_v33, %v4514_v26  ;;  %v2951_v40 = vunpack.c.l.b16 %v987_v33 }
  0xf8   : > { %v2061_v41 = vunpack.c.l.b16 %v1399_v36  ;;  %v2062_v48 = vunpack.c.l.b16 %v1406_v37  ;;  %v3173_v49 = vrot.slane %v2893_v38, %v4718_v43  ;;  %v2952_v60 = vunpack.c.h.b16 %v987_v33 }
  0xf9   : > { %v3178_v52 = vrot.slane %v2894_v42, %v4721_v44  ;;  %v2119_v56 = vunpack.c.l.b16 %v1805_v45  ;;  %v2120_v57 = vunpack.c.l.b16 %v1812_v35  ;;  %v3460_v5 = vrot.slane %v2951_v40, %v4518_v27 }
  0xfa   : > { %v2373_v53 = vrot.slane %v2061_v41, %v4718_v43  ;;  %v2378_v54 = vrot.slane %v2062_v48, %v4721_v44  ;;  %v3174_v59 = vsel %vm2197_vm6, %v3173_v49, %v4693_v62  ;;  %v3464_v61 = vrot.slane %v2952_v60, %v4527_v30 }
  0xfb   : > { %v4827_v63 = vsel %vm2204_vm7, %v3178_v52, %v3174_v59  ;;  %v2660_v62 = vrot.slane %v2119_v56, %v4518_v27  ;;  %v2664_v21 = vrot.slane %v2120_v57, %v4527_v30 }
  0xfc   : > { %v2374_v2 = vsel %vm2197_vm6, %v2373_v53, %v4701_v3  ;;  %1051 = vmax.xlane.bf16.xlu1 %v1049_v31  ;;  %v3465_v1 = vsel %vm2162_vm1, %v3464_v61, %v3460_v5  ;;  %976 = vmax.xlane.bf16.xlu0 %v974_v20  ;;  %v4865_v53 = vsub.s32 %v2206_v4, %v4502_v17 }
  0xfd   : > { %v4836_v9 = vsel %vm2204_vm7, %v2378_v54, %v2374_v2  ;;  %v992_v10 = vpop.xlane.xlu1 %991  ;;  %v917_v18 = vpop.xlane.xlu0 %916  ;;  %v2665_v51 = vsel %vm2162_vm1, %v2664_v21, %v2660_v62  ;;  %v4873_v61 = vsub.s32 %v2213_v6, %v4502_v17  ;;  %v4215_v2 = vld [vmem:[%s4424_s13 + $0x1f0] sm:$0xff]  }
  0xfe   : > { %v1819_v3 = vrot.slane %v992_v10, %v4511_v25  ;;  %v1826_v12 = vrot.slane %v992_v10, %v4514_v26  ;;  %v2953_v14 = vunpack.c.l.b16 %v992_v10  ;;  %v2954_v15 = vunpack.c.h.b16 %v992_v10 }
  0xff   : > { %v1609_v23 = vrot.slane %v917_v18, %v4511_v25  ;;  %v1616_v24 = vrot.slane %v917_v18, %v4514_v26  ;;  %v2923_v31 = vunpack.c.l.b16 %v917_v18  ;;  %v2924_v36 = vunpack.c.h.b16 %v917_v18 }
 0x100   : > { %v2121_v37 = vunpack.c.l.b16 %v1819_v3  ;;  %v2122_v38 = vunpack.c.l.b16 %v1826_v12  ;;  %v3469_v33 = vrot.slane %v2953_v14, %v4521_v28  ;;  %v3474_v20 = vrot.slane %v2954_v15, %v4524_v29  ;;  %v4217_v14 = vld [vmem:[%s4424_s13 + $0x1f8] sm:$0xff]  }
 0x101   : > { %v2091_v42 = vunpack.c.l.b16 %v1609_v23  ;;  %v2092_v45 = vunpack.c.l.b16 %v1616_v24  ;;  %v3321_v35 = vrot.slane %v2923_v31, %v4602_v7  ;;  %v3326_v40 = vrot.slane %v2924_v36, %v4605_v8  ;;  %v4218_v15 = vld [vmem:[%s4424_s13 + $0x1b8] sm:$0xff]  }
 0x102   : > { %v2669_v41 = vrot.slane %v2121_v37, %v4521_v28  ;;  %v2674_v48 = vrot.slane %v2122_v38, %v4524_v29  ;;  %v3470_v49 = vsel %vm2169_vm2, %v3469_v33, %v3465_v1  ;;  %v4216_v1 = vld [vmem:[%s4424_s13 + $0x178] sm:$0xff]   ;;  %v1054_v12 = vsel %vm741_vm0, %v4215_v2, 4286644096  ;;  %s3955_s13 = sshll.u32 %s5625_s12, 2 }
 0x103   : > { %v4854_v60 = vsel %vm2176_vm3, %v3474_v20, %v3470_v49  ;;  %v2521_v55 = vrot.slane %v2091_v42, %v4602_v7  ;;  %v2526_v52 = vrot.slane %v2092_v45, %v4605_v8  ;;  %v3322_v56 = vsel %vm2183_vm4, %v3321_v35, %v4729_v50  ;;  %s266_s14 = scalar_lea.vmem [#allocation2], %s3955_s13 }
 0x104   : > { %v2670_v57 = vsel %vm2169_vm2, %v2669_v41, %v2665_v51  ;;  %v4862_v5 = vsel %vm2190_vm5, %v3326_v40, %v3322_v56  ;;  %1016 = vmax.xlane.bf16.xlu1 %v1014_v0  ;;  %941 = vmax.xlane.bf16.xlu0 %v939_v16  ;;  %v979_v36 = vsel %vm741_vm0, %v4216_v1, 4286644096  ;;  %v1059_v42 = vsel %vm741_vm0, %v4217_v14, 4286644096  ;;  %s3847_s10 = sshll.u32 %s266_s14, 4  ;;  %s3848_s10 = int_to_ptr.vmem [resolvable:$true] %s3847_s10 }
 0x105   : > { %v4868_v54 = vsel %vm2176_vm3, %v2674_v48, %v2670_v57  ;;  %v2522_v59 = vsel %vm2183_vm4, %v2521_v55, %v4738_v58  ;;  %v767_v50 = vpop.xlane.xlu1 %766  ;;  %v4891_v31 = vpop.xlane.xlu0 %1026  ;;  %v4333_v14 = vmov 0.0   ;;  %s4235_s15 = scalar_lea.vmem %s3848_s10, 64  ;;  %p4242_p0 = scmp.lt.s32.totalorder %s3848_s10, %s4240_s17 }
 0x106   : > { %v4877_v62 = vsel %vm2190_vm5, %v2526_v52, %v2522_v59  ;;  %v1189_v0 = vrot.slane %v767_v50, %v4511_v25  ;;  %v1196_v4 = vrot.slane %v767_v50, %v4514_v26  ;;  %v2863_v21 = vunpack.c.l.b16 %v767_v50  ;;  %4067 = vmatprep.subr.bf16.mxu0 %v4333_v14  ;;  %4087 = vmatprep.subr.bf16.mxu1 %v4333_v14  ;;  %p4236_p11 = scmp.ne.s32.totalorder %s3848_s10, %s4235_s15  ;;  %p4243_p1 = scmp.lt.s32.totalorder %s4241_s18, %s4235_s15 }
 0x107   : > { %v2864_v10 = vunpack.c.h.b16 %v767_v50  ;;  %4083 = vmatprep.mubr.msk.bf16.mxu0 %vm4334_vm11, %v4333_v14  ;;  %4103 = vmatprep.mubr.msk.bf16.mxu1 %vm4334_vm11, %v4333_v14 }
 0x108   : > { %v2031_v58 = vunpack.c.l.b16 %v1189_v0  ;;  %v2032_v16 = vunpack.c.l.b16 %v1196_v4  ;;  %v3025_v6 = vrot.slane %v2863_v21, %v4865_v53  ;;  %p4237_p12 = pnand %p4236_p11, %p4410_p5  ;;  %p4244_p2 = por %p4243_p1, %p4242_p0 }
 0x109   : > { %v3030_v3 = vrot.slane %v2864_v10, %v4873_v61 }
 0x10a   : > { %v2210_v18 = vrot.slane %v2031_v58, %v4865_v53  ;;  %v2217_v23 = vrot.slane %v2032_v16, %v4873_v61  ;;  %v3026_v24 = vsel %vm2211_vm8, %v3025_v6, %v4764_v39  ;;  %v1019_v39 = vsel %vm741_vm0, %v4218_v15, 4286644096  ;;  %v4219_v58 = vld [vmem:[%s5739_s1] sm:$0xff]   ;;  %p4238_p13 = pneg %p4237_p12 }
 0x10b   : > { %v4895_v37 = vsel %vm2218_vm9, %v3030_v3, %v3026_v24  ;;  %4068 = vmatpush3.bf16.msra.mxu0 %v4219_v58  ;;  %v4221_v24 = vld [vmem:[%s5739_s1 + $0x10] sm:$0xff]   ;;  %vm2260_vm0 = vcmask 1048512  }
 0x10c   : > { %v2212_v38 = vsel %vm2211_vm8, %v2210_v18, %v4776_v47  ;;  %1056 = vmax.xlane.bf16.xlu1 %v1054_v12  ;;  %981 = vmax.xlane.bf16.xlu0 %v979_v36  ;;  %v1924_v36 = vrot.slane %v4891_v31, %v4514_v26  ;;  %p4245_p3 = pnand %p4244_p2, %p4238_p13 }
 0x10d   : > { %v4900_v33 = vsel %vm2218_vm9, %v2217_v23, %v2212_v38  ;;  %v882_v20 = vpop.xlane.xlu1 %881  ;;  %v807_v41 = vpop.xlane.xlu0 %806  ;;  %4069 = vmatprep.subr.bf16.mxu0 %v4333_v14 }
 0x10e   : > { %v1511_v45 = vrot.slane %v882_v20, %v4511_v25  ;;  %v1518_v35 = vrot.slane %v882_v20, %v4514_v26  ;;  %v2909_v40 = vunpack.c.l.b16 %v882_v20  ;;  %v2910_v51 = vunpack.c.h.b16 %v882_v20 }
 0x10f   : > { %v1301_v48 = vrot.slane %v807_v41, %v4511_v25  ;;  %v1308_v47 = vrot.slane %v807_v41, %v4514_v26  ;;  %v2879_v49 = vunpack.c.l.b16 %v807_v41  ;;  %v2880_v55 = vunpack.c.h.b16 %v807_v41 }
 0x110   : > { %v2077_v52 = vunpack.c.l.b16 %v1511_v45  ;;  %v2078_v56 = vunpack.c.l.b16 %v1518_v35  ;;  %v3252_v57 = vrot.slane %v2909_v40, %v4718_v43  ;;  %v3257_v59 = vrot.slane %v2910_v51, %v4721_v44 }
 0x111   : > { %v2047_v50 = vunpack.c.l.b16 %v1301_v48  ;;  %v2048_v2 = vunpack.c.l.b16 %v1308_v47  ;;  %v3104_v0 = vrot.slane %v2879_v49, %v4865_v53  ;;  %v3109_v4 = vrot.slane %v2880_v55, %v4873_v61 }
 0x112   : > { %v2452_v21 = vrot.slane %v2077_v52, %v4718_v43  ;;  %v2457_v1 = vrot.slane %v2078_v56, %v4721_v44  ;;  %v3253_v10 = vsel %vm2197_vm6, %v3252_v57, %v4800_v19  ;;  %v2220_v20 = vadd.s32 4294967216, %v4498_v13  ;;  %v4223_v56 = vld [vmem:[%s5739_s1 + $0x20] sm:$0xff]  }
 0x113   : > { %v4920_v16 = vsel %vm2204_vm7, %v3257_v59, %v3253_v10  ;;  %v2304_v6 = vrot.slane %v2047_v50, %v4865_v53  ;;  %v2309_v3 = vrot.slane %v2048_v2, %v4873_v61  ;;  %v3105_v12 = vsel %vm2211_vm8, %v3104_v0, %v4755_v32 }
 0x114   : > { %v2453_v19 = vsel %vm2197_vm6, %v2452_v21, %v4810_v34  ;;  %v4930_v15 = vsel %vm2218_vm9, %v3109_v4, %v3105_v12  ;;  %1061 = vmax.xlane.bf16.xlu1 %v1059_v42  ;;  %1021 = vmax.xlane.bf16.xlu0 %v1019_v39  ;;  %v4220_v34 = vld [vmem:[%s5739_s1 + $0x8] sm:$0xff]   ;;  %v4222_v42 = vld [vmem:[%s5739_s1 + $0x18] sm:$0xff]   ;;  %v2227_v39 = vadd.s32 4294967208, %v4498_v13  ;;  %v2234_v40 = vadd.s32 4294967200, %v4498_v13 }
 0x115   : > { %v4933_v18 = vsel %vm2204_vm7, %v2457_v1, %v2453_v19  ;;  %v2305_v23 = vsel %vm2211_vm8, %v2304_v6, %v4771_v46  ;;  %4070 = vmatpush3.bf16.msra.mxu0 %v4220_v34  ;;  %v1917_v46 = vrot.slane %v4891_v31, %v4511_v25  ;;  %v1032_v38 = vpop.xlane.xlu1 %1031  ;;  %v957_v35 = vpop.xlane.xlu0 %956  ;;  %v2136_v41 = vunpack.c.l.b16 %v1924_v36  ;;  %v4224_v12 = vld [vmem:[%s5739_s1 + $0x28] sm:$0xff]  }
 0x116   : > { %v4939_v32 = vsel %vm2218_vm9, %v2309_v3, %v2305_v23  ;;  %4071 = vmatprep.subr.bf16.mxu0 %v4333_v14  ;;  %v1931_v45 = vrot.slane %v1032_v38, %v4511_v25  ;;  %v2967_v48 = vunpack.c.l.b16 %v4891_v31  ;;  %v2968_v47 = vunpack.c.h.b16 %v4891_v31 }
 0x117   : > { %v2135_v51 = vunpack.c.l.b16 %v1917_v46  ;;  %v1938_v49 = vrot.slane %v1032_v38, %v4514_v26  ;;  %v4966_v55 = vsub.s32 %v2220_v20, %v4502_v17  ;;  %v2241_v52 = vadd.s32 4294967192, %v4498_v13 }
 0x118   : > { %v2969_v57 = vunpack.c.l.b16 %v1032_v38  ;;  %v1721_v59 = vrot.slane %v957_v35, %v4511_v25  ;;  %v4974_v50 = vsub.s32 %v2227_v39, %v4502_v17  ;;  %v2248_v31 = vadd.s32 4294967184, %v4498_v13 }
 0x119   : > { %4072 = vmatpush3.bf16.msra.mxu0 %v4221_v24  ;;  %v2137_v2 = vunpack.c.l.b16 %v1931_v45  ;;  %v2939_v0 = vunpack.c.l.b16 %v957_v35  ;;  %v4978_v4 = vsub.s32 %v2234_v40, %v4502_v17  ;;  %v2255_v21 = vadd.s32 4294967176, %v4498_v13 }
 0x11a   : > { %4073 = vmatprep.subr.bf16.mxu0 %v4333_v14  ;;  %v2739_v1 = vrot.slane %v2135_v51, %v4518_v27  ;;  %v2743_v10 = vrot.slane %v2136_v41, %v4527_v30  ;;  %v3539_v58 = vrot.slane %v2967_v48, %v4518_v27  ;;  %v3543_v6 = vrot.slane %v2968_v47, %v4527_v30  ;;  %v4225_v47 = vld [vmem:[%s5739_s1 + $0x30] sm:$0xff]  }
 0x11b   : > { %v2138_v19 = vunpack.c.l.b16 %v1938_v49  ;;  %v2970_v23 = vunpack.c.h.b16 %v1032_v38  ;;  %v1728_v13 = vrot.slane %v957_v35, %v4514_v26  ;;  %v4995_v24 = vsub.s32 %v2241_v52, %v4502_v17 }
 0x11c   : > { %v3548_v27 = vrot.slane %v2969_v57, %v4521_v28  ;;  %v2107_v30 = vunpack.c.l.b16 %v1721_v59  ;;  %v2940_v46 = vunpack.c.h.b16 %v957_v35  ;;  %v4999_v36 = vsub.s32 %v2248_v31, %v4502_v17 }
 0x11d   : > { %4074 = vmatpush3.bf16.msra.mxu0 %v4222_v42  ;;  %v4985_v3 = vpop.xlane.xlu1 %921  ;;  %v4992_v34 = vpop.xlane.xlu0 %846  ;;  %v2748_v20 = vrot.slane %v2137_v2, %v4521_v28  ;;  %v3400_v42 = vrot.slane %v2939_v0, %v4602_v7  ;;  %v5006_v39 = vsub.s32 %v2255_v21, %v4502_v17  ;;  %v2744_v45 = vsel %vm2162_vm1, %v2743_v10, %v2739_v1 }
 0x11e   : > { %4075 = vmatprep.subr.bf16.mxu0 %v4333_v14  ;;  %v1623_v38 = vrot.slane %v4985_v3, %v4511_v25  ;;  %v3544_v40 = vsel %vm2162_vm1, %v3543_v6, %v3539_v58  ;;  %v1630_v35 = vrot.slane %v4985_v3, %v4514_v26  ;;  %v1413_v51 = vrot.slane %v4992_v34, %v4511_v25  ;;  %v4226_v58 = vld [vmem:[%s5739_s1 + $0x38] sm:$0xff]  }
 0x11f   : > { %v2753_v28 = vrot.slane %v2138_v19, %v4524_v29  ;;  %v3553_v41 = vrot.slane %v2970_v23, %v4524_v29  ;;  %v2108_v48 = vunpack.c.l.b16 %v1728_v13  ;;  %v2925_v17 = vunpack.c.l.b16 %v4985_v3 }
 0x120   : > { %v3549_v49 = vsel %vm2169_vm2, %v3548_v27, %v3544_v40  ;;  %v2600_v52 = vrot.slane %v2107_v30, %v4602_v7  ;;  %v1420_v57 = vrot.slane %v4992_v34, %v4514_v26  ;;  %v2749_v59 = vsel %vm2169_vm2, %v2748_v20, %v2744_v45 }
 0x121   : > { %4076 = vmatpush3.bf16.msra.mxu0 %v4223_v56  ;;  %v3405_v56 = vrot.slane %v2940_v46, %v4605_v8  ;;  %v3401_v29 = vsel %vm2183_vm4, %v3400_v42, %v4792_v11  ;;  %v2093_v31 = vunpack.c.l.b16 %v1623_v38  ;;  %v2895_v2 = vunpack.c.l.b16 %v4992_v34 }
 0x122   : > { %4077 = vmatprep.subr.bf16.mxu0 %v4333_v14  ;;  %v2094_v21 = vunpack.c.l.b16 %v1630_v35  ;;  %v2926_v1 = vunpack.c.h.b16 %v4985_v3  ;;  %v2063_v10 = vunpack.c.l.b16 %v1413_v51  ;;  %v5036_v6 = vsel %vm2176_vm3, %v3553_v41, %v3549_v49  ;;  %v4227_v35 = vld [vmem:[%s5741_s3] sm:$0xff]  }
 0x123   : > { %v2605_v11 = vrot.slane %v2108_v48, %v4605_v8  ;;  %v5043_v3 = vsel %vm2190_vm5, %v3405_v56, %v3401_v29  ;;  %v2064_v19 = vunpack.c.l.b16 %v1420_v57  ;;  %v2896_v23 = vunpack.c.h.b16 %v4992_v34  ;;  %4088 = vmatpush3.bf16.msra.mxu1 %v4227_v35  ;;  %v4228_v56 = vld [vmem:[%s5741_s3 + $0x8] sm:$0xff]  }
 0x124   : > { %v5048_v30 = vsel %vm2176_vm3, %v2753_v28, %v2749_v59  ;;  %v2531_v46 = vrot.slane %v2093_v31, %v4718_v43  ;;  %v3183_v20 = vrot.slane %v2895_v2, %v4865_v53  ;;  %v2601_v38 = vsel %vm2183_vm4, %v2600_v52, %v4803_v22  ;;  %4089 = vmatprep.subr.bf16.mxu1 %v4333_v14 }
 0x125   : > { %4078 = vmatpush3.bf16.msra.mxu0 %v4224_v12  ;;  %v772_v0 = vpop.xlane.xlu1 %771  ;;  %v3331_v12 = vrot.slane %v2925_v17, %v4718_v43  ;;  %v997_v27 = vpop.xlane.xlu0 %996  ;;  %v2536_v45 = vrot.slane %v2094_v21, %v4721_v44  ;;  %v3336_v34 = vrot.slane %v2926_v1, %v4721_v44  ;;  %v2383_v40 = vrot.slane %v2063_v10, %v4865_v53 }
 0x126   : > { %4079 = vmatprep.subr.bf16.mxu0 %v4333_v14  ;;  %v1203_v13 = vrot.slane %v772_v0, %v4511_v25  ;;  %v2865_v42 = vunpack.c.l.b16 %v772_v0  ;;  %v1210_v28 = vrot.slane %v772_v0, %v4514_v26  ;;  %v1833_v41 = vrot.slane %v997_v27, %v4511_v25 }
 0x127   : > { %v3332_v51 = vsel %vm2197_vm6, %v3331_v12, %v4862_v5  ;;  %v2955_v48 = vunpack.c.l.b16 %v997_v27  ;;  %v2388_v22 = vrot.slane %v2064_v19, %v4873_v61  ;;  %v3188_v17 = vrot.slane %v2896_v23, %v4873_v61  ;;  %4090 = vmatpush3.bf16.msra.mxu1 %v4228_v56 }
 0x128   : > { %v2866_v49 = vunpack.c.h.b16 %v772_v0  ;;  %v2532_v5 = vsel %vm2197_vm6, %v2531_v46, %v4877_v62  ;;  %v3184_v57 = vsel %vm2211_vm8, %v3183_v20, %v4827_v63  ;;  %v3035_v59 = vrot.slane %v2865_v42, %v4966_v55  ;;  %4091 = vmatprep.subr.bf16.mxu1 %v4333_v14 }
 0x129   : > { %4080 = vmatpush3.bf16.msra.mxu0 %v4225_v47  ;;  %v2033_v47 = vunpack.c.l.b16 %v1203_v13  ;;  %v1840_v29 = vrot.slane %v997_v27, %v4514_v26  ;;  %v5077_v31 = vsel %vm2190_vm5, %v2605_v11, %v2601_v38  ;;  %v5080_v2 = vsel %vm2204_vm7, %v3336_v34, %v3332_v51 }
 0x12a   : > { %4081 = vmatprep.subr.bf16.mxu0 %v4333_v14  ;;  %v2384_v0 = vsel %vm2211_vm8, %v2383_v40, %v4836_v9  ;;  %v2956_v21 = vunpack.c.h.b16 %v997_v27  ;;  %v2034_v62 = vunpack.c.l.b16 %v1210_v28  ;;  %v2123_v1 = vunpack.c.l.b16 %v1833_v41  ;;  %v4229_v9 = vld [vmem:[%s5741_s3 + $0x10] sm:$0xff]  }
 0x12b   : > { %v3479_v63 = vrot.slane %v2955_v48, %v4602_v7  ;;  %v5087_v12 = vsel %vm2204_vm7, %v2536_v45, %v2532_v5  ;;  %v5090_v11 = vsel %vm2218_vm9, %v3188_v17, %v3184_v57  ;;  %v2224_v19 = vrot.slane %v2033_v47, %v4966_v55  ;;  %4092 = vmatpush3.bf16.msra.mxu1 %v4229_v9  ;;  %v4230_v47 = vld [vmem:[%s5741_s3 + $0x18] sm:$0xff]  }
 0x12c   : > { %v3040_v23 = vrot.slane %v2866_v49, %v4974_v50  ;;  %v5098_v13 = vsel %vm2218_vm9, %v2388_v22, %v2384_v0  ;;  %v3036_v27 = vsel %vm2225_vm10, %v3035_v59, %v4895_v37  ;;  %v2124_v46 = vunpack.c.l.b16 %v1840_v29  ;;  %4093 = vmatprep.subr.bf16.mxu1 %v4333_v14 }
 0x12d   : > { %4082 = vmatpush3.bf16.msra.mxu0 %v4226_v58  ;;  %v887_v52 = vpop.xlane.xlu1 %886  ;;  %v812_v58 = vpop.xlane.xlu0 %811  ;;  %v3484_v42 = vrot.slane %v2956_v21, %v4605_v8  ;;  %v2231_v35 = vrot.slane %v2034_v62, %v4974_v50  ;;  %v2679_v51 = vrot.slane %v2123_v1, %v4602_v7  ;;  %v3480_v28 = vsel %vm2183_vm4, %v3479_v63, %v4854_v60 }
 0x12e   : > { %v1525_v10 = vrot.slane %v887_v52, %v4511_v25  ;;  %v2911_v20 = vunpack.c.l.b16 %v887_v52  ;;  %v1532_v38 = vrot.slane %v887_v52, %v4514_v26  ;;  %v1315_v45 = vrot.slane %v812_v58, %v4511_v25 }
 0x12f   : > { %v2881_v34 = vunpack.c.l.b16 %v812_v58  ;;  %v2226_v41 = vsel %vm2225_vm10, %v2224_v19, %v4900_v33  ;;  %v5113_v48 = vsel %vm2232_vm12, %v3040_v23, %v3036_v27  ;;  %v2912_v22 = vunpack.c.h.b16 %v887_v52  ;;  %4094 = vmatpush3.bf16.msra.mxu1 %v4230_v47  ;;  %v4231_v23 = vld [vmem:[%s5741_s3 + $0x20] sm:$0xff]  }
 0x130   : > { %v2079_v37 = vunpack.c.l.b16 %v1525_v10  ;;  %v1322_v17 = vrot.slane %v812_v58, %v4514_v26  ;;  %v2684_v49 = vrot.slane %v2124_v46, %v4605_v8  ;;  %v3262_v56 = vrot.slane %v2911_v20, %v4865_v53  ;;  %4095 = vmatprep.subr.bf16.mxu1 %v4333_v14 }
 0x131   : > { %v2882_v60 = vunpack.c.h.b16 %v812_v58  ;;  %v5124_v33 = vsel %vm2190_vm5, %v3484_v42, %v3480_v28  ;;  %v2080_v52 = vunpack.c.l.b16 %v1532_v38  ;;  %v2049_v59 = vunpack.c.l.b16 %v1315_v45 }
 0x132   : > { %v3114_v29 = vrot.slane %v2881_v34, %v4966_v55  ;;  %v5128_v0 = vsel %vm2232_vm12, %v2231_v35, %v2226_v41  ;;  %v2680_v21 = vsel %vm2183_vm4, %v2679_v51, %v4868_v54  ;;  %v2462_v62 = vrot.slane %v2079_v37, %v4865_v53 }
 0x133   : > { %v3267_v63 = vrot.slane %v2912_v22, %v4873_v61  ;;  %v2050_v10 = vunpack.c.l.b16 %v1322_v17  ;;  %v3263_v9 = vsel %vm2211_vm8, %v3262_v56, %v4920_v16  ;;  %v3119_v54 = vrot.slane %v2882_v60, %v4974_v50  ;;  %4096 = vmatpush3.bf16.msra.mxu1 %v4231_v23 }
 0x134   : > { %v2467_v20 = vrot.slane %v2080_v52, %v4873_v61  ;;  %v2314_v42 = vrot.slane %v2049_v59, %v4966_v55  ;;  %v3115_v38 = vsel %vm2225_vm10, %v3114_v29, %v4930_v15  ;;  %v5148_v34 = vsel %vm2190_vm5, %v2684_v49, %v2680_v21  ;;  %v4232_v15 = vld [vmem:[%s5741_s3 + $0x28] sm:$0xff]   ;;  %4097 = vmatprep.subr.bf16.mxu1 %v4333_v14 }
 0x135   : > { %v1037_v40 = vpop.xlane.xlu1 %1036  ;;  %v962_v57 = vpop.xlane.xlu0 %961  ;;  %v2463_v16 = vsel %vm2211_vm8, %v2462_v62, %v4933_v18  ;;  %v5155_v37 = vsel %vm2218_vm9, %v3267_v63, %v3263_v9  ;;  %v5162_v18 = vsel %vm2232_vm12, %v3119_v54, %v3115_v38  ;;  %vm2815_vm1 = vcmask 1041409  }
 0x136   : > { %v1945_v5 = vrot.slane %v1037_v40, %v4511_v25  ;;  %v2971_v1 = vunpack.c.l.b16 %v1037_v40  ;;  %v1952_v58 = vrot.slane %v1037_v40, %v4514_v26  ;;  %v1735_v19 = vrot.slane %v962_v57, %v4511_v25 }
 0x137   : > { %v2941_v46 = vunpack.c.l.b16 %v962_v57  ;;  %v2972_v45 = vunpack.c.h.b16 %v1037_v40  ;;  %v1742_v51 = vrot.slane %v962_v57, %v4514_v26  ;;  %v2942_v17 = vunpack.c.h.b16 %v962_v57  ;;  %4098 = vmatpush3.bf16.msra.mxu1 %v4232_v15 }
 0x138   : > { %v2139_v27 = vunpack.c.l.b16 %v1945_v5  ;;  %v3558_v35 = vrot.slane %v2971_v1, %v4602_v7  ;;  %v2140_v41 = vunpack.c.l.b16 %v1952_v58  ;;  %v2109_v22 = vunpack.c.l.b16 %v1735_v19  ;;  %4099 = vmatprep.subr.bf16.mxu1 %v4333_v14 }
 0x139   : > { %v2319_v40 = vrot.slane %v2050_v10, %v4974_v50  ;;  %v3410_v56 = vrot.slane %v2941_v46, %v4718_v43  ;;  %v5168_v60 = vsel %vm2218_vm9, %v2467_v20, %v2463_v16  ;;  %v2315_v5 = vsel %vm2225_vm10, %v2314_v42, %v4939_v32 }
 0x13a   : > { %v2758_v49 = vrot.slane %v2139_v27, %v4602_v7  ;;  %v3563_v57 = vrot.slane %v2972_v45, %v4605_v8  ;;  %v3559_v59 = vsel %vm2183_vm4, %v3558_v35, %v5036_v6  ;;  %v2110_v29 = vunpack.c.l.b16 %v1742_v51 }
 0x13b   : > { %v2763_v62 = vrot.slane %v2140_v41, %v4605_v8  ;;  %v2610_v1 = vrot.slane %v2109_v22, %v4718_v43  ;;  %v3415_v63 = vrot.slane %v2942_v17, %v4721_v44  ;;  %v3411_v19 = vsel %vm2197_vm6, %v3410_v56, %v5043_v3 }
 0x13c   : > { %v2759_v32 = vsel %vm2183_vm4, %v2758_v49, %v5048_v30  ;;  %v5187_v8 = vsel %vm2232_vm12, %v2319_v40, %v2315_v5  ;;  %v5190_v9 = vsel %vm2190_vm5, %v3563_v57, %v3559_v59  ;;  %v2615_v45 = vrot.slane %v2110_v29, %v4721_v44 }
 0x13d   : > { %v927_v28 = vpop.xlane.xlu1 %926  ;;  %v852_v47 = vpop.xlane.xlu0 %851  ;;  %v5196_v38 = vsel %vm2190_vm5, %v2763_v62, %v2759_v32  ;;  %v5200_v16 = vsel %vm2204_vm7, %v3415_v63, %v3411_v19  ;;  %v2611_v51 = vsel %vm2197_vm6, %v2610_v1, %v5077_v31  ;;  %vm2817_vm2 = vcmask 1042434  }
 0x13e   : > { %v1637_v52 = vrot.slane %v927_v28, %v4511_v25  ;;  %v2927_v21 = vunpack.c.l.b16 %v927_v28  ;;  %v1427_v7 = vrot.slane %v852_v47, %v4511_v25  ;;  %v2897_v10 = vunpack.c.l.b16 %v852_v47 }
 0x13f   : > { %v1644_v6 = vrot.slane %v927_v28, %v4514_v26  ;;  %v2928_v23 = vunpack.c.h.b16 %v927_v28  ;;  %v1434_v27 = vrot.slane %v852_v47, %v4514_v26  ;;  %v2898_v20 = vunpack.c.h.b16 %v852_v47 }
 0x140   : > { %v2095_v54 = vunpack.c.l.b16 %v1637_v52  ;;  %v3341_v30 = vrot.slane %v2927_v21, %v4865_v53  ;;  %v2065_v46 = vunpack.c.l.b16 %v1427_v7  ;;  %v3193_v35 = vrot.slane %v2897_v10, %v4966_v55 }
 0x141   : > { %v2096_v28 = vunpack.c.l.b16 %v1644_v6  ;;  %v3346_v41 = vrot.slane %v2928_v23, %v4873_v61  ;;  %v2066_v47 = vunpack.c.l.b16 %v1434_v27  ;;  %v3198_v5 = vrot.slane %v2898_v20, %v4974_v50 }
 0x142   : > { %v2541_v17 = vrot.slane %v2095_v54, %v4865_v53  ;;  %v3342_v49 = vsel %vm2211_vm8, %v3341_v30, %v5080_v2  ;;  %v2393_v56 = vrot.slane %v2065_v46, %v4966_v55  ;;  %v5213_v31 = vsel %vm2204_vm7, %v2615_v45, %v2611_v51 }
 0x143   : > { %v3194_v52 = vsel %vm2225_vm10, %v3193_v35, %v5090_v11  ;;  %v2546_v21 = vrot.slane %v2096_v28, %v4873_v61  ;;  %v5222_v10 = vsel %vm2218_vm9, %v3346_v41, %v3342_v49  ;;  %v2398_v32 = vrot.slane %v2066_v47, %v4974_v50 }
 0x144   : > { %v2394_v6 = vsel %vm2225_vm10, %v2393_v56, %v5098_v13  ;;  %v5231_v23 = vsel %vm2232_vm12, %v3198_v5, %v3194_v52  ;;  %vm2819_vm3 = vcmask 1043459   ;;  %vm2821_vm4 = vcmask 1044484  }
 0x145   : > { %v777_v58 = vpop.xlane.xlu1 %776  ;;  %v1002_v42 = vpop.xlane.xlu0 %1001  ;;  %v5248_v41 = vsel %vm2232_vm12, %v2398_v32, %v2394_v6  ;;  %vm2823_vm5 = vcmask 1045509  }
 0x146   : > { %v1217_v3 = vrot.slane %v777_v58, %v4511_v25  ;;  %v2867_v22 = vunpack.c.l.b16 %v777_v58  ;;  %v1224_v15 = vrot.slane %v777_v58, %v4514_v26  ;;  %v2957_v40 = vunpack.c.l.b16 %v1002_v42 }
 0x147   : > { %v2868_v59 = vunpack.c.h.b16 %v777_v58  ;;  %v1847_v29 = vrot.slane %v1002_v42, %v4511_v25  ;;  %v1854_v2 = vrot.slane %v1002_v42, %v4514_v26  ;;  %v2958_v62 = vunpack.c.h.b16 %v1002_v42 }
 0x148   : > { %v2035_v57 = vunpack.c.l.b16 %v1217_v3  ;;  %v3045_v7 = vrot.slane %v2867_v22, %v4978_v4  ;;  %v2036_v19 = vunpack.c.l.b16 %v1224_v15  ;;  %v3489_v11 = vrot.slane %v2957_v40, %v4718_v43 }
 0x149   : > { %v2542_v58 = vsel %vm2211_vm8, %v2541_v17, %v5087_v12  ;;  %v3050_v27 = vrot.slane %v2868_v59, %v4995_v24  ;;  %v2125_v30 = vunpack.c.l.b16 %v1847_v29  ;;  %v2126_v42 = vunpack.c.l.b16 %v1854_v2 }
 0x14a   : > { %v2238_v54 = vrot.slane %v2035_v57, %v4978_v4  ;;  %v3046_v3 = vsel %vm2239_vm13, %v3045_v7, %v5113_v48  ;;  %v3494_v12 = vrot.slane %v2958_v62, %v4721_v44  ;;  %v5242_v45 = vsel %vm2218_vm9, %v2546_v21, %v2542_v58 }
 0x14b   : > { %v2245_v35 = vrot.slane %v2036_v19, %v4995_v24  ;;  %v3490_v51 = vsel %vm2197_vm6, %v3489_v11, %v5124_v33  ;;  %v5254_v15 = vsel %vm2246_vm14, %v3050_v27, %v3046_v3  ;;  %v2689_v40 = vrot.slane %v2125_v30, %v4718_v43 }
 0x14c   : > { %v2240_v48 = vsel %vm2239_vm13, %v2238_v54, %v5128_v0  ;;  %v2694_v33 = vrot.slane %v2126_v42, %v4721_v44  ;;  %v5259_v57 = vsel %vm2204_vm7, %v3494_v12, %v3490_v51 }
 0x14d   : > { %v892_v1 = vpop.xlane.xlu1 %891  ;;  %v817_v63 = vpop.xlane.xlu0 %816  ;;  %v5262_v0 = vsel %vm2246_vm14, %v2245_v35, %v2240_v48  ;;  %v2690_v11 = vsel %vm2197_vm6, %v2689_v40, %v5148_v34 }
 0x14e   : > { %v1539_v46 = vrot.slane %v892_v1, %v4511_v25  ;;  %v1329_v20 = vrot.slane %v817_v63, %v4511_v25  ;;  %v1546_v13 = vrot.slane %v892_v1, %v4514_v26  ;;  %v2913_v28 = vunpack.c.l.b16 %v892_v1 }
 0x14f   : > { %v1336_v22 = vrot.slane %v817_v63, %v4514_v26  ;;  %v2883_v17 = vunpack.c.l.b16 %v817_v63  ;;  %v2914_v59 = vunpack.c.h.b16 %v892_v1  ;;  %v2884_v62 = vunpack.c.h.b16 %v817_v63 }
 0x150   : > { %v2081_v49 = vunpack.c.l.b16 %v1539_v46  ;;  %v2051_v56 = vunpack.c.l.b16 %v1329_v20  ;;  %v2082_v52 = vunpack.c.l.b16 %v1546_v13  ;;  %v3272_v29 = vrot.slane %v2913_v28, %v4966_v55 }
 0x151   : > { %v2052_v2 = vunpack.c.l.b16 %v1336_v22  ;;  %v3124_v32 = vrot.slane %v2883_v17, %v4978_v4  ;;  %v3277_v27 = vrot.slane %v2914_v59, %v4974_v50  ;;  %v3129_v13 = vrot.slane %v2884_v62, %v4995_v24 }
 0x152   : > { %v2472_v58 = vrot.slane %v2081_v49, %v4966_v55  ;;  %v2324_v1 = vrot.slane %v2051_v56, %v4978_v4  ;;  %v2477_v54 = vrot.slane %v2082_v52, %v4974_v50  ;;  %v3273_v46 = vsel %vm2225_vm10, %v3272_v29, %v5155_v37 }
 0x153   : > { %v2329_v42 = vrot.slane %v2052_v2, %v4995_v24  ;;  %v3125_v12 = vsel %vm2239_vm13, %v3124_v32, %v5162_v18  ;;  %v5288_v17 = vsel %vm2204_vm7, %v2694_v33, %v2690_v11 }
 0x154   : > { %v2473_v28 = vsel %vm2225_vm10, %v2472_v58, %v5168_v60  ;;  %v2325_v48 = vsel %vm2239_vm13, %v2324_v1, %v5187_v8  ;;  %v5306_v59 = vsel %vm2246_vm14, %v3129_v13, %v3125_v12 }
 0x155   : > { %v1042_v47 = vpop.xlane.xlu1 %1041  ;;  %v967_v5 = vpop.xlane.xlu0 %966  ;;  %v5303_v33 = vsel %vm2246_vm14, %v2329_v42, %v2325_v48 }
 0x156   : > { %v1959_v21 = vrot.slane %v1042_v47, %v4511_v25  ;;  %v2973_v7 = vunpack.c.l.b16 %v1042_v47  ;;  %v1749_v19 = vrot.slane %v967_v5, %v4511_v25  ;;  %v1966_v6 = vrot.slane %v1042_v47, %v4514_v26 }
 0x157   : > { %v2974_v30 = vunpack.c.h.b16 %v1042_v47  ;;  %v1756_v63 = vrot.slane %v967_v5, %v4514_v26  ;;  %v2943_v34 = vunpack.c.l.b16 %v967_v5  ;;  %v2944_v22 = vunpack.c.h.b16 %v967_v5 }
 0x158   : > { %v2141_v20 = vunpack.c.l.b16 %v1959_v21  ;;  %v3568_v3 = vrot.slane %v2973_v7, %v4718_v43  ;;  %v2111_v35 = vunpack.c.l.b16 %v1749_v19  ;;  %v2142_v37 = vunpack.c.l.b16 %v1966_v6 }
 0x159   : > { %v5291_v47 = vsel %vm2232_vm12, %v3277_v27, %v3273_v46  ;;  %v3573_v18 = vrot.slane %v2974_v30, %v4721_v44  ;;  %v2112_v40 = vunpack.c.l.b16 %v1756_v63  ;;  %v3420_v60 = vrot.slane %v2943_v34, %v4865_v53 }
 0x15a   : > { %v2768_v49 = vrot.slane %v2141_v20, %v4718_v43  ;;  %v3569_v56 = vsel %vm2197_vm6, %v3568_v3, %v5190_v9  ;;  %v5300_v5 = vsel %vm2232_vm12, %v2477_v54, %v2473_v28  ;;  %v2620_v29 = vrot.slane %v2111_v35, %v4865_v53 }
 0x15b   : > { %v2773_v43 = vrot.slane %v2142_v37, %v4721_v44  ;;  %v3425_v9 = vrot.slane %v2944_v22, %v4873_v61  ;;  %v5313_v2 = vsel %vm2204_vm7, %v3573_v18, %v3569_v56  ;;  %v2625_v58 = vrot.slane %v2112_v40, %v4873_v61 }
 0x15c   : > { %v2769_v11 = vsel %vm2197_vm6, %v2768_v49, %v5196_v38  ;;  %v3421_v44 = vsel %vm2211_vm8, %v3420_v60, %v5200_v16  ;;  %v2621_v54 = vsel %vm2211_vm8, %v2620_v29, %v5213_v31  ;;  %vm2825_vm6 = vcmask 1046534  }
 0x15d   : > { %v932_v51 = vpop.xlane.xlu1 %931  ;;  %v857_v52 = vpop.xlane.xlu0 %856  ;;  %v5337_v13 = vsel %vm2204_vm7, %v2773_v43, %v2769_v11  ;;  %v5340_v35 = vsel %vm2218_vm9, %v2625_v58, %v2621_v54  ;;  %vm2827_vm7 = vcmask 1047559  }
 0x15e   : > { %v1651_v8 = vrot.slane %v932_v51, %v4511_v25  ;;  %v1658_v21 = vrot.slane %v932_v51, %v4514_v26  ;;  %v2929_v7 = vunpack.c.l.b16 %v932_v51  ;;  %v1441_v62 = vrot.slane %v857_v52, %v4511_v25 }
 0x15f   : > { %v1448_v32 = vrot.slane %v857_v52, %v4514_v26  ;;  %v2899_v19 = vunpack.c.l.b16 %v857_v52  ;;  %v2930_v27 = vunpack.c.h.b16 %v932_v51  ;;  %v2900_v38 = vunpack.c.h.b16 %v857_v52 }
 0x160   : > { %v2097_v1 = vunpack.c.l.b16 %v1651_v8  ;;  %v5326_v46 = vunpack.c.l.b16 %v1658_v21  ;;  %v3351_v20 = vrot.slane %v2929_v7, %v4966_v55  ;;  %v5331_v16 = vunpack.c.l.b16 %v1441_v62 }
 0x161   : > { %v5333_v42 = vunpack.c.l.b16 %v1448_v32  ;;  %v3203_v31 = vrot.slane %v2899_v19, %v4978_v4  ;;  %v5343_v51 = vsel %vm2218_vm9, %v3425_v9, %v3421_v44  ;;  %v5347_v48 = vrot.slane %v2930_v27, %v4974_v50 }
 0x162   : > { %v2551_v28 = vrot.slane %v2097_v1, %v4966_v55  ;;  %v2556_v40 = vrot.slane %v5326_v46, %v4974_v50  ;;  %v5355_v49 = vsel %vm2225_vm10, %v3351_v20, %v5222_v10  ;;  %v5358_v56 = vrot.slane %v2900_v38, %v4995_v24 }
 0x163   : > { %v2403_v8 = vrot.slane %v5331_v16, %v4978_v4  ;;  %v2408_v52 = vrot.slane %v5333_v42, %v4995_v24  ;;  %v5367_v29 = vsel %vm2239_vm13, %v3203_v31, %v5231_v23 }
 0x164   : > { %v2552_v10 = vsel %vm2225_vm10, %v2551_v28, %v5242_v45 }
 0x165   : > { %v782_v6 = vpop.xlane.xlu1 %781  ;;  %v5329_v34 = vpop.xlane.xlu0 %1006 }
 0x166   : > { %v1231_v30 = vrot.slane %v782_v6, %v4511_v25  ;;  %v1238_v63 = vrot.slane %v782_v6, %v4514_v26  ;;  %v2869_v3 = vunpack.c.l.b16 %v782_v6  ;;  %v2870_v22 = vunpack.c.h.b16 %v782_v6 }
 0x167   : > { %v1861_v18 = vrot.slane %v5329_v34, %v4511_v25  ;;  %v1868_v9 = vrot.slane %v5329_v34, %v4514_v26  ;;  %v2959_v21 = vunpack.c.l.b16 %v5329_v34  ;;  %v2960_v7 = vunpack.c.h.b16 %v5329_v34 }
 0x168   : > { %v2037_v12 = vunpack.c.l.b16 %v1231_v30  ;;  %v2038_v37 = vunpack.c.l.b16 %v1238_v63  ;;  %v3055_v60 = vrot.slane %v2869_v3, %v4999_v36  ;;  %v3060_v19 = vrot.slane %v2870_v22, %v5006_v39 }
 0x169   : > { %v2127_v11 = vunpack.c.l.b16 %v1861_v18  ;;  %v3499_v31 = vrot.slane %v2959_v21, %v4865_v53 }
 0x16a   : > { %v2252_v43 = vrot.slane %v2037_v12, %v4999_v36  ;;  %v2259_v32 = vrot.slane %v2038_v37, %v5006_v39  ;;  %v3056_v44 = vsel %vm2253_vm15, %v3055_v60, %v5254_v15  ;;  %v2128_v15 = vunpack.c.l.b16 %v1868_v9 }
 0x16b   : > { %v3061_v16 = vsel %vm2260_vm0, %v3060_v19, %v3056_v44  ;;  %v2699_v28 = vrot.slane %v2127_v11, %v4865_v53 }
 0x16c   : > { %v2254_v54 = vsel %vm2253_vm15, %v2252_v43, %v5262_v0 }
 0x16d   : > { %v897_v62 = vpop.xlane.xlu1 %896  ;;  %v822_v58 = vpop.xlane.xlu0 %821  ;;  %v2261_v18 = vsel %vm2260_vm0, %v2259_v32, %v2254_v54  ;;  %v3504_v54 = vrot.slane %v2960_v7, %v4873_v61 }
 0x16e   : > { %v1553_v23 = vrot.slane %v897_v62, %v4511_v25  ;;  %v1343_v45 = vrot.slane %v822_v58, %v4511_v25  ;;  %v1350_v1 = vrot.slane %v822_v58, %v4514_v26  ;;  %v2885_v6 = vunpack.c.l.b16 %v822_v58 }
 0x16f   : > { %v1560_v27 = vrot.slane %v897_v62, %v4514_v26  ;;  %v2915_v30 = vunpack.c.l.b16 %v897_v62  ;;  %v2886_v63 = vunpack.c.h.b16 %v822_v58  ;;  %v2916_v43 = vunpack.c.h.b16 %v897_v62 }
 0x170   : > { %v2083_v20 = vunpack.c.l.b16 %v1553_v23  ;;  %v2053_v38 = vunpack.c.l.b16 %v1343_v45  ;;  %v2054_v3 = vunpack.c.l.b16 %v1350_v1  ;;  %v3134_v34 = vrot.slane %v2885_v6, %v4999_v36 }
 0x171   : > { %v3139_v12 = vrot.slane %v2886_v63, %v5006_v39  ;;  %v2084_v60 = vunpack.c.l.b16 %v1560_v27  ;;  %v3282_v21 = vrot.slane %v2915_v30, %v4978_v4  ;;  %v2404_v1 = vsel %vm2239_vm13, %v2403_v8, %v5248_v41 }
 0x172   : > { %v2334_v0 = vrot.slane %v2053_v38, %v4999_v36  ;;  %v2339_v37 = vrot.slane %v2054_v3, %v5006_v39  ;;  %v3135_v22 = vsel %vm2253_vm15, %v3134_v34, %v5306_v59  ;;  %v2482_v9 = vrot.slane %v2083_v20, %v4978_v4 }
 0x173   : > { %v3140_v19 = vsel %vm2260_vm0, %v3139_v12, %v3135_v22  ;;  %v2704_v6 = vrot.slane %v2128_v15, %v4873_v61  ;;  %v2700_v27 = vsel %vm2211_vm8, %v2699_v28, %v5288_v17  ;;  %v3500_v30 = vsel %vm2211_vm8, %v3499_v31, %v5259_v57 }
 0x174   : > { %v2335_v11 = vsel %vm2253_vm15, %v2334_v0, %v5303_v33  ;;  %v5402_v23 = vsel %vm2815_vm1, %v3140_v19, %v3061_v16  ;;  %v3287_v63 = vrot.slane %v2916_v43, %v4995_v24  ;;  %v2487_v38 = vrot.slane %v2084_v60, %v4995_v24 }
 0x175   : > { %v1047_v58 = vpop.xlane.xlu1 %1046  ;;  %v2340_v44 = vsel %vm2260_vm0, %v2339_v37, %v2335_v11  ;;  %v972_v45 = vpop.xlane.xlu0 %971  ;;  %v3283_v41 = vsel %vm2239_vm13, %v3282_v21, %v5291_v47  ;;  %v2483_v3 = vsel %vm2239_vm13, %v2482_v9, %v5300_v5  ;;  %v5433_v16 = vsel %vm2232_vm12, %v2556_v40, %v2552_v10 }
 0x176   : > { %v1973_v59 = vrot.slane %v1047_v58, %v4511_v25  ;;  %v1980_v32 = vrot.slane %v1047_v58, %v4514_v26  ;;  %v2975_v62 = vunpack.c.l.b16 %v1047_v58  ;;  %v5412_v33 = vsel %vm2815_vm1, %v2340_v44, %v2261_v18 }
 0x177   : > { %v2976_v20 = vunpack.c.h.b16 %v1047_v58  ;;  %v1763_v7 = vrot.slane %v972_v45, %v4511_v25  ;;  %v1770_v57 = vrot.slane %v972_v45, %v4514_v26  ;;  %v5438_v47 = vsel %vm2232_vm12, %v5347_v48, %v5355_v49 }
 0x178   : > { %v3578_v8 = vrot.slane %v2975_v62, %v4865_v53  ;;  %v2143_v34 = vunpack.c.l.b16 %v1973_v59  ;;  %v5426_v17 = vunpack.c.l.b16 %v1980_v32  ;;  %v2409_v5 = vsel %vm2246_vm14, %v2408_v52, %v2404_v1 }
 0x179   : > { %v3209_v15 = vsel %vm2246_vm14, %v5358_v56, %v5367_v29  ;;  %v5448_v31 = vsel %vm2218_vm9, %v2704_v6, %v2700_v27  ;;  %v5451_v46 = vsel %vm2218_vm9, %v3504_v54, %v3500_v30  ;;  %v3583_v40 = vrot.slane %v2976_v20, %v4873_v61 }
 0x17a   : > { %v2945_v10 = vunpack.c.l.b16 %v972_v45  ;;  %v5455_v48 = vsel %vm2246_vm14, %v2487_v38, %v2483_v3  ;;  %v3288_v42 = vsel %vm2246_vm14, %v3287_v63, %v3283_v41  ;;  %v3579_v49 = vsel %vm2211_vm8, %v3578_v8, %v5313_v2 }
 0x17b   : > { %v2113_v52 = vunpack.c.l.b16 %v1763_v7  ;;  %v2778_v56 = vrot.slane %v2143_v34, %v4865_v53  ;;  %v2783_v29 = vrot.slane %v5426_v17, %v4873_v61  ;;  %v5463_v28 = vunpack.c.l.b16 %v1770_v57 }
 0x17c   : > { %v2946_v0 = vunpack.c.h.b16 %v972_v45  ;;  %v5469_v2 = vsel %vm2218_vm9, %v3583_v40, %v3579_v49  ;;  %v3430_v19 = vrot.slane %v2945_v10, %v4966_v55 }
 0x17d   : > { %v937_v12 = vpop.xlane.xlu1 %936  ;;  %v862_v37 = vpop.xlane.xlu0 %861  ;;  %v2630_v44 = vrot.slane %v2113_v52, %v4966_v55  ;;  %v2635_v59 = vrot.slane %v5463_v28, %v4974_v50  ;;  %v2779_v27 = vsel %vm2211_vm8, %v2778_v56, %v5337_v13 }
 0x17e   : > { %v1665_v22 = vrot.slane %v937_v12, %v4511_v25  ;;  %v1455_v18 = vrot.slane %v862_v37, %v4511_v25  ;;  %v1462_v60 = vrot.slane %v862_v37, %v4514_v26  ;;  %v2901_v43 = vunpack.c.l.b16 %v862_v37 }
 0x17f   : > { %v1672_v53 = vrot.slane %v937_v12, %v4514_v26  ;;  %v2902_v9 = vunpack.c.h.b16 %v862_v37  ;;  %v2931_v61 = vunpack.c.l.b16 %v937_v12  ;;  %v5478_v32 = vrot.slane %v2946_v0, %v4974_v50 }
 0x180   : > { %v2069_v21 = vunpack.c.l.b16 %v1455_v18  ;;  %v2070_v11 = vunpack.c.l.b16 %v1462_v60  ;;  %v3213_v58 = vrot.slane %v2901_v43, %v4999_v36  ;;  %v2099_v45 = vunpack.c.l.b16 %v1665_v22 }
 0x181   : > { %v3218_v62 = vrot.slane %v2902_v9, %v5006_v39  ;;  %v3431_v30 = vsel %vm2225_vm10, %v3430_v19, %v5343_v51  ;;  %v2932_v63 = vunpack.c.h.b16 %v937_v12  ;;  %v5489_v38 = vunpack.c.l.b16 %v1672_v53 }
 0x182   : > { %v2413_v1 = vrot.slane %v2069_v21, %v4999_v36  ;;  %v2418_v6 = vrot.slane %v2070_v11, %v5006_v39  ;;  %v3214_v54 = vsel %vm2253_vm15, %v3213_v58, %v3209_v15  ;;  %v3361_v41 = vrot.slane %v2931_v61, %v4978_v4 }
 0x183   : > { %v3219_v20 = vsel %vm2260_vm0, %v3218_v62, %v3214_v54  ;;  %v2561_v15 = vrot.slane %v2099_v45, %v4978_v4  ;;  %v2784_v18 = vsel %vm2218_vm9, %v2783_v29, %v2779_v27  ;;  %v2631_v19 = vsel %vm2225_vm10, %v2630_v44, %v5340_v35 }
 0x184   : > { %v2414_v8 = vsel %vm2253_vm15, %v2413_v1, %v2409_v5  ;;  %v3616_v7 = vsel %vm2817_vm2, %v3219_v20, %v5402_v23  ;;  %v3366_v53 = vrot.slane %v2932_v63, %v4995_v24  ;;  %v2566_v21 = vrot.slane %v5489_v38, %v4995_v24 }
 0x185   : > { %v902_v3 = vpop.xlane.xlu1 %901  ;;  %v2419_v34 = vsel %vm2260_vm0, %v2418_v6, %v2414_v8  ;;  %v1012_v57 = vpop.xlane.xlu0 %1011  ;;  %v3362_v29 = vsel %vm2239_vm13, %v3361_v41, %v5438_v47  ;;  %v2562_v35 = vsel %vm2239_vm13, %v2561_v15, %v5433_v16 }
 0x186   : > { %v1567_v13 = vrot.slane %v902_v3, %v4511_v25  ;;  %v1574_v17 = vrot.slane %v902_v3, %v4514_v26  ;;  %v2917_v51 = vunpack.c.l.b16 %v902_v3  ;;  %v2818_v40 = vsel %vm2817_vm2, %v2419_v34, %v5412_v33 }
 0x187   : > { %v2918_v10 = vunpack.c.h.b16 %v902_v3  ;;  %v1875_v5 = vrot.slane %v1012_v57, %v4511_v25  ;;  %v2961_v12 = vunpack.c.l.b16 %v1012_v57  ;;  %v1882_v0 = vrot.slane %v1012_v57, %v4514_v26 }
 0x188   : > { %v2085_v49 = vunpack.c.l.b16 %v1567_v13  ;;  %v2086_v52 = vunpack.c.l.b16 %v1574_v17  ;;  %v3292_v23 = vrot.slane %v2917_v51, %v4999_v36  ;;  %v2962_v22 = vunpack.c.h.b16 %v1012_v57 }
 0x189   : > { %v3297_v56 = vrot.slane %v2918_v10, %v5006_v39  ;;  %v2129_v37 = vunpack.c.l.b16 %v1875_v5  ;;  %v3509_v43 = vrot.slane %v2961_v12, %v4966_v55  ;;  %v2130_v58 = vunpack.c.l.b16 %v1882_v0 }
 0x18a   : > { %v2492_v60 = vrot.slane %v2085_v49, %v4999_v36  ;;  %v3293_v33 = vsel %vm2253_vm15, %v3292_v23, %v3288_v42  ;;  %v2497_v9 = vrot.slane %v2086_v52, %v5006_v39  ;;  %v3514_v62 = vrot.slane %v2962_v22, %v4974_v50 }
 0x18b   : > { %v3298_v61 = vsel %vm2260_vm0, %v3297_v56, %v3293_v33  ;;  %v2709_v44 = vrot.slane %v2129_v37, %v4966_v55  ;;  %v3510_v1 = vsel %vm2225_vm10, %v3509_v43, %v5451_v46  ;;  %v2636_v17 = vsel %vm2232_vm12, %v2635_v59, %v2631_v19 }
 0x18c   : > { %v2493_v42 = vsel %vm2253_vm15, %v2492_v60, %v5455_v48  ;;  %v5521_v11 = vsel %vm2819_vm3, %v3298_v61, %v3616_v7  ;;  %v3436_v51 = vsel %vm2232_vm12, %v5478_v32, %v3431_v30  ;;  %v3367_v57 = vsel %vm2246_vm14, %v3366_v53, %v3362_v29 }
 0x18d   : > { %v1052_v45 = vpop.xlane.xlu1 %1051  ;;  %v977_v54 = vpop.xlane.xlu0 %976  ;;  %v2498_v27 = vsel %vm2260_vm0, %v2497_v9, %v2493_v42  ;;  %v2567_v10 = vsel %vm2246_vm14, %v2566_v21, %v2562_v35  ;;  %v2710_v5 = vsel %vm2225_vm10, %v2709_v44, %v5448_v31  ;;  %v2714_v49 = vrot.slane %v2130_v58, %v4974_v50 }
 0x18e   : > { %v1987_v47 = vrot.slane %v1052_v45, %v4511_v25  ;;  %v1994_v6 = vrot.slane %v1052_v45, %v4514_v26  ;;  %v2977_v48 = vunpack.c.l.b16 %v1052_v45  ;;  %v1777_v63 = vrot.slane %v977_v54, %v4511_v25 }
 0x18f   : > { %v1784_v16 = vrot.slane %v977_v54, %v4514_v26  ;;  %v2947_v20 = vunpack.c.l.b16 %v977_v54  ;;  %v2978_v8 = vunpack.c.h.b16 %v1052_v45  ;;  %v2948_v34 = vunpack.c.h.b16 %v977_v54 }
 0x190   : > { %v2145_v38 = vunpack.c.l.b16 %v1987_v47  ;;  %v2146_v41 = vunpack.c.l.b16 %v1994_v6  ;;  %v3588_v7 = vrot.slane %v2977_v48, %v4966_v55  ;;  %v2115_v3 = vunpack.c.l.b16 %v1777_v63 }
 0x191   : > { %v2116_v46 = vunpack.c.l.b16 %v1784_v16  ;;  %v3440_v13 = vrot.slane %v2947_v20, %v4978_v4  ;;  %v3515_v28 = vsel %vm2232_vm12, %v3514_v62, %v3510_v1  ;;  %v3593_v32 = vrot.slane %v2978_v8, %v4974_v50 }
 0x192   : > { %v2788_v15 = vrot.slane %v2145_v38, %v4966_v55  ;;  %v2640_v52 = vrot.slane %v2115_v3, %v4978_v4  ;;  %v2793_v59 = vrot.slane %v2146_v41, %v4974_v50  ;;  %v5553_v30 = vsel %vm2819_vm3, %v2498_v27, %v2818_v40 }
 0x193   : > { %v3589_v55 = vsel %vm2225_vm10, %v3588_v7, %v5469_v2  ;;  %v2645_v23 = vrot.slane %v2116_v46, %v4995_v24  ;;  %v3441_v31 = vsel %vm2239_vm13, %v3440_v13, %v3436_v51  ;;  %v3445_v12 = vrot.slane %v2948_v34, %v4995_v24 }
 0x194   : > { %v2789_v0 = vsel %vm2225_vm10, %v2788_v15, %v2784_v18  ;;  %v2641_v40 = vsel %vm2239_vm13, %v2640_v52, %v2636_v17  ;;  %v2715_v35 = vsel %vm2232_vm12, %v2714_v49, %v2710_v5  ;;  %v3594_v58 = vsel %vm2232_vm12, %v3593_v32, %v3589_v55 }
 0x195   : > { %v1017_v56 = vpop.xlane.xlu1 %1016  ;;  %v942_v60 = vpop.xlane.xlu0 %941  ;;  %v3446_v44 = vsel %vm2246_vm14, %v3445_v12, %v3441_v31  ;;  %v2794_v45 = vsel %vm2232_vm12, %v2793_v59, %v2789_v0  ;;  %v2646_v48 = vsel %vm2246_vm14, %v2645_v23, %v2641_v40 }
 0x196   : > { %v1889_v37 = vrot.slane %v1017_v56, %v4511_v25  ;;  %v1896_v22 = vrot.slane %v1017_v56, %v4514_v26  ;;  %v2963_v50 = vunpack.c.l.b16 %v1017_v56  ;;  %v1679_v33 = vrot.slane %v942_v60, %v4511_v25 }
 0x197   : > { %v1686_v2 = vrot.slane %v942_v60, %v4514_v26  ;;  %v2933_v43 = vunpack.c.l.b16 %v942_v60  ;;  %v2964_v9 = vunpack.c.h.b16 %v1017_v56  ;;  %v2934_v61 = vunpack.c.h.b16 %v942_v60 }
 0x198   : > { %v2131_v19 = vunpack.c.l.b16 %v1889_v37  ;;  %v5566_v53 = vunpack.c.l.b16 %v1896_v22  ;;  %v3519_v18 = vrot.slane %v2963_v50, %v4978_v4  ;;  %v2101_v21 = vunpack.c.l.b16 %v1679_v33 }
 0x199   : > { %v2102_v29 = vunpack.c.l.b16 %v1686_v2  ;;  %v3371_v42 = vrot.slane %v2933_v43, %v4999_v36  ;;  %v3376_v62 = vrot.slane %v2934_v61, %v5006_v39  ;;  %v3524_v27 = vrot.slane %v2964_v9, %v4995_v24 }
 0x19a   : > { %v2571_v1 = vrot.slane %v2101_v21, %v4999_v36  ;;  %v2719_v54 = vrot.slane %v2131_v19, %v4978_v4  ;;  %v2724_v16 = vrot.slane %v5566_v53, %v4995_v24  ;;  %v3520_v20 = vsel %vm2239_vm13, %v3519_v18, %v3515_v28 }
 0x19b   : > { %v2576_v47 = vrot.slane %v2102_v29, %v5006_v39  ;;  %v3372_v6 = vsel %vm2253_vm15, %v3371_v42, %v3367_v57  ;;  %v3525_v22 = vsel %vm2246_vm14, %v3524_v27, %v3520_v20 }
 0x19c   : > { %v3377_v63 = vsel %vm2260_vm0, %v3376_v62, %v3372_v6  ;;  %v2572_v38 = vsel %vm2253_vm15, %v2571_v1, %v2567_v10  ;;  %v2720_v56 = vsel %vm2239_vm13, %v2719_v54, %v2715_v35 }
 0x19d   : > { %v1057_v41 = vpop.xlane.xlu1 %1056  ;;  %v3618_v8 = vsel %vm2821_vm4, %v3377_v63, %v5521_v11  ;;  %v2577_v7 = vsel %vm2260_vm0, %v2576_v47, %v2572_v38  ;;  %v982_v13 = vpop.xlane.xlu0 %981 }
 0x19e   : > { %v2001_v3 = vrot.slane %v1057_v41, %v4511_v25  ;;  %v2008_v46 = vrot.slane %v1057_v41, %v4514_v26  ;;  %v2979_v34 = vunpack.c.l.b16 %v1057_v41  ;;  %v2980_v17 = vunpack.c.h.b16 %v1057_v41 }
 0x19f   : > { %v1791_v51 = vrot.slane %v982_v13, %v4511_v25  ;;  %v1798_v57 = vrot.slane %v982_v13, %v4514_v26  ;;  %v2949_v15 = vunpack.c.l.b16 %v982_v13  ;;  %v2950_v52 = vunpack.c.h.b16 %v982_v13 }
 0x1a0   : > { %v2147_v5 = vunpack.c.l.b16 %v2001_v3  ;;  %v2148_v10 = vunpack.c.l.b16 %v2008_v46  ;;  %v3598_v49 = vrot.slane %v2979_v34, %v4978_v4  ;;  %v3603_v11 = vrot.slane %v2980_v17, %v4995_v24 }
 0x1a1   : > { %v2117_v28 = vunpack.c.l.b16 %v1791_v51  ;;  %v2118_v59 = vunpack.c.l.b16 %v1798_v57  ;;  %v3450_v32 = vrot.slane %v2949_v15, %v4999_v36  ;;  %v3455_v12 = vrot.slane %v2950_v52, %v5006_v39 }
 0x1a2   : > { %v2798_v55 = vrot.slane %v2147_v5, %v4978_v4  ;;  %v2803_v23 = vrot.slane %v2148_v10, %v4995_v24  ;;  %v3599_v31 = vsel %vm2239_vm13, %v3598_v49, %v3594_v58  ;;  %v2822_v40 = vsel %vm2821_vm4, %v2577_v7, %v5553_v30  ;;  %v4233_v5 = vld [vmem:[%s5741_s3 + $0x30] sm:$0xff]   ;;  %v4234_v10 = vld [vmem:[%s5741_s3 + $0x38] sm:$0xff]   ;;  %v4024_v49 = vld [vmem:[%s5740_s2] ss:$0 sm:$0xff] }
 0x1a3   : > { %v2650_v0 = vrot.slane %v2117_v28, %v4999_v36  ;;  %v3451_v37 = vsel %vm2253_vm15, %v3450_v32, %v3446_v44  ;;  %v2655_v4 = vrot.slane %v2118_v59, %v5006_v39  ;;  %v3604_v43 = vsel %vm2246_vm14, %v3603_v11, %v3599_v31  ;;  %4100 = vmatpush3.bf16.msra.mxu1 %v4233_v5 }
 0x1a4   : > { %v2799_v50 = vsel %vm2239_vm13, %v2798_v55, %v2794_v45  ;;  %v3456_v60 = vsel %vm2260_vm0, %v3455_v12, %v3451_v37  ;;  %v2725_v3 = vsel %vm2246_vm14, %v2724_v16, %v2720_v56  ;;  %4101 = vmatprep.subr.bf16.mxu1 %v4333_v14 }
 0x1a5   : > { %v2651_v33 = vsel %vm2253_vm15, %v2650_v0, %v2646_v48  ;;  %v1062_v2 = vpop.xlane.xlu1 %1061  ;;  %v3619_v19 = vsel %vm2823_vm5, %v3456_v60, %v3618_v8  ;;  %v2804_v9 = vsel %vm2246_vm14, %v2803_v23, %v2799_v50  ;;  %v1022_v42 = vpop.xlane.xlu0 %1021 }
 0x1a6   : > { %v2015_v61 = vrot.slane %v1062_v2, %v4511_v25  ;;  %v2022_v18 = vrot.slane %v1062_v2, %v4514_v26  ;;  %v2981_v21 = vunpack.c.l.b16 %v1062_v2  ;;  %v2982_v29 = vunpack.c.h.b16 %v1062_v2 }
 0x1a7   : > { %v1903_v35 = vrot.slane %v1022_v42, %v4511_v25  ;;  %v1910_v30 = vrot.slane %v1022_v42, %v4514_v26  ;;  %v2965_v58 = vunpack.c.l.b16 %v1022_v42  ;;  %v2966_v44 = vunpack.c.h.b16 %v1022_v42  ;;  %4102 = vmatpush3.bf16.msra.mxu1 %v4234_v10 }
 0x1a8   : > { %v2149_v62 = vunpack.c.l.b16 %v2015_v61  ;;  %v2150_v45 = vunpack.c.l.b16 %v2022_v18  ;;  %v3608_v1 = vrot.slane %v2981_v21, %v4999_v36  ;;  %v3613_v47 = vrot.slane %v2982_v29, %v5006_v39 }
 0x1a9   : > { %v2133_v6 = vunpack.c.l.b16 %v1903_v35  ;;  %v2134_v48 = vunpack.c.l.b16 %v1910_v30  ;;  %v3529_v54 = vrot.slane %v2965_v58, %v4999_v36  ;;  %v3534_v27 = vrot.slane %v2966_v44, %v5006_v39 }
 0x1aa   : > { %v2808_v63 = vrot.slane %v2149_v62, %v4999_v36  ;;  %v2813_v25 = vrot.slane %v2150_v45, %v5006_v39  ;;  %v3609_v26 = vsel %vm2253_vm15, %v3608_v1, %v3604_v43  ;;  %v2656_v20 = vsel %vm2260_vm0, %v2655_v4, %v2651_v33 }
 0x1ab   : > { %v2729_v38 = vrot.slane %v2133_v6, %v4999_v36  ;;  %v2734_v41 = vrot.slane %v2134_v48, %v5006_v39  ;;  %v3530_v8 = vsel %vm2253_vm15, %v3529_v54, %v3525_v22  ;;  %v3614_v7 = vsel %vm2260_vm0, %v3613_v47, %v3609_v26 }
 0x1ac   : > { %v3535_v46 = vsel %vm2260_vm0, %v3534_v27, %v3530_v8  ;;  %v2809_v34 = vsel %vm2253_vm15, %v2808_v63, %v2804_v9  ;;  %v2824_v13 = vsel %vm2823_vm5, %v2656_v20, %v2822_v40 }
 0x1ad   : > { %v2730_v36 = vsel %vm2253_vm15, %v2729_v38, %v2725_v3  ;;  %v3620_v39 = vsel %vm2825_vm6, %v3535_v46, %v3619_v19  ;;  %v2814_v17 = vsel %vm2260_vm0, %v2813_v25, %v2809_v34 }
 0x1ae   : > { %v3621_v51 = vsel %vm2827_vm7, %v3614_v7, %v3620_v39  ;;  %v2735_v24 = vsel %vm2260_vm0, %v2734_v41, %v2730_v36 }
 0x1af   : > { %v3622_v53 = vpack.c.b16 %v3621_v51, %v3621_v51  ;;  %v2826_v16 = vsel %vm2825_vm6, %v2735_v24, %v2824_v13 }
 0x1b0   : > { %v2828_v57 = vsel %vm2827_vm7, %v2814_v17, %v2826_v16 }
 0x1b1   : > { %4084 = vmatmul.mubr.bf16.vlgmr.msra.gmra.mrb[0].mxu0 %v3622_v53  ;;  %v2829_v15 = vpack.c.b16 %v2828_v57, %v2828_v57 }
 0x1b3   : > { %2831 = vst [vmem:[%s266_s14] sm:$0xf] %v2829_v15 }
 0x284   : > { %v3706_v52 = vpop.f32.mrb[0].mxu0 }
 0x285   : > { %v3707_v11 = vadd.f32 %v4024_v49, %v3706_v52  ;;  %v4085_v28 = vpop.f32.mrb[1].mxu0 }
 0x286   : > { %v3709_v59 = vpop.f32.mrb[2].mxu0 }
 0x287   : > { %v3712_v32 = vmax.f32 %v3707_v11, 0.0  ;;  %v4086_v55 = vpop.f32.mrb[3].mxu0 }
 0x289   : > { %v3713_v23 = vpack.c.bf16 %v3712_v32, %v3712_v32 }
 0x28b   : > { %4104 = vmatmul.mubr.bf16.vlgmr.msra.gmra.mrb[0].mxu1 %v3713_v23 }
 0x28c   : > { %4248 = shalt.err (!%p4245_p3)
}
 0x28d   : > { %s4249_s14 = scalar_lea.hbm %s5665_s9, 64  ;;  %s4253_s28 = scalar_lea.hbm %s5743_s5, 128 }
 0x28e   : > { %p4250_p4 = scmp.ne.s32.totalorder %s5665_s9, %s4249_s14  ;;  %p4254_p9 = scmp.lt.u32.totalorder %s5665_s9, %s5743_s5 }
 0x28f   : > { %p4255_p10 = scmp.lt.u32.totalorder %s4253_s28, %s4249_s14  ;;  %p4257_p12 = scmp.lt.u32.totalorder %s4249_s14, %s5665_s9 }
 0x290   : > { %p4251_p7 = pnand %p4250_p4, %p4410_p5 }
 0x291   : > { %p4256_p11 = por %p4255_p10, %p4254_p9 }
 0x292   : > { %p4252_p8 = pneg %p4251_p7 }
 0x293   : > { %p4258_p13 = por %p4257_p12, %p4256_p11 }
 0x295   : > { %p4259_p0 = pnand %p4258_p13, %p4252_p8 }
 0x297   : > { %4262 = shalt.err (!%p4259_p0)
}
 0x298   : > { %4107 = dma.vmem_to_hbm [thread:$0]  (%p4410_p5), %s3848_s10, 64, %s5665_s9, %s3829_s11   ;;  %v4033_v14 = vld [vmem:[%s5742_s4] ss:$0 sm:$0xff] }
 0x299   : > { %s273_s18 = scalar_lea.vmem [#allocation4], %s3955_s13  ;;  %s5695_s9 = scalar_lea.hbm %s5744_s6, %s4044_s26 }
 0x29a   : > { %s3860_s14 = sshll.u32 %s273_s18, 4  ;;  %s3834_s10 = scalar_lea.sflag [#allocation5], %s5625_s12  ;;  %s5697_s14 = int_to_ptr.vmem [resolvable:$true] %s3860_s14 }
 0x29b   : > { %s4263_s11 = scalar_lea.vmem %s5697_s14, 64  ;;  %s4336_s13 = smov [#allocation4]  }
 0x29c   : > { %p4264_p1 = scmp.ne.s32.totalorder %s5697_s14, %s4263_s11  ;;  %s4267_s28 = sshll.u32 %s4336_s13, 4  ;;  %s4268_s28 = int_to_ptr.vmem [resolvable:$false] %s4267_s28 }
 0x29d   : > { %s4269_s25 = scalar_lea.vmem %s4268_s28, 128  ;;  %p4270_p4 = scmp.lt.s32.totalorder %s5697_s14, %s4268_s28 }
 0x29e   : > { %p4265_p2 = pnand %p4264_p1, %p4410_p5  ;;  %p4271_p7 = scmp.lt.s32.totalorder %s4269_s25, %s4263_s11 }
 0x2a0   : > { %p4266_p3 = pneg %p4265_p2  ;;  %p4272_p8 = por %p4271_p7, %p4270_p4 }
 0x2a2   : > { %p4273_p9 = pnand %p4272_p8, %p4266_p3 }
 0x35e   : > { %v3819_v31 = vpop.f32.mrb[0].mxu1 }
 0x35f   : > { %v3820_v12 = vadd.f32 %v4033_v14, %v3819_v31  ;;  %v4105_v56 = vpop.f32.mrb[1].mxu1 }
 0x360   : > { %v3822_v0 = vpop.f32.mrb[2].mxu1 }
 0x361   : > { %v3825_v37 = vmax.f32 %v3820_v12, 0.0  ;;  %v4106_v22 = vpop.f32.mrb[3].mxu1 }
 0x363   : > { %v3826_v50 = vpack.c.bf16 %v3825_v37, %v3825_v37 }
 0x365   : > { %3827 = vst [vmem:[%s273_s18] sm:$0xf] %v3826_v50 }
 0x366   : > { %4276 = shalt.err (!%p4273_p9)
}
 0x367   : > { %s4277_s12 = scalar_lea.hbm %s5695_s9, 64  ;;  %s4281_s16 = scalar_lea.hbm %s5744_s6, 128 }
 0x368   : > { %p4278_p10 = scmp.ne.s32.totalorder %s5695_s9, %s4277_s12  ;;  %p4282_p13 = scmp.lt.u32.totalorder %s5695_s9, %s5744_s6 }
 0x369   : > { %p4283_p0 = scmp.lt.u32.totalorder %s4281_s16, %s4277_s12  ;;  %p4285_p2 = scmp.lt.u32.totalorder %s4277_s12, %s5695_s9 }
 0x36a   : > { %p4279_p11 = pnand %p4278_p10, %p4410_p5 }
 0x36b   : > { %p4284_p1 = por %p4283_p0, %p4282_p13 }
 0x36c   : > { %p4280_p12 = pneg %p4279_p11 }
 0x36d   : > { %p4286_p3 = por %p4285_p2, %p4284_p1 }
 0x36f   : > { %p4287_p4 = pnand %p4286_p3, %p4280_p12 }
 0x371   : > { %4290 = shalt.err (!%p4287_p4)
}
 0x372   : > { %4108 = dma.vmem_to_hbm [thread:$0]  (%p4410_p5), %s5697_s14, 64, %s5695_s9, %s3834_s10  }
 0x373 PF: > { %p4118_p7 = scmp.ge.s32.totalorder %s4329_s24, 2  ;;  %s3872_s18 = sand.u32 1, %s4317_s21  }
 0x374   : > { %s3873_s19 = scalar_lea.sflag [#allocation3], %s3872_s18 }
 0x375   : > { %p4112_p8 = pnand %p4118_p7, %p4414_p6 }
 0x377   : > { %4308 = dma.done.wait (!%p4112_p8), %s3873_s19, 64  }
 0x378   : > { %4310 = vsyncadd (!%p4112_p8), %s3873_s19, 4294967232  ;;  %s3882_s20 = scalar_lea.sflag [#allocation5], %s3872_s18 }
 0x379   : > { %4312 = dma.done.wait (!%p4112_p8), %s3882_s20, 64  }
 0x37a   : > { %4314 = vsyncadd (!%p4112_p8), %s3882_s20, 4294967232  ;;  %p20_p5 = scmp.ge.s32.totalorder %s4397_s27, 4   ;;  %s5747_s21 = smov %s4321_s22 }
 0x37b   : > { %s5748_s22 = smov %s4325_s23  ;;  %s5749_s23 = smov %s4408_s30 }
 0x37c   : > { %s5750_s24 = smov %s4397_s27  ;;  %22 = sbr.rel (!%p20_p5) target bundleno = 5 (0x5), region = 92 }
 0x383   :  { %3887 = vsyncpa [#allocation3], 1 }
 0x384   :  { %3889 = vsyncpa [#allocation3 + $0x1], 1 }
 0x385   :  { %3890 = vsyncpa [#allocation5], 1 }
 0x386   :  { %3892 = vsyncpa [#allocation5 + $0x1], 1 }

</bundles_post_ra>
